<compile_context>
chip_gen: v6e
topology: v6e:2x2x1
jax: 0.10.0
libtpu: 0.0.40
codegen_flags: <defaults>
</compile_context>

<pallas_src>
import functools

import jax
import jax.numpy as jnp
import numpy as np
from jax.experimental import pallas as pl
from jax.experimental.pallas import tpu as pltpu

IOTA = 0.5    # tversky_percent  (unused in forward, kept for parity)
MU = 0.5      # boundary_percent (unused in forward, kept for parity)
ALPHA = 0.5
BETA = 0.5
SMOOTH = 1.0
EPS = 1e-7


def _shift_fill0(x, d, axis):
  """y[..., i, ...] = x[..., i + d, ...] if in bounds, else 0 (no wraparound)."""
  if d == 0:
    return x
  n = x.shape[axis]
  if abs(d) >= n:
    return jnp.zeros_like(x)
  pad_shape = list(x.shape)
  pad_shape[axis] = abs(d)
  zeros = jnp.zeros(pad_shape, x.dtype)
  idx = [slice(None)] * x.ndim
  if d > 0:
    idx[axis] = slice(d, None)
    return jnp.concatenate([x[tuple(idx)], zeros], axis=axis)
  idx[axis] = slice(None, d)          # d < 0  ->  x[..., :n+d, ...]
  return jnp.concatenate([zeros, x[tuple(idx)]], axis=axis)


def _maxpool2d_same(x, k):
  """Stride-1 'same' k x k max-pool of a 2-D (H, W) array, separable.

  NOTE: assumes x >= 0 everywhere (true for every quantity pooled here:
  1-g, 1-s, gt_b, pred_b), so the 0-fill of out-of-bounds taps is numerically
  identical to PyTorch max_pool2d's implicit -inf padding (the window always
  contains the in-bounds center element).
  """
  p = (k - 1) // 2
  # 1 x k pass along the lane (W) axis.
  m = x
  for d in range(1, p + 1):
    m = jnp.maximum(m, _shift_fill0(x, d, axis=1))
    m = jnp.maximum(m, _shift_fill0(x, -d, axis=1))
  # k x 1 pass along the sublane (H) axis.
  out = m
  for d in range(1, p + 1):
    out = jnp.maximum(out, _shift_fill0(m, d, axis=0))
    out = jnp.maximum(out, _shift_fill0(m, -d, axis=0))
  return out


def _stats_kernel(pred_ref, gt_ref, out_ref, *, theta0, theta, tile_nc):
  """pred_ref/gt_ref: (tile_nc, H, W); out_ref: (1, 8, 128) per-step stats."""
  # Hoisted once per grid step, reused by the output packing of every plane.
  row = jax.lax.broadcasted_iota(jnp.int32, (8, 128), 0)   # stat index
  lane = jax.lax.broadcasted_iota(jnp.int32, (8, 128), 1)  # plane-in-step index

  def plane_body(p, acc):
    x = pred_ref[p].astype(jnp.float32)   # logits, (H, W)
    g = gt_ref[p].astype(jnp.float32)     # ground truth, (H, W)

    # sigmoid: exp and reciprocal both run on the EUP slot.
    s = pl.reciprocal(1.0 + jnp.exp(-x), approx=False)

    # --- Tversky partial sums (fp/fn via algebra: one element-wise product) ---
    sum_s = jnp.sum(s)
    sum_g = jnp.sum(g)
    tp = jnp.sum(s * g)
    fp = sum_s - tp                       # = sum((1 - g) * s)
    fn = sum_g - tp                       # = sum(g * (1 - s))

    # --- Boundary-loss partial sums (all pooled quantities are >= 0) ---
    one_m_g = 1.0 - g
    one_m_s = 1.0 - s
    gt_b = _maxpool2d_same(one_m_g, theta0) - one_m_g
    pred_b = _maxpool2d_same(one_m_s, theta0) - one_m_s
    gt_b_ext = _maxpool2d_same(gt_b, theta)
    pred_b_ext = _maxpool2d_same(pred_b, theta)

    sum_pb = jnp.sum(pred_b)
    sum_gb = jnp.sum(gt_b)
    sum_pb_gbe = jnp.sum(pred_b * gt_b_ext)
    sum_pbe_gb = jnp.sum(pred_b_ext * gt_b)

    # Pack the 7 scalars into sublane rows of lane `p` of the stats tile.
    vals = (tp, fp, fn, sum_pb, sum_gb, sum_pb_gbe, sum_pbe_gb)
    stat_rows = jnp.zeros((8, 128), jnp.float32)
    for r, v in enumerate(vals):
      stat_rows = stat_rows + jnp.where(row == r, v, 0.0)
    return acc + jnp.where(lane == p, stat_rows, 0.0)

  acc = jax.lax.fori_loop(0, tile_nc, plane_body,
                          jnp.zeros((8, 128), jnp.float32),
                          unroll=True if tile_nc <= 8 else 4)
  out_ref[0] = acc


def _pick_tile_nc(nc, plane_bytes):
  """Planes per grid step: ~1 MiB input blocks, divisor of nc, <=128, >=2 steps."""
  target_bytes = 1 << 20
  t = max(1, min(nc, 128, target_bytes // max(1, plane_bytes)))
  while nc % t:
    t -= 1
  if t == nc and nc >= 2:   # keep >= 2 grid steps so both v7x TensorCores get work
    t = nc // 2
    while nc % t:
      t -= 1
  return max(t, 1)


def tversky_boundary_loss(pred, gt, weights, *, theta0=3, theta=5,
                          smooth=SMOOTH, alpha=ALPHA, beta=BETA):
  """Equivalent of TverskyBoundaryLoss.forward (target same shape as input)."""
  n, c, h, w = pred.shape
  nc = n * c
  # No up-front astype: inputs travel over HBM in their native dtype (bf16/int
  # welcome) and are upcast to f32 inside the kernel.
  pred_p = pred.reshape(nc, h, w)
  gt_p = gt.reshape(nc, h, w)

  tile_nc = _pick_tile_nc(nc, h * w * jnp.dtype(pred.dtype).itemsize)
  num_tiles = nc // tile_nc

  kernel = functools.partial(_stats_kernel, theta0=theta0, theta=theta,
                             tile_nc=tile_nc)
  # TODO(synk): for very large H*W planes (v7x, 64 MiB VMEM) tile over H with a
  # ((theta0-1)//2 + (theta-1)//2)-row halo instead of whole-plane blocks.
  stats = pl.pallas_call(
      kernel,
      out_shape=jax.ShapeDtypeStruct((num_tiles, 8, 128), jnp.float32),
      grid=(num_tiles,),
      in_specs=[
          pl.BlockSpec((tile_nc, h, w), lambda t: (t, 0, 0)),
          pl.BlockSpec((tile_nc, h, w), lambda t: (t, 0, 0)),
      ],
      out_specs=pl.BlockSpec((1, 8, 128), lambda t: (t, 0, 0)),
      compiler_params=pltpu.CompilerParams(
          dimension_semantics=("parallel",)),
  )(pred_p, gt_p)

  # stats[t, r, l] = stat r of plane (t * tile_nc + l), for l < tile_nc.
  stats = jnp.transpose(stats[:, :, :tile_nc], (0, 2, 1)).reshape(nc, 8)

  # Tversky loss (global flat reduction = sum of per-plane partials).
  tp = jnp.sum(stats[:, 0])
  fp = jnp.sum(stats[:, 1])
  fn = jnp.sum(stats[:, 2])
  tversky = (tp + smooth) / (tp + alpha * fp + beta * fn + smooth)
  tversky_loss = 1.0 - tversky

  # Boundary loss (per (n, c) plane, then mean over planes).
  sum_pb, sum_gb = stats[:, 3], stats[:, 4]
  sum_pb_gbe, sum_pbe_gb = stats[:, 5], stats[:, 6]
  P = sum_pb_gbe / (sum_pb + EPS)
  R = sum_pbe_gb / (sum_gb + EPS)
  bf1 = 2.0 * P * R / (P + R + EPS)
  boundary_loss = jnp.mean(1.0 - bf1)

  wts = jax.nn.softmax(weights)   # nn.Parameter(torch.ones(2)/2) -> [0.5, 0.5]
  return wts[0] * tversky_loss + wts[1] * boundary_loss


def _reference_loss(pred, gt, weights, theta0=3, theta=5):
  """Pure-JAX reference mirroring the PyTorch forward exactly."""
  s = jax.nn.sigmoid(pred.astype(jnp.float32))
  g = gt.astype(jnp.float32)

  def mp(x, k):
    p = (k - 1) // 2
    return jax.lax.reduce_window(
        x, -jnp.inf, jax.lax.max,
        window_dimensions=(1, 1, k, k), window_strides=(1, 1, 1, 1),
        padding=((0, 0), (0, 0), (p, p), (p, p)))

  gt_b = mp(1.0 - g, theta0) - (1.0 - g)
  pred_b = mp(1.0 - s, theta0) - (1.0 - s)
  gt_b_ext = mp(gt_b, theta)
  pred_b_ext = mp(pred_b, theta)
  n, c, h, w = pred.shape
  pb = pred_b.reshape(n, c, -1)
  gb = gt_b.reshape(n, c, -1)
  gbe = gt_b_ext.reshape(n, c, -1)
  pbe = pred_b_ext.reshape(n, c, -1)
  P = jnp.sum(pb * gbe, -1) / (jnp.sum(pb, -1) + EPS)
  R = jnp.sum(pbe * gb, -1) / (jnp.sum(gb, -1) + EPS)
  bf1 = 2.0 * P * R / (P + R + EPS)
  boundary = jnp.mean(1.0 - bf1)

  si, ti = s.reshape(-1), g.reshape(-1)
  TP = jnp.sum(si * ti)
  FP = jnp.sum((1.0 - ti) * si)
  FN = jnp.sum(ti * (1.0 - si))
  tversky = 1.0 - (TP + SMOOTH) / (TP + ALPHA * FP + BETA * FN + SMOOTH)

  w = jax.nn.softmax(weights)
  return w[0] * tversky + w[1] * boundary


if __name__ == "__main__":
  key = jax.random.PRNGKey(0)
  k1, k2 = jax.random.split(key)
  N, C, H, W = 2, 4, 16, 128
  pred = jax.random.normal(k1, (N, C, H, W), dtype=jnp.float32)       # logits
  gt = (jax.random.uniform(k2, (N, C, H, W)) > 0.5).astype(jnp.float32)
  # Deterministic parameter init, same as nn.Parameter(torch.ones(2) / 2).
  weights = jnp.ones((2,), jnp.float32) / 2.0

  loss = tversky_boundary_loss(pred, gt, weights)
  jax.block_until_ready(loss)

  ref = _reference_loss(pred, gt, weights)
  np.testing.assert_allclose(np.asarray(loss), np.asarray(ref),
                             rtol=1e-4, atol=1e-5)
  print("KERNEL_OK")
</pallas_src>

<mosaic_0001>
module attributes {stable_mosaic.version = 11 : i64} {
  func.func @_stats_kernel(%arg0: i32, %arg1: memref<4x16x128xf32, #tpu.memory_space<vmem>>, %arg2: memref<4x16x128xf32, #tpu.memory_space<vmem>>, %arg3: memref<1x8x128xf32, #tpu.memory_space<vmem>>) attributes {dimension_semantics = [#tpu.dimension_semantics<parallel>], iteration_bounds = array<i64: 2>, scalar_prefetch = 0 : i64, scratch_operands = 0 : i64, tpu.core_type = #tpu.core_type<tc>, window_params = [{transform_indices = @transform_0, window_bounds = array<i64: 4, 16, 128>}, {transform_indices = @transform_1, window_bounds = array<i64: 4, 16, 128>}, {transform_indices = @transform_2, window_bounds = array<i64: 1, 8, 128>}]} {
    %0 = tpu.iota {dimensions = array<i32: 0>} : vector<8x128xi32>
    %1 = tpu.iota {dimensions = array<i32: 1>} : vector<8x128xi32>
    %cst = arith.constant 0.000000e+00 : f32
    %2 = vector.broadcast %cst : f32 to vector<8x128xf32>
    %c0_i32 = arith.constant 0 : i32
    %3 = arith.index_cast %c0_i32 : i32 to index
    %c0 = arith.constant 0 : index
    %c0_0 = arith.constant 0 : index
    %4 = vector.load %arg1[%3, %c0, %c0_0] : memref<4x16x128xf32, #tpu.memory_space<vmem>>, vector<1x16x128xf32>
    %5 = vector.shape_cast %4 : vector<1x16x128xf32> to vector<16x128xf32>
    %6 = arith.index_cast %c0_i32 : i32 to index
    %c0_1 = arith.constant 0 : index
    %c0_2 = arith.constant 0 : index
    %7 = vector.load %arg2[%6, %c0_1, %c0_2] : memref<4x16x128xf32, #tpu.memory_space<vmem>>, vector<1x16x128xf32>
    %8 = vector.shape_cast %7 : vector<1x16x128xf32> to vector<16x128xf32>
    %cst_3 = arith.constant 0.000000e+00 : f32
    %9 = vector.broadcast %cst_3 : f32 to vector<16x128xf32>
    %10 = arith.subf %9, %5 : vector<16x128xf32>
    %11 = math.exp %10 : vector<16x128xf32>
    %cst_4 = arith.constant 1.000000e+00 : f32
    %12 = vector.broadcast %cst_4 : f32 to vector<16x128xf32>
    %13 = arith.addf %12, %11 : vector<16x128xf32>
    %14 = tpu.reciprocal %13 : vector<16x128xf32> -> vector<16x128xf32>
    %15 = vector.shape_cast %14 : vector<16x128xf32> to vector<1x16x128xf32>
    %cst_5 = arith.constant dense<0.000000e+00> : vector<1xf32>
    %16 = vector.multi_reduction <add>, %15, %cst_5 [1, 2] : vector<1x16x128xf32> to vector<1xf32>
    %17 = vector.shape_cast %16 : vector<1xf32> to vector<1x1x1xf32>
    %18 = vector.extract %17[0, 0, 0] : f32 from vector<1x1x1xf32>
    %19 = vector.shape_cast %8 : vector<16x128xf32> to vector<1x16x128xf32>
    %cst_6 = arith.constant dense<0.000000e+00> : vector<1xf32>
    %20 = vector.multi_reduction <add>, %19, %cst_6 [1, 2] : vector<1x16x128xf32> to vector<1xf32>
    %21 = vector.shape_cast %20 : vector<1xf32> to vector<1x1x1xf32>
    %22 = vector.extract %21[0, 0, 0] : f32 from vector<1x1x1xf32>
    %23 = arith.mulf %14, %8 : vector<16x128xf32>
    %24 = vector.shape_cast %23 : vector<16x128xf32> to vector<1x16x128xf32>
    %cst_7 = arith.constant dense<0.000000e+00> : vector<1xf32>
    %25 = vector.multi_reduction <add>, %24, %cst_7 [1, 2] : vector<1x16x128xf32> to vector<1xf32>
    %26 = vector.shape_cast %25 : vector<1xf32> to vector<1x1x1xf32>
    %27 = vector.extract %26[0, 0, 0] : f32 from vector<1x1x1xf32>
    %28 = arith.subf %18, %27 : f32
    %29 = arith.subf %22, %27 : f32
    %cst_8 = arith.constant 1.000000e+00 : f32
    %30 = vector.broadcast %cst_8 : f32 to vector<16x128xf32>
    %31 = arith.subf %30, %8 : vector<16x128xf32>
    %cst_9 = arith.constant 1.000000e+00 : f32
    %32 = vector.broadcast %cst_9 : f32 to vector<16x128xf32>
    %33 = arith.subf %32, %14 : vector<16x128xf32>
    %cst_10 = arith.constant 0.000000e+00 : f32
    %34 = vector.broadcast %cst_10 : f32 to vector<16x1xf32>
    %35 = vector.extract_strided_slice %31 {offsets = [0, 1], sizes = [16, 127], strides = [1, 1]} : vector<16x128xf32> to vector<16x127xf32>
    %36 = tpu.concatenate %35, %34 in 1 : vector<16x127xf32>, vector<16x1xf32> -> vector<16x128xf32>
    %37 = arith.maximumf %31, %36 : vector<16x128xf32>
    %cst_11 = arith.constant 0.000000e+00 : f32
    %38 = vector.broadcast %cst_11 : f32 to vector<16x1xf32>
    %39 = vector.extract_strided_slice %31 {offsets = [0, 0], sizes = [16, 127], strides = [1, 1]} : vector<16x128xf32> to vector<16x127xf32>
    %40 = tpu.concatenate %38, %39 in 1 : vector<16x1xf32>, vector<16x127xf32> -> vector<16x128xf32>
    %41 = arith.maximumf %37, %40 : vector<16x128xf32>
    %cst_12 = arith.constant 0.000000e+00 : f32
    %42 = vector.broadcast %cst_12 : f32 to vector<1x128xf32>
    %43 = vector.extract_strided_slice %41 {offsets = [1, 0], sizes = [15, 128], strides = [1, 1]} : vector<16x128xf32> to vector<15x128xf32>
    %44 = tpu.concatenate %43, %42 in 0 : vector<15x128xf32>, vector<1x128xf32> -> vector<16x128xf32>
    %45 = arith.maximumf %41, %44 : vector<16x128xf32>
    %cst_13 = arith.constant 0.000000e+00 : f32
    %46 = vector.broadcast %cst_13 : f32 to vector<1x128xf32>
    %47 = vector.extract_strided_slice %41 {offsets = [0, 0], sizes = [15, 128], strides = [1, 1]} : vector<16x128xf32> to vector<15x128xf32>
    %48 = tpu.concatenate %46, %47 in 0 : vector<1x128xf32>, vector<15x128xf32> -> vector<16x128xf32>
    %49 = arith.maximumf %45, %48 : vector<16x128xf32>
    %50 = arith.subf %49, %31 : vector<16x128xf32>
    %cst_14 = arith.constant 0.000000e+00 : f32
    %51 = vector.broadcast %cst_14 : f32 to vector<16x1xf32>
    %52 = vector.extract_strided_slice %33 {offsets = [0, 1], sizes = [16, 127], strides = [1, 1]} : vector<16x128xf32> to vector<16x127xf32>
    %53 = tpu.concatenate %52, %51 in 1 : vector<16x127xf32>, vector<16x1xf32> -> vector<16x128xf32>
    %54 = arith.maximumf %33, %53 : vector<16x128xf32>
    %cst_15 = arith.constant 0.000000e+00 : f32
    %55 = vector.broadcast %cst_15 : f32 to vector<16x1xf32>
    %56 = vector.extract_strided_slice %33 {offsets = [0, 0], sizes = [16, 127], strides = [1, 1]} : vector<16x128xf32> to vector<16x127xf32>
    %57 = tpu.concatenate %55, %56 in 1 : vector<16x1xf32>, vector<16x127xf32> -> vector<16x128xf32>
    %58 = arith.maximumf %54, %57 : vector<16x128xf32>
    %cst_16 = arith.constant 0.000000e+00 : f32
    %59 = vector.broadcast %cst_16 : f32 to vector<1x128xf32>
    %60 = vector.extract_strided_slice %58 {offsets = [1, 0], sizes = [15, 128], strides = [1, 1]} : vector<16x128xf32> to vector<15x128xf32>
    %61 = tpu.concatenate %60, %59 in 0 : vector<15x128xf32>, vector<1x128xf32> -> vector<16x128xf32>
    %62 = arith.maximumf %58, %61 : vector<16x128xf32>
    %cst_17 = arith.constant 0.000000e+00 : f32
    %63 = vector.broadcast %cst_17 : f32 to vector<1x128xf32>
    %64 = vector.extract_strided_slice %58 {offsets = [0, 0], sizes = [15, 128], strides = [1, 1]} : vector<16x128xf32> to vector<15x128xf32>
    %65 = tpu.concatenate %63, %64 in 0 : vector<1x128xf32>, vector<15x128xf32> -> vector<16x128xf32>
    %66 = arith.maximumf %62, %65 : vector<16x128xf32>
    %67 = arith.subf %66, %33 : vector<16x128xf32>
    %cst_18 = arith.constant 0.000000e+00 : f32
    %68 = vector.broadcast %cst_18 : f32 to vector<16x1xf32>
    %69 = vector.extract_strided_slice %50 {offsets = [0, 1], sizes = [16, 127], strides = [1, 1]} : vector<16x128xf32> to vector<16x127xf32>
    %70 = tpu.concatenate %69, %68 in 1 : vector<16x127xf32>, vector<16x1xf32> -> vector<16x128xf32>
    %71 = arith.maximumf %50, %70 : vector<16x128xf32>
    %cst_19 = arith.constant 0.000000e+00 : f32
    %72 = vector.broadcast %cst_19 : f32 to vector<16x1xf32>
    %73 = vector.extract_strided_slice %50 {offsets = [0, 0], sizes = [16, 127], strides = [1, 1]} : vector<16x128xf32> to vector<16x127xf32>
    %74 = tpu.concatenate %72, %73 in 1 : vector<16x1xf32>, vector<16x127xf32> -> vector<16x128xf32>
    %75 = arith.maximumf %71, %74 : vector<16x128xf32>
    %cst_20 = arith.constant 0.000000e+00 : f32
    %76 = vector.broadcast %cst_20 : f32 to vector<16x2xf32>
    %77 = vector.extract_strided_slice %50 {offsets = [0, 2], sizes = [16, 126], strides = [1, 1]} : vector<16x128xf32> to vector<16x126xf32>
    %78 = tpu.concatenate %77, %76 in 1 : vector<16x126xf32>, vector<16x2xf32> -> vector<16x128xf32>
    %79 = arith.maximumf %75, %78 : vector<16x128xf32>
    %cst_21 = arith.constant 0.000000e+00 : f32
    %80 = vector.broadcast %cst_21 : f32 to vector<16x2xf32>
    %81 = vector.extract_strided_slice %50 {offsets = [0, 0], sizes = [16, 126], strides = [1, 1]} : vector<16x128xf32> to vector<16x126xf32>
    %82 = tpu.concatenate %80, %81 in 1 : vector<16x2xf32>, vector<16x126xf32> -> vector<16x128xf32>
    %83 = arith.maximumf %79, %82 : vector<16x128xf32>
    %cst_22 = arith.constant 0.000000e+00 : f32
    %84 = vector.broadcast %cst_22 : f32 to vector<1x128xf32>
    %85 = vector.extract_strided_slice %83 {offsets = [1, 0], sizes = [15, 128], strides = [1, 1]} : vector<16x128xf32> to vector<15x128xf32>
    %86 = tpu.concatenate %85, %84 in 0 : vector<15x128xf32>, vector<1x128xf32> -> vector<16x128xf32>
    %87 = arith.maximumf %83, %86 : vector<16x128xf32>
    %cst_23 = arith.constant 0.000000e+00 : f32
    %88 = vector.broadcast %cst_23 : f32 to vector<1x128xf32>
    %89 = vector.extract_strided_slice %83 {offsets = [0, 0], sizes = [15, 128], strides = [1, 1]} : vector<16x128xf32> to vector<15x128xf32>
    %90 = tpu.concatenate %88, %89 in 0 : vector<1x128xf32>, vector<15x128xf32> -> vector<16x128xf32>
    %91 = arith.maximumf %87, %90 : vector<16x128xf32>
    %cst_24 = arith.constant 0.000000e+00 : f32
    %92 = vector.broadcast %cst_24 : f32 to vector<2x128xf32>
    %93 = vector.extract_strided_slice %83 {offsets = [2, 0], sizes = [14, 128], strides = [1, 1]} : vector<16x128xf32> to vector<14x128xf32>
    %94 = tpu.concatenate %93, %92 in 0 : vector<14x128xf32>, vector<2x128xf32> -> vector<16x128xf32>
    %95 = arith.maximumf %91, %94 : vector<16x128xf32>
    %cst_25 = arith.constant 0.000000e+00 : f32
    %96 = vector.broadcast %cst_25 : f32 to vector<2x128xf32>
    %97 = vector.extract_strided_slice %83 {offsets = [0, 0], sizes = [14, 128], strides = [1, 1]} : vector<16x128xf32> to vector<14x128xf32>
    %98 = tpu.concatenate %96, %97 in 0 : vector<2x128xf32>, vector<14x128xf32> -> vector<16x128xf32>
    %99 = arith.maximumf %95, %98 : vector<16x128xf32>
    %cst_26 = arith.constant 0.000000e+00 : f32
    %100 = vector.broadcast %cst_26 : f32 to vector<16x1xf32>
    %101 = vector.extract_strided_slice %67 {offsets = [0, 1], sizes = [16, 127], strides = [1, 1]} : vector<16x128xf32> to vector<16x127xf32>
    %102 = tpu.concatenate %101, %100 in 1 : vector<16x127xf32>, vector<16x1xf32> -> vector<16x128xf32>
    %103 = arith.maximumf %67, %102 : vector<16x128xf32>
    %cst_27 = arith.constant 0.000000e+00 : f32
    %104 = vector.broadcast %cst_27 : f32 to vector<16x1xf32>
    %105 = vector.extract_strided_slice %67 {offsets = [0, 0], sizes = [16, 127], strides = [1, 1]} : vector<16x128xf32> to vector<16x127xf32>
    %106 = tpu.concatenate %104, %105 in 1 : vector<16x1xf32>, vector<16x127xf32> -> vector<16x128xf32>
    %107 = arith.maximumf %103, %106 : vector<16x128xf32>
    %cst_28 = arith.constant 0.000000e+00 : f32
    %108 = vector.broadcast %cst_28 : f32 to vector<16x2xf32>
    %109 = vector.extract_strided_slice %67 {offsets = [0, 2], sizes = [16, 126], strides = [1, 1]} : vector<16x128xf32> to vector<16x126xf32>
    %110 = tpu.concatenate %109, %108 in 1 : vector<16x126xf32>, vector<16x2xf32> -> vector<16x128xf32>
    %111 = arith.maximumf %107, %110 : vector<16x128xf32>
    %cst_29 = arith.constant 0.000000e+00 : f32
    %112 = vector.broadcast %cst_29 : f32 to vector<16x2xf32>
    %113 = vector.extract_strided_slice %67 {offsets = [0, 0], sizes = [16, 126], strides = [1, 1]} : vector<16x128xf32> to vector<16x126xf32>
    %114 = tpu.concatenate %112, %113 in 1 : vector<16x2xf32>, vector<16x126xf32> -> vector<16x128xf32>
    %115 = arith.maximumf %111, %114 : vector<16x128xf32>
    %cst_30 = arith.constant 0.000000e+00 : f32
    %116 = vector.broadcast %cst_30 : f32 to vector<1x128xf32>
    %117 = vector.extract_strided_slice %115 {offsets = [1, 0], sizes = [15, 128], strides = [1, 1]} : vector<16x128xf32> to vector<15x128xf32>
    %118 = tpu.concatenate %117, %116 in 0 : vector<15x128xf32>, vector<1x128xf32> -> vector<16x128xf32>
    %119 = arith.maximumf %115, %118 : vector<16x128xf32>
    %cst_31 = arith.constant 0.000000e+00 : f32
    %120 = vector.broadcast %cst_31 : f32 to vector<1x128xf32>
    %121 = vector.extract_strided_slice %115 {offsets = [0, 0], sizes = [15, 128], strides = [1, 1]} : vector<16x128xf32> to vector<15x128xf32>
    %122 = tpu.concatenate %120, %121 in 0 : vector<1x128xf32>, vector<15x128xf32> -> vector<16x128xf32>
    %123 = arith.maximumf %119, %122 : vector<16x128xf32>
    %cst_32 = arith.constant 0.000000e+00 : f32
    %124 = vector.broadcast %cst_32 : f32 to vector<2x128xf32>
    %125 = vector.extract_strided_slice %115 {offsets = [2, 0], sizes = [14, 128], strides = [1, 1]} : vector<16x128xf32> to vector<14x128xf32>
    %126 = tpu.concatenate %125, %124 in 0 : vector<14x128xf32>, vector<2x128xf32> -> vector<16x128xf32>
    %127 = arith.maximumf %123, %126 : vector<16x128xf32>
    %cst_33 = arith.constant 0.000000e+00 : f32
    %128 = vector.broadcast %cst_33 : f32 to vector<2x128xf32>
    %129 = vector.extract_strided_slice %115 {offsets = [0, 0], sizes = [14, 128], strides = [1, 1]} : vector<16x128xf32> to vector<14x128xf32>
    %130 = tpu.concatenate %128, %129 in 0 : vector<2x128xf32>, vector<14x128xf32> -> vector<16x128xf32>
    %131 = arith.maximumf %127, %130 : vector<16x128xf32>
    %132 = vector.shape_cast %67 : vector<16x128xf32> to vector<1x16x128xf32>
    %cst_34 = arith.constant dense<0.000000e+00> : vector<1xf32>
    %133 = vector.multi_reduction <add>, %132, %cst_34 [1, 2] : vector<1x16x128xf32> to vector<1xf32>
    %134 = vector.shape_cast %133 : vector<1xf32> to vector<1x1x1xf32>
    %135 = vector.extract %134[0, 0, 0] : f32 from vector<1x1x1xf32>
    %136 = vector.shape_cast %50 : vector<16x128xf32> to vector<1x16x128xf32>
    %cst_35 = arith.constant dense<0.000000e+00> : vector<1xf32>
    %137 = vector.multi_reduction <add>, %136, %cst_35 [1, 2] : vector<1x16x128xf32> to vector<1xf32>
    %138 = vector.shape_cast %137 : vector<1xf32> to vector<1x1x1xf32>
    %139 = vector.extract %138[0, 0, 0] : f32 from vector<1x1x1xf32>
    %140 = arith.mulf %67, %99 : vector<16x128xf32>
    %141 = vector.shape_cast %140 : vector<16x128xf32> to vector<1x16x128xf32>
    %cst_36 = arith.constant dense<0.000000e+00> : vector<1xf32>
    %142 = vector.multi_reduction <add>, %141, %cst_36 [1, 2] : vector<1x16x128xf32> to vector<1xf32>
    %143 = vector.shape_cast %142 : vector<1xf32> to vector<1x1x1xf32>
    %144 = vector.extract %143[0, 0, 0] : f32 from vector<1x1x1xf32>
    %145 = arith.mulf %131, %50 : vector<16x128xf32>
    %146 = vector.shape_cast %145 : vector<16x128xf32> to vector<1x16x128xf32>
    %cst_37 = arith.constant dense<0.000000e+00> : vector<1xf32>
    %147 = vector.multi_reduction <add>, %146, %cst_37 [1, 2] : vector<1x16x128xf32> to vector<1xf32>
    %148 = vector.shape_cast %147 : vector<1xf32> to vector<1x1x1xf32>
    %149 = vector.extract %148[0, 0, 0] : f32 from vector<1x1x1xf32>
    %cst_38 = arith.constant 0.000000e+00 : f32
    %150 = vector.broadcast %cst_38 : f32 to vector<8x128xf32>
    %c0_i32_39 = arith.constant 0 : i32
    %151 = vector.broadcast %c0_i32_39 : i32 to vector<8x128xi32>
    %152 = arith.cmpi eq, %0, %151 : vector<8x128xi32>
    %cst_40 = arith.constant 0.000000e+00 : f32
    %153 = vector.broadcast %27 : f32 to vector<8x128xf32>
    %154 = vector.broadcast %cst_40 : f32 to vector<8x128xf32>
    %155 = arith.select %152, %153, %154 : vector<8x128xi1>, vector<8x128xf32>
    %156 = arith.addf %150, %155 : vector<8x128xf32>
    %c1_i32 = arith.constant 1 : i32
    %157 = vector.broadcast %c1_i32 : i32 to vector<8x128xi32>
    %158 = arith.cmpi eq, %0, %157 : vector<8x128xi32>
    %cst_41 = arith.constant 0.000000e+00 : f32
    %159 = vector.broadcast %28 : f32 to vector<8x128xf32>
    %160 = vector.broadcast %cst_41 : f32 to vector<8x128xf32>
    %161 = arith.select %158, %159, %160 : vector<8x128xi1>, vector<8x128xf32>
    %162 = arith.addf %156, %161 : vector<8x128xf32>
    %c2_i32 = arith.constant 2 : i32
    %163 = vector.broadcast %c2_i32 : i32 to vector<8x128xi32>
    %164 = arith.cmpi eq, %0, %163 : vector<8x128xi32>
    %cst_42 = arith.constant 0.000000e+00 : f32
    %165 = vector.broadcast %29 : f32 to vector<8x128xf32>
    %166 = vector.broadcast %cst_42 : f32 to vector<8x128xf32>
    %167 = arith.select %164, %165, %166 : vector<8x128xi1>, vector<8x128xf32>
    %168 = arith.addf %162, %167 : vector<8x128xf32>
    %c3_i32 = arith.constant 3 : i32
    %169 = vector.broadcast %c3_i32 : i32 to vector<8x128xi32>
    %170 = arith.cmpi eq, %0, %169 : vector<8x128xi32>
    %cst_43 = arith.constant 0.000000e+00 : f32
    %171 = vector.broadcast %135 : f32 to vector<8x128xf32>
    %172 = vector.broadcast %cst_43 : f32 to vector<8x128xf32>
    %173 = arith.select %170, %171, %172 : vector<8x128xi1>, vector<8x128xf32>
    %174 = arith.addf %168, %173 : vector<8x128xf32>
    %c4_i32 = arith.constant 4 : i32
    %175 = vector.broadcast %c4_i32 : i32 to vector<8x128xi32>
    %176 = arith.cmpi eq, %0, %175 : vector<8x128xi32>
    %cst_44 = arith.constant 0.000000e+00 : f32
    %177 = vector.broadcast %139 : f32 to vector<8x128xf32>
    %178 = vector.broadcast %cst_44 : f32 to vector<8x128xf32>
    %179 = arith.select %176, %177, %178 : vector<8x128xi1>, vector<8x128xf32>
    %180 = arith.addf %174, %179 : vector<8x128xf32>
    %c5_i32 = arith.constant 5 : i32
    %181 = vector.broadcast %c5_i32 : i32 to vector<8x128xi32>
    %182 = arith.cmpi eq, %0, %181 : vector<8x128xi32>
    %cst_45 = arith.constant 0.000000e+00 : f32
    %183 = vector.broadcast %144 : f32 to vector<8x128xf32>
    %184 = vector.broadcast %cst_45 : f32 to vector<8x128xf32>
    %185 = arith.select %182, %183, %184 : vector<8x128xi1>, vector<8x128xf32>
    %186 = arith.addf %180, %185 : vector<8x128xf32>
    %c6_i32 = arith.constant 6 : i32
    %187 = vector.broadcast %c6_i32 : i32 to vector<8x128xi32>
    %188 = arith.cmpi eq, %0, %187 : vector<8x128xi32>
    %cst_46 = arith.constant 0.000000e+00 : f32
    %189 = vector.broadcast %149 : f32 to vector<8x128xf32>
    %190 = vector.broadcast %cst_46 : f32 to vector<8x128xf32>
    %191 = arith.select %188, %189, %190 : vector<8x128xi1>, vector<8x128xf32>
    %192 = arith.addf %186, %191 : vector<8x128xf32>
    %193 = vector.broadcast %c0_i32 : i32 to vector<8x128xi32>
    %194 = arith.cmpi eq, %1, %193 : vector<8x128xi32>
    %cst_47 = arith.constant 0.000000e+00 : f32
    %195 = vector.broadcast %cst_47 : f32 to vector<8x128xf32>
    %196 = arith.select %194, %192, %195 : vector<8x128xi1>, vector<8x128xf32>
    %197 = arith.addf %2, %196 : vector<8x128xf32>
    %c1_i32_48 = arith.constant 1 : i32
    %198 = arith.index_cast %c1_i32_48 : i32 to index
    %c0_49 = arith.constant 0 : index
    %c0_50 = arith.constant 0 : index
    %199 = vector.load %arg1[%198, %c0_49, %c0_50] : memref<4x16x128xf32, #tpu.memory_space<vmem>>, vector<1x16x128xf32>
    %200 = vector.shape_cast %199 : vector<1x16x128xf32> to vector<16x128xf32>
    %201 = arith.index_cast %c1_i32_48 : i32 to index
    %c0_51 = arith.constant 0 : index
    %c0_52 = arith.constant 0 : index
    %202 = vector.load %arg2[%201, %c0_51, %c0_52] : memref<4x16x128xf32, #tpu.memory_space<vmem>>, vector<1x16x128xf32>
    %203 = vector.shape_cast %202 : vector<1x16x128xf32> to vector<16x128xf32>
    %cst_53 = arith.constant 0.000000e+00 : f32
    %204 = vector.broadcast %cst_53 : f32 to vector<16x128xf32>
    %205 = arith.subf %204, %200 : vector<16x128xf32>
    %206 = math.exp %205 : vector<16x128xf32>
    %cst_54 = arith.constant 1.000000e+00 : f32
    %207 = vector.broadcast %cst_54 : f32 to vector<16x128xf32>
    %208 = arith.addf %207, %206 : vector<16x128xf32>
    %209 = tpu.reciprocal %208 : vector<16x128xf32> -> vector<16x128xf32>
    %210 = vector.shape_cast %209 : vector<16x128xf32> to vector<1x16x128xf32>
    %cst_55 = arith.constant dense<0.000000e+00> : vector<1xf32>
    %211 = vector.multi_reduction <add>, %210, %cst_55 [1, 2] : vector<1x16x128xf32> to vector<1xf32>
    %212 = vector.shape_cast %211 : vector<1xf32> to vector<1x1x1xf32>
    %213 = vector.extract %212[0, 0, 0] : f32 from vector<1x1x1xf32>
    %214 = vector.shape_cast %203 : vector<16x128xf32> to vector<1x16x128xf32>
    %cst_56 = arith.constant dense<0.000000e+00> : vector<1xf32>
    %215 = vector.multi_reduction <add>, %214, %cst_56 [1, 2] : vector<1x16x128xf32> to vector<1xf32>
    %216 = vector.shape_cast %215 : vector<1xf32> to vector<1x1x1xf32>
    %217 = vector.extract %216[0, 0, 0] : f32 from vector<1x1x1xf32>
    %218 = arith.mulf %209, %203 : vector<16x128xf32>
    %219 = vector.shape_cast %218 : vector<16x128xf32> to vector<1x16x128xf32>
    %cst_57 = arith.constant dense<0.000000e+00> : vector<1xf32>
    %220 = vector.multi_reduction <add>, %219, %cst_57 [1, 2] : vector<1x16x128xf32> to vector<1xf32>
    %221 = vector.shape_cast %220 : vector<1xf32> to vector<1x1x1xf32>
    %222 = vector.extract %221[0, 0, 0] : f32 from vector<1x1x1xf32>
    %223 = arith.subf %213, %222 : f32
    %224 = arith.subf %217, %222 : f32
    %cst_58 = arith.constant 1.000000e+00 : f32
    %225 = vector.broadcast %cst_58 : f32 to vector<16x128xf32>
    %226 = arith.subf %225, %203 : vector<16x128xf32>
    %cst_59 = arith.constant 1.000000e+00 : f32
    %227 = vector.broadcast %cst_59 : f32 to vector<16x128xf32>
    %228 = arith.subf %227, %209 : vector<16x128xf32>
    %cst_60 = arith.constant 0.000000e+00 : f32
    %229 = vector.broadcast %cst_60 : f32 to vector<16x1xf32>
    %230 = vector.extract_strided_slice %226 {offsets = [0, 1], sizes = [16, 127], strides = [1, 1]} : vector<16x128xf32> to vector<16x127xf32>
    %231 = tpu.concatenate %230, %229 in 1 : vector<16x127xf32>, vector<16x1xf32> -> vector<16x128xf32>
    %232 = arith.maximumf %226, %231 : vector<16x128xf32>
    %cst_61 = arith.constant 0.000000e+00 : f32
    %233 = vector.broadcast %cst_61 : f32 to vector<16x1xf32>
    %234 = vector.extract_strided_slice %226 {offsets = [0, 0], sizes = [16, 127], strides = [1, 1]} : vector<16x128xf32> to vector<16x127xf32>
    %235 = tpu.concatenate %233, %234 in 1 : vector<16x1xf32>, vector<16x127xf32> -> vector<16x128xf32>
    %236 = arith.maximumf %232, %235 : vector<16x128xf32>
    %cst_62 = arith.constant 0.000000e+00 : f32
    %237 = vector.broadcast %cst_62 : f32 to vector<1x128xf32>
    %238 = vector.extract_strided_slice %236 {offsets = [1, 0], sizes = [15, 128], strides = [1, 1]} : vector<16x128xf32> to vector<15x128xf32>
    %239 = tpu.concatenate %238, %237 in 0 : vector<15x128xf32>, vector<1x128xf32> -> vector<16x128xf32>
    %240 = arith.maximumf %236, %239 : vector<16x128xf32>
    %cst_63 = arith.constant 0.000000e+00 : f32
    %241 = vector.broadcast %cst_63 : f32 to vector<1x128xf32>
    %242 = vector.extract_strided_slice %236 {offsets = [0, 0], sizes = [15, 128], strides = [1, 1]} : vector<16x128xf32> to vector<15x128xf32>
    %243 = tpu.concatenate %241, %242 in 0 : vector<1x128xf32>, vector<15x128xf32> -> vector<16x128xf32>
    %244 = arith.maximumf %240, %243 : vector<16x128xf32>
    %245 = arith.subf %244, %226 : vector<16x128xf32>
    %cst_64 = arith.constant 0.000000e+00 : f32
    %246 = vector.broadcast %cst_64 : f32 to vector<16x1xf32>
    %247 = vector.extract_strided_slice %228 {offsets = [0, 1], sizes = [16, 127], strides = [1, 1]} : vector<16x128xf32> to vector<16x127xf32>
    %248 = tpu.concatenate %247, %246 in 1 : vector<16x127xf32>, vector<16x1xf32> -> vector<16x128xf32>
    %249 = arith.maximumf %228, %248 : vector<16x128xf32>
    %cst_65 = arith.constant 0.000000e+00 : f32
    %250 = vector.broadcast %cst_65 : f32 to vector<16x1xf32>
    %251 = vector.extract_strided_slice %228 {offsets = [0, 0], sizes = [16, 127], strides = [1, 1]} : vector<16x128xf32> to vector<16x127xf32>
    %252 = tpu.concatenate %250, %251 in 1 : vector<16x1xf32>, vector<16x127xf32> -> vector<16x128xf32>
    %253 = arith.maximumf %249, %252 : vector<16x128xf32>
    %cst_66 = arith.constant 0.000000e+00 : f32
    %254 = vector.broadcast %cst_66 : f32 to vector<1x128xf32>
    %255 = vector.extract_strided_slice %253 {offsets = [1, 0], sizes = [15, 128], strides = [1, 1]} : vector<16x128xf32> to vector<15x128xf32>
    %256 = tpu.concatenate %255, %254 in 0 : vector<15x128xf32>, vector<1x128xf32> -> vector<16x128xf32>
    %257 = arith.maximumf %253, %256 : vector<16x128xf32>
    %cst_67 = arith.constant 0.000000e+00 : f32
    %258 = vector.broadcast %cst_67 : f32 to vector<1x128xf32>
    %259 = vector.extract_strided_slice %253 {offsets = [0, 0], sizes = [15, 128], strides = [1, 1]} : vector<16x128xf32> to vector<15x128xf32>
    %260 = tpu.concatenate %258, %259 in 0 : vector<1x128xf32>, vector<15x128xf32> -> vector<16x128xf32>
    %261 = arith.maximumf %257, %260 : vector<16x128xf32>
    %262 = arith.subf %261, %228 : vector<16x128xf32>
    %cst_68 = arith.constant 0.000000e+00 : f32
    %263 = vector.broadcast %cst_68 : f32 to vector<16x1xf32>
    %264 = vector.extract_strided_slice %245 {offsets = [0, 1], sizes = [16, 127], strides = [1, 1]} : vector<16x128xf32> to vector<16x127xf32>
    %265 = tpu.concatenate %264, %263 in 1 : vector<16x127xf32>, vector<16x1xf32> -> vector<16x128xf32>
    %266 = arith.maximumf %245, %265 : vector<16x128xf32>
    %cst_69 = arith.constant 0.000000e+00 : f32
    %267 = vector.broadcast %cst_69 : f32 to vector<16x1xf32>
    %268 = vector.extract_strided_slice %245 {offsets = [0, 0], sizes = [16, 127], strides = [1, 1]} : vector<16x128xf32> to vector<16x127xf32>
    %269 = tpu.concatenate %267, %268 in 1 : vector<16x1xf32>, vector<16x127xf32> -> vector<16x128xf32>
    %270 = arith.maximumf %266, %269 : vector<16x128xf32>
    %cst_70 = arith.constant 0.000000e+00 : f32
    %271 = vector.broadcast %cst_70 : f32 to vector<16x2xf32>
    %272 = vector.extract_strided_slice %245 {offsets = [0, 2], sizes = [16, 126], strides = [1, 1]} : vector<16x128xf32> to vector<16x126xf32>
    %273 = tpu.concatenate %272, %271 in 1 : vector<16x126xf32>, vector<16x2xf32> -> vector<16x128xf32>
    %274 = arith.maximumf %270, %273 : vector<16x128xf32>
    %cst_71 = arith.constant 0.000000e+00 : f32
    %275 = vector.broadcast %cst_71 : f32 to vector<16x2xf32>
    %276 = vector.extract_strided_slice %245 {offsets = [0, 0], sizes = [16, 126], strides = [1, 1]} : vector<16x128xf32> to vector<16x126xf32>
    %277 = tpu.concatenate %275, %276 in 1 : vector<16x2xf32>, vector<16x126xf32> -> vector<16x128xf32>
    %278 = arith.maximumf %274, %277 : vector<16x128xf32>
    %cst_72 = arith.constant 0.000000e+00 : f32
    %279 = vector.broadcast %cst_72 : f32 to vector<1x128xf32>
    %280 = vector.extract_strided_slice %278 {offsets = [1, 0], sizes = [15, 128], strides = [1, 1]} : vector<16x128xf32> to vector<15x128xf32>
    %281 = tpu.concatenate %280, %279 in 0 : vector<15x128xf32>, vector<1x128xf32> -> vector<16x128xf32>
    %282 = arith.maximumf %278, %281 : vector<16x128xf32>
    %cst_73 = arith.constant 0.000000e+00 : f32
    %283 = vector.broadcast %cst_73 : f32 to vector<1x128xf32>
    %284 = vector.extract_strided_slice %278 {offsets = [0, 0], sizes = [15, 128], strides = [1, 1]} : vector<16x128xf32> to vector<15x128xf32>
    %285 = tpu.concatenate %283, %284 in 0 : vector<1x128xf32>, vector<15x128xf32> -> vector<16x128xf32>
    %286 = arith.maximumf %282, %285 : vector<16x128xf32>
    %cst_74 = arith.constant 0.000000e+00 : f32
    %287 = vector.broadcast %cst_74 : f32 to vector<2x128xf32>
    %288 = vector.extract_strided_slice %278 {offsets = [2, 0], sizes = [14, 128], strides = [1, 1]} : vector<16x128xf32> to vector<14x128xf32>
    %289 = tpu.concatenate %288, %287 in 0 : vector<14x128xf32>, vector<2x128xf32> -> vector<16x128xf32>
    %290 = arith.maximumf %286, %289 : vector<16x128xf32>
    %cst_75 = arith.constant 0.000000e+00 : f32
    %291 = vector.broadcast %cst_75 : f32 to vector<2x128xf32>
    %292 = vector.extract_strided_slice %278 {offsets = [0, 0], sizes = [14, 128], strides = [1, 1]} : vector<16x128xf32> to vector<14x128xf32>
    %293 = tpu.concatenate %291, %292 in 0 : vector<2x128xf32>, vector<14x128xf32> -> vector<16x128xf32>
    %294 = arith.maximumf %290, %293 : vector<16x128xf32>
    %cst_76 = arith.constant 0.000000e+00 : f32
    %295 = vector.broadcast %cst_76 : f32 to vector<16x1xf32>
    %296 = vector.extract_strided_slice %262 {offsets = [0, 1], sizes = [16, 127], strides = [1, 1]} : vector<16x128xf32> to vector<16x127xf32>
    %297 = tpu.concatenate %296, %295 in 1 : vector<16x127xf32>, vector<16x1xf32> -> vector<16x128xf32>
    %298 = arith.maximumf %262, %297 : vector<16x128xf32>
    %cst_77 = arith.constant 0.000000e+00 : f32
    %299 = vector.broadcast %cst_77 : f32 to vector<16x1xf32>
    %300 = vector.extract_strided_slice %262 {offsets = [0, 0], sizes = [16, 127], strides = [1, 1]} : vector<16x128xf32> to vector<16x127xf32>
    %301 = tpu.concatenate %299, %300 in 1 : vector<16x1xf32>, vector<16x127xf32> -> vector<16x128xf32>
    %302 = arith.maximumf %298, %301 : vector<16x128xf32>
    %cst_78 = arith.constant 0.000000e+00 : f32
    %303 = vector.broadcast %cst_78 : f32 to vector<16x2xf32>
    %304 = vector.extract_strided_slice %262 {offsets = [0, 2], sizes = [16, 126], strides = [1, 1]} : vector<16x128xf32> to vector<16x126xf32>
    %305 = tpu.concatenate %304, %303 in 1 : vector<16x126xf32>, vector<16x2xf32> -> vector<16x128xf32>
    %306 = arith.maximumf %302, %305 : vector<16x128xf32>
    %cst_79 = arith.constant 0.000000e+00 : f32
    %307 = vector.broadcast %cst_79 : f32 to vector<16x2xf32>
    %308 = vector.extract_strided_slice %262 {offsets = [0, 0], sizes = [16, 126], strides = [1, 1]} : vector<16x128xf32> to vector<16x126xf32>
    %309 = tpu.concatenate %307, %308 in 1 : vector<16x2xf32>, vector<16x126xf32> -> vector<16x128xf32>
    %310 = arith.maximumf %306, %309 : vector<16x128xf32>
    %cst_80 = arith.constant 0.000000e+00 : f32
    %311 = vector.broadcast %cst_80 : f32 to vector<1x128xf32>
    %312 = vector.extract_strided_slice %310 {offsets = [1, 0], sizes = [15, 128], strides = [1, 1]} : vector<16x128xf32> to vector<15x128xf32>
    %313 = tpu.concatenate %312, %311 in 0 : vector<15x128xf32>, vector<1x128xf32> -> vector<16x128xf32>
    %314 = arith.maximumf %310, %313 : vector<16x128xf32>
    %cst_81 = arith.constant 0.000000e+00 : f32
    %315 = vector.broadcast %cst_81 : f32 to vector<1x128xf32>
    %316 = vector.extract_strided_slice %310 {offsets = [0, 0], sizes = [15, 128], strides = [1, 1]} : vector<16x128xf32> to vector<15x128xf32>
    %317 = tpu.concatenate %315, %316 in 0 : vector<1x128xf32>, vector<15x128xf32> -> vector<16x128xf32>
    %318 = arith.maximumf %314, %317 : vector<16x128xf32>
    %cst_82 = arith.constant 0.000000e+00 : f32
    %319 = vector.broadcast %cst_82 : f32 to vector<2x128xf32>
    %320 = vector.extract_strided_slice %310 {offsets = [2, 0], sizes = [14, 128], strides = [1, 1]} : vector<16x128xf32> to vector<14x128xf32>
    %321 = tpu.concatenate %320, %319 in 0 : vector<14x128xf32>, vector<2x128xf32> -> vector<16x128xf32>
    %322 = arith.maximumf %318, %321 : vector<16x128xf32>
    %cst_83 = arith.constant 0.000000e+00 : f32
    %323 = vector.broadcast %cst_83 : f32 to vector<2x128xf32>
    %324 = vector.extract_strided_slice %310 {offsets = [0, 0], sizes = [14, 128], strides = [1, 1]} : vector<16x128xf32> to vector<14x128xf32>
    %325 = tpu.concatenate %323, %324 in 0 : vector<2x128xf32>, vector<14x128xf32> -> vector<16x128xf32>
    %326 = arith.maximumf %322, %325 : vector<16x128xf32>
    %327 = vector.shape_cast %262 : vector<16x128xf32> to vector<1x16x128xf32>
    %cst_84 = arith.constant dense<0.000000e+00> : vector<1xf32>
    %328 = vector.multi_reduction <add>, %327, %cst_84 [1, 2] : vector<1x16x128xf32> to vector<1xf32>
    %329 = vector.shape_cast %328 : vector<1xf32> to vector<1x1x1xf32>
    %330 = vector.extract %329[0, 0, 0] : f32 from vector<1x1x1xf32>
    %331 = vector.shape_cast %245 : vector<16x128xf32> to vector<1x16x128xf32>
    %cst_85 = arith.constant dense<0.000000e+00> : vector<1xf32>
    %332 = vector.multi_reduction <add>, %331, %cst_85 [1, 2] : vector<1x16x128xf32> to vector<1xf32>
    %333 = vector.shape_cast %332 : vector<1xf32> to vector<1x1x1xf32>
    %334 = vector.extract %333[0, 0, 0] : f32 from vector<1x1x1xf32>
    %335 = arith.mulf %262, %294 : vector<16x128xf32>
    %336 = vector.shape_cast %335 : vector<16x128xf32> to vector<1x16x128xf32>
    %cst_86 = arith.constant dense<0.000000e+00> : vector<1xf32>
    %337 = vector.multi_reduction <add>, %336, %cst_86 [1, 2] : vector<1x16x128xf32> to vector<1xf32>
    %338 = vector.shape_cast %337 : vector<1xf32> to vector<1x1x1xf32>
    %339 = vector.extract %338[0, 0, 0] : f32 from vector<1x1x1xf32>
    %340 = arith.mulf %326, %245 : vector<16x128xf32>
    %341 = vector.shape_cast %340 : vector<16x128xf32> to vector<1x16x128xf32>
    %cst_87 = arith.constant dense<0.000000e+00> : vector<1xf32>
    %342 = vector.multi_reduction <add>, %341, %cst_87 [1, 2] : vector<1x16x128xf32> to vector<1xf32>
    %343 = vector.shape_cast %342 : vector<1xf32> to vector<1x1x1xf32>
    %344 = vector.extract %343[0, 0, 0] : f32 from vector<1x1x1xf32>
    %cst_88 = arith.constant 0.000000e+00 : f32
    %345 = vector.broadcast %cst_88 : f32 to vector<8x128xf32>
    %c0_i32_89 = arith.constant 0 : i32
    %346 = vector.broadcast %c0_i32_89 : i32 to vector<8x128xi32>
    %347 = arith.cmpi eq, %0, %346 : vector<8x128xi32>
    %cst_90 = arith.constant 0.000000e+00 : f32
    %348 = vector.broadcast %222 : f32 to vector<8x128xf32>
    %349 = vector.broadcast %cst_90 : f32 to vector<8x128xf32>
    %350 = arith.select %347, %348, %349 : vector<8x128xi1>, vector<8x128xf32>
    %351 = arith.addf %345, %350 : vector<8x128xf32>
    %c1_i32_91 = arith.constant 1 : i32
    %352 = vector.broadcast %c1_i32_91 : i32 to vector<8x128xi32>
    %353 = arith.cmpi eq, %0, %352 : vector<8x128xi32>
    %cst_92 = arith.constant 0.000000e+00 : f32
    %354 = vector.broadcast %223 : f32 to vector<8x128xf32>
    %355 = vector.broadcast %cst_92 : f32 to vector<8x128xf32>
    %356 = arith.select %353, %354, %355 : vector<8x128xi1>, vector<8x128xf32>
    %357 = arith.addf %351, %356 : vector<8x128xf32>
    %c2_i32_93 = arith.constant 2 : i32
    %358 = vector.broadcast %c2_i32_93 : i32 to vector<8x128xi32>
    %359 = arith.cmpi eq, %0, %358 : vector<8x128xi32>
    %cst_94 = arith.constant 0.000000e+00 : f32
    %360 = vector.broadcast %224 : f32 to vector<8x128xf32>
    %361 = vector.broadcast %cst_94 : f32 to vector<8x128xf32>
    %362 = arith.select %359, %360, %361 : vector<8x128xi1>, vector<8x128xf32>
    %363 = arith.addf %357, %362 : vector<8x128xf32>
    %c3_i32_95 = arith.constant 3 : i32
    %364 = vector.broadcast %c3_i32_95 : i32 to vector<8x128xi32>
    %365 = arith.cmpi eq, %0, %364 : vector<8x128xi32>
    %cst_96 = arith.constant 0.000000e+00 : f32
    %366 = vector.broadcast %330 : f32 to vector<8x128xf32>
    %367 = vector.broadcast %cst_96 : f32 to vector<8x128xf32>
    %368 = arith.select %365, %366, %367 : vector<8x128xi1>, vector<8x128xf32>
    %369 = arith.addf %363, %368 : vector<8x128xf32>
    %c4_i32_97 = arith.constant 4 : i32
    %370 = vector.broadcast %c4_i32_97 : i32 to vector<8x128xi32>
    %371 = arith.cmpi eq, %0, %370 : vector<8x128xi32>
    %cst_98 = arith.constant 0.000000e+00 : f32
    %372 = vector.broadcast %334 : f32 to vector<8x128xf32>
    %373 = vector.broadcast %cst_98 : f32 to vector<8x128xf32>
    %374 = arith.select %371, %372, %373 : vector<8x128xi1>, vector<8x128xf32>
    %375 = arith.addf %369, %374 : vector<8x128xf32>
    %c5_i32_99 = arith.constant 5 : i32
    %376 = vector.broadcast %c5_i32_99 : i32 to vector<8x128xi32>
    %377 = arith.cmpi eq, %0, %376 : vector<8x128xi32>
    %cst_100 = arith.constant 0.000000e+00 : f32
    %378 = vector.broadcast %339 : f32 to vector<8x128xf32>
    %379 = vector.broadcast %cst_100 : f32 to vector<8x128xf32>
    %380 = arith.select %377, %378, %379 : vector<8x128xi1>, vector<8x128xf32>
    %381 = arith.addf %375, %380 : vector<8x128xf32>
    %c6_i32_101 = arith.constant 6 : i32
    %382 = vector.broadcast %c6_i32_101 : i32 to vector<8x128xi32>
    %383 = arith.cmpi eq, %0, %382 : vector<8x128xi32>
    %cst_102 = arith.constant 0.000000e+00 : f32
    %384 = vector.broadcast %344 : f32 to vector<8x128xf32>
    %385 = vector.broadcast %cst_102 : f32 to vector<8x128xf32>
    %386 = arith.select %383, %384, %385 : vector<8x128xi1>, vector<8x128xf32>
    %387 = arith.addf %381, %386 : vector<8x128xf32>
    %388 = vector.broadcast %c1_i32_48 : i32 to vector<8x128xi32>
    %389 = arith.cmpi eq, %1, %388 : vector<8x128xi32>
    %cst_103 = arith.constant 0.000000e+00 : f32
    %390 = vector.broadcast %cst_103 : f32 to vector<8x128xf32>
    %391 = arith.select %389, %387, %390 : vector<8x128xi1>, vector<8x128xf32>
    %392 = arith.addf %197, %391 : vector<8x128xf32>
    %c2_i32_104 = arith.constant 2 : i32
    %393 = arith.index_cast %c2_i32_104 : i32 to index
    %c0_105 = arith.constant 0 : index
    %c0_106 = arith.constant 0 : index
    %394 = vector.load %arg1[%393, %c0_105, %c0_106] : memref<4x16x128xf32, #tpu.memory_space<vmem>>, vector<1x16x128xf32>
    %395 = vector.shape_cast %394 : vector<1x16x128xf32> to vector<16x128xf32>
    %396 = arith.index_cast %c2_i32_104 : i32 to index
    %c0_107 = arith.constant 0 : index
    %c0_108 = arith.constant 0 : index
    %397 = vector.load %arg2[%396, %c0_107, %c0_108] : memref<4x16x128xf32, #tpu.memory_space<vmem>>, vector<1x16x128xf32>
    %398 = vector.shape_cast %397 : vector<1x16x128xf32> to vector<16x128xf32>
    %cst_109 = arith.constant 0.000000e+00 : f32
    %399 = vector.broadcast %cst_109 : f32 to vector<16x128xf32>
    %400 = arith.subf %399, %395 : vector<16x128xf32>
    %401 = math.exp %400 : vector<16x128xf32>
    %cst_110 = arith.constant 1.000000e+00 : f32
    %402 = vector.broadcast %cst_110 : f32 to vector<16x128xf32>
    %403 = arith.addf %402, %401 : vector<16x128xf32>
    %404 = tpu.reciprocal %403 : vector<16x128xf32> -> vector<16x128xf32>
    %405 = vector.shape_cast %404 : vector<16x128xf32> to vector<1x16x128xf32>
    %cst_111 = arith.constant dense<0.000000e+00> : vector<1xf32>
    %406 = vector.multi_reduction <add>, %405, %cst_111 [1, 2] : vector<1x16x128xf32> to vector<1xf32>
    %407 = vector.shape_cast %406 : vector<1xf32> to vector<1x1x1xf32>
    %408 = vector.extract %407[0, 0, 0] : f32 from vector<1x1x1xf32>
    %409 = vector.shape_cast %398 : vector<16x128xf32> to vector<1x16x128xf32>
    %cst_112 = arith.constant dense<0.000000e+00> : vector<1xf32>
    %410 = vector.multi_reduction <add>, %409, %cst_112 [1, 2] : vector<1x16x128xf32> to vector<1xf32>
    %411 = vector.shape_cast %410 : vector<1xf32> to vector<1x1x1xf32>
    %412 = vector.extract %411[0, 0, 0] : f32 from vector<1x1x1xf32>
    %413 = arith.mulf %404, %398 : vector<16x128xf32>
    %414 = vector.shape_cast %413 : vector<16x128xf32> to vector<1x16x128xf32>
    %cst_113 = arith.constant dense<0.000000e+00> : vector<1xf32>
    %415 = vector.multi_reduction <add>, %414, %cst_113 [1, 2] : vector<1x16x128xf32> to vector<1xf32>
    %416 = vector.shape_cast %415 : vector<1xf32> to vector<1x1x1xf32>
    %417 = vector.extract %416[0, 0, 0] : f32 from vector<1x1x1xf32>
    %418 = arith.subf %408, %417 : f32
    %419 = arith.subf %412, %417 : f32
    %cst_114 = arith.constant 1.000000e+00 : f32
    %420 = vector.broadcast %cst_114 : f32 to vector<16x128xf32>
    %421 = arith.subf %420, %398 : vector<16x128xf32>
    %cst_115 = arith.constant 1.000000e+00 : f32
    %422 = vector.broadcast %cst_115 : f32 to vector<16x128xf32>
    %423 = arith.subf %422, %404 : vector<16x128xf32>
    %cst_116 = arith.constant 0.000000e+00 : f32
    %424 = vector.broadcast %cst_116 : f32 to vector<16x1xf32>
    %425 = vector.extract_strided_slice %421 {offsets = [0, 1], sizes = [16, 127], strides = [1, 1]} : vector<16x128xf32> to vector<16x127xf32>
    %426 = tpu.concatenate %425, %424 in 1 : vector<16x127xf32>, vector<16x1xf32> -> vector<16x128xf32>
    %427 = arith.maximumf %421, %426 : vector<16x128xf32>
    %cst_117 = arith.constant 0.000000e+00 : f32
    %428 = vector.broadcast %cst_117 : f32 to vector<16x1xf32>
    %429 = vector.extract_strided_slice %421 {offsets = [0, 0], sizes = [16, 127], strides = [1, 1]} : vector<16x128xf32> to vector<16x127xf32>
    %430 = tpu.concatenate %428, %429 in 1 : vector<16x1xf32>, vector<16x127xf32> -> vector<16x128xf32>
    %431 = arith.maximumf %427, %430 : vector<16x128xf32>
    %cst_118 = arith.constant 0.000000e+00 : f32
    %432 = vector.broadcast %cst_118 : f32 to vector<1x128xf32>
    %433 = vector.extract_strided_slice %431 {offsets = [1, 0], sizes = [15, 128], strides = [1, 1]} : vector<16x128xf32> to vector<15x128xf32>
    %434 = tpu.concatenate %433, %432 in 0 : vector<15x128xf32>, vector<1x128xf32> -> vector<16x128xf32>
    %435 = arith.maximumf %431, %434 : vector<16x128xf32>
    %cst_119 = arith.constant 0.000000e+00 : f32
    %436 = vector.broadcast %cst_119 : f32 to vector<1x128xf32>
    %437 = vector.extract_strided_slice %431 {offsets = [0, 0], sizes = [15, 128], strides = [1, 1]} : vector<16x128xf32> to vector<15x128xf32>
    %438 = tpu.concatenate %436, %437 in 0 : vector<1x128xf32>, vector<15x128xf32> -> vector<16x128xf32>
    %439 = arith.maximumf %435, %438 : vector<16x128xf32>
    %440 = arith.subf %439, %421 : vector<16x128xf32>
    %cst_120 = arith.constant 0.000000e+00 : f32
    %441 = vector.broadcast %cst_120 : f32 to vector<16x1xf32>
    %442 = vector.extract_strided_slice %423 {offsets = [0, 1], sizes = [16, 127], strides = [1, 1]} : vector<16x128xf32> to vector<16x127xf32>
    %443 = tpu.concatenate %442, %441 in 1 : vector<16x127xf32>, vector<16x1xf32> -> vector<16x128xf32>
    %444 = arith.maximumf %423, %443 : vector<16x128xf32>
    %cst_121 = arith.constant 0.000000e+00 : f32
    %445 = vector.broadcast %cst_121 : f32 to vector<16x1xf32>
    %446 = vector.extract_strided_slice %423 {offsets = [0, 0], sizes = [16, 127], strides = [1, 1]} : vector<16x128xf32> to vector<16x127xf32>
    %447 = tpu.concatenate %445, %446 in 1 : vector<16x1xf32>, vector<16x127xf32> -> vector<16x128xf32>
    %448 = arith.maximumf %444, %447 : vector<16x128xf32>
    %cst_122 = arith.constant 0.000000e+00 : f32
    %449 = vector.broadcast %cst_122 : f32 to vector<1x128xf32>
    %450 = vector.extract_strided_slice %448 {offsets = [1, 0], sizes = [15, 128], strides = [1, 1]} : vector<16x128xf32> to vector<15x128xf32>
    %451 = tpu.concatenate %450, %449 in 0 : vector<15x128xf32>, vector<1x128xf32> -> vector<16x128xf32>
    %452 = arith.maximumf %448, %451 : vector<16x128xf32>
    %cst_123 = arith.constant 0.000000e+00 : f32
    %453 = vector.broadcast %cst_123 : f32 to vector<1x128xf32>
    %454 = vector.extract_strided_slice %448 {offsets = [0, 0], sizes = [15, 128], strides = [1, 1]} : vector<16x128xf32> to vector<15x128xf32>
    %455 = tpu.concatenate %453, %454 in 0 : vector<1x128xf32>, vector<15x128xf32> -> vector<16x128xf32>
    %456 = arith.maximumf %452, %455 : vector<16x128xf32>
    %457 = arith.subf %456, %423 : vector<16x128xf32>
    %cst_124 = arith.constant 0.000000e+00 : f32
    %458 = vector.broadcast %cst_124 : f32 to vector<16x1xf32>
    %459 = vector.extract_strided_slice %440 {offsets = [0, 1], sizes = [16, 127], strides = [1, 1]} : vector<16x128xf32> to vector<16x127xf32>
    %460 = tpu.concatenate %459, %458 in 1 : vector<16x127xf32>, vector<16x1xf32> -> vector<16x128xf32>
    %461 = arith.maximumf %440, %460 : vector<16x128xf32>
    %cst_125 = arith.constant 0.000000e+00 : f32
    %462 = vector.broadcast %cst_125 : f32 to vector<16x1xf32>
    %463 = vector.extract_strided_slice %440 {offsets = [0, 0], sizes = [16, 127], strides = [1, 1]} : vector<16x128xf32> to vector<16x127xf32>
    %464 = tpu.concatenate %462, %463 in 1 : vector<16x1xf32>, vector<16x127xf32> -> vector<16x128xf32>
    %465 = arith.maximumf %461, %464 : vector<16x128xf32>
    %cst_126 = arith.constant 0.000000e+00 : f32
    %466 = vector.broadcast %cst_126 : f32 to vector<16x2xf32>
    %467 = vector.extract_strided_slice %440 {offsets = [0, 2], sizes = [16, 126], strides = [1, 1]} : vector<16x128xf32> to vector<16x126xf32>
    %468 = tpu.concatenate %467, %466 in 1 : vector<16x126xf32>, vector<16x2xf32> -> vector<16x128xf32>
    %469 = arith.maximumf %465, %468 : vector<16x128xf32>
    %cst_127 = arith.constant 0.000000e+00 : f32
    %470 = vector.broadcast %cst_127 : f32 to vector<16x2xf32>
    %471 = vector.extract_strided_slice %440 {offsets = [0, 0], sizes = [16, 126], strides = [1, 1]} : vector<16x128xf32> to vector<16x126xf32>
    %472 = tpu.concatenate %470, %471 in 1 : vector<16x2xf32>, vector<16x126xf32> -> vector<16x128xf32>
    %473 = arith.maximumf %469, %472 : vector<16x128xf32>
    %cst_128 = arith.constant 0.000000e+00 : f32
    %474 = vector.broadcast %cst_128 : f32 to vector<1x128xf32>
    %475 = vector.extract_strided_slice %473 {offsets = [1, 0], sizes = [15, 128], strides = [1, 1]} : vector<16x128xf32> to vector<15x128xf32>
    %476 = tpu.concatenate %475, %474 in 0 : vector<15x128xf32>, vector<1x128xf32> -> vector<16x128xf32>
    %477 = arith.maximumf %473, %476 : vector<16x128xf32>
    %cst_129 = arith.constant 0.000000e+00 : f32
    %478 = vector.broadcast %cst_129 : f32 to vector<1x128xf32>
    %479 = vector.extract_strided_slice %473 {offsets = [0, 0], sizes = [15, 128], strides = [1, 1]} : vector<16x128xf32> to vector<15x128xf32>
    %480 = tpu.concatenate %478, %479 in 0 : vector<1x128xf32>, vector<15x128xf32> -> vector<16x128xf32>
    %481 = arith.maximumf %477, %480 : vector<16x128xf32>
    %cst_130 = arith.constant 0.000000e+00 : f32
    %482 = vector.broadcast %cst_130 : f32 to vector<2x128xf32>
    %483 = vector.extract_strided_slice %473 {offsets = [2, 0], sizes = [14, 128], strides = [1, 1]} : vector<16x128xf32> to vector<14x128xf32>
    %484 = tpu.concatenate %483, %482 in 0 : vector<14x128xf32>, vector<2x128xf32> -> vector<16x128xf32>
    %485 = arith.maximumf %481, %484 : vector<16x128xf32>
    %cst_131 = arith.constant 0.000000e+00 : f32
    %486 = vector.broadcast %cst_131 : f32 to vector<2x128xf32>
    %487 = vector.extract_strided_slice %473 {offsets = [0, 0], sizes = [14, 128], strides = [1, 1]} : vector<16x128xf32> to vector<14x128xf32>
    %488 = tpu.concatenate %486, %487 in 0 : vector<2x128xf32>, vector<14x128xf32> -> vector<16x128xf32>
    %489 = arith.maximumf %485, %488 : vector<16x128xf32>
    %cst_132 = arith.constant 0.000000e+00 : f32
    %490 = vector.broadcast %cst_132 : f32 to vector<16x1xf32>
    %491 = vector.extract_strided_slice %457 {offsets = [0, 1], sizes = [16, 127], strides = [1, 1]} : vector<16x128xf32> to vector<16x127xf32>
    %492 = tpu.concatenate %491, %490 in 1 : vector<16x127xf32>, vector<16x1xf32> -> vector<16x128xf32>
    %493 = arith.maximumf %457, %492 : vector<16x128xf32>
    %cst_133 = arith.constant 0.000000e+00 : f32
    %494 = vector.broadcast %cst_133 : f32 to vector<16x1xf32>
    %495 = vector.extract_strided_slice %457 {offsets = [0, 0], sizes = [16, 127], strides = [1, 1]} : vector<16x128xf32> to vector<16x127xf32>
    %496 = tpu.concatenate %494, %495 in 1 : vector<16x1xf32>, vector<16x127xf32> -> vector<16x128xf32>
    %497 = arith.maximumf %493, %496 : vector<16x128xf32>
    %cst_134 = arith.constant 0.000000e+00 : f32
    %498 = vector.broadcast %cst_134 : f32 to vector<16x2xf32>
    %499 = vector.extract_strided_slice %457 {offsets = [0, 2], sizes = [16, 126], strides = [1, 1]} : vector<16x128xf32> to vector<16x126xf32>
    %500 = tpu.concatenate %499, %498 in 1 : vector<16x126xf32>, vector<16x2xf32> -> vector<16x128xf32>
    %501 = arith.maximumf %497, %500 : vector<16x128xf32>
    %cst_135 = arith.constant 0.000000e+00 : f32
    %502 = vector.broadcast %cst_135 : f32 to vector<16x2xf32>
    %503 = vector.extract_strided_slice %457 {offsets = [0, 0], sizes = [16, 126], strides = [1, 1]} : vector<16x128xf32> to vector<16x126xf32>
    %504 = tpu.concatenate %502, %503 in 1 : vector<16x2xf32>, vector<16x126xf32> -> vector<16x128xf32>
    %505 = arith.maximumf %501, %504 : vector<16x128xf32>
    %cst_136 = arith.constant 0.000000e+00 : f32
    %506 = vector.broadcast %cst_136 : f32 to vector<1x128xf32>
    %507 = vector.extract_strided_slice %505 {offsets = [1, 0], sizes = [15, 128], strides = [1, 1]} : vector<16x128xf32> to vector<15x128xf32>
    %508 = tpu.concatenate %507, %506 in 0 : vector<15x128xf32>, vector<1x128xf32> -> vector<16x128xf32>
    %509 = arith.maximumf %505, %508 : vector<16x128xf32>
    %cst_137 = arith.constant 0.000000e+00 : f32
    %510 = vector.broadcast %cst_137 : f32 to vector<1x128xf32>
    %511 = vector.extract_strided_slice %505 {offsets = [0, 0], sizes = [15, 128], strides = [1, 1]} : vector<16x128xf32> to vector<15x128xf32>
    %512 = tpu.concatenate %510, %511 in 0 : vector<1x128xf32>, vector<15x128xf32> -> vector<16x128xf32>
    %513 = arith.maximumf %509, %512 : vector<16x128xf32>
    %cst_138 = arith.constant 0.000000e+00 : f32
    %514 = vector.broadcast %cst_138 : f32 to vector<2x128xf32>
    %515 = vector.extract_strided_slice %505 {offsets = [2, 0], sizes = [14, 128], strides = [1, 1]} : vector<16x128xf32> to vector<14x128xf32>
    %516 = tpu.concatenate %515, %514 in 0 : vector<14x128xf32>, vector<2x128xf32> -> vector<16x128xf32>
    %517 = arith.maximumf %513, %516 : vector<16x128xf32>
    %cst_139 = arith.constant 0.000000e+00 : f32
    %518 = vector.broadcast %cst_139 : f32 to vector<2x128xf32>
    %519 = vector.extract_strided_slice %505 {offsets = [0, 0], sizes = [14, 128], strides = [1, 1]} : vector<16x128xf32> to vector<14x128xf32>
    %520 = tpu.concatenate %518, %519 in 0 : vector<2x128xf32>, vector<14x128xf32> -> vector<16x128xf32>
    %521 = arith.maximumf %517, %520 : vector<16x128xf32>
    %522 = vector.shape_cast %457 : vector<16x128xf32> to vector<1x16x128xf32>
    %cst_140 = arith.constant dense<0.000000e+00> : vector<1xf32>
    %523 = vector.multi_reduction <add>, %522, %cst_140 [1, 2] : vector<1x16x128xf32> to vector<1xf32>
    %524 = vector.shape_cast %523 : vector<1xf32> to vector<1x1x1xf32>
    %525 = vector.extract %524[0, 0, 0] : f32 from vector<1x1x1xf32>
    %526 = vector.shape_cast %440 : vector<16x128xf32> to vector<1x16x128xf32>
    %cst_141 = arith.constant dense<0.000000e+00> : vector<1xf32>
    %527 = vector.multi_reduction <add>, %526, %cst_141 [1, 2] : vector<1x16x128xf32> to vector<1xf32>
    %528 = vector.shape_cast %527 : vector<1xf32> to vector<1x1x1xf32>
    %529 = vector.extract %528[0, 0, 0] : f32 from vector<1x1x1xf32>
    %530 = arith.mulf %457, %489 : vector<16x128xf32>
    %531 = vector.shape_cast %530 : vector<16x128xf32> to vector<1x16x128xf32>
    %cst_142 = arith.constant dense<0.000000e+00> : vector<1xf32>
    %532 = vector.multi_reduction <add>, %531, %cst_142 [1, 2] : vector<1x16x128xf32> to vector<1xf32>
    %533 = vector.shape_cast %532 : vector<1xf32> to vector<1x1x1xf32>
    %534 = vector.extract %533[0, 0, 0] : f32 from vector<1x1x1xf32>
    %535 = arith.mulf %521, %440 : vector<16x128xf32>
    %536 = vector.shape_cast %535 : vector<16x128xf32> to vector<1x16x128xf32>
    %cst_143 = arith.constant dense<0.000000e+00> : vector<1xf32>
    %537 = vector.multi_reduction <add>, %536, %cst_143 [1, 2] : vector<1x16x128xf32> to vector<1xf32>
    %538 = vector.shape_cast %537 : vector<1xf32> to vector<1x1x1xf32>
    %539 = vector.extract %538[0, 0, 0] : f32 from vector<1x1x1xf32>
    %cst_144 = arith.constant 0.000000e+00 : f32
    %540 = vector.broadcast %cst_144 : f32 to vector<8x128xf32>
    %c0_i32_145 = arith.constant 0 : i32
    %541 = vector.broadcast %c0_i32_145 : i32 to vector<8x128xi32>
    %542 = arith.cmpi eq, %0, %541 : vector<8x128xi32>
    %cst_146 = arith.constant 0.000000e+00 : f32
    %543 = vector.broadcast %417 : f32 to vector<8x128xf32>
    %544 = vector.broadcast %cst_146 : f32 to vector<8x128xf32>
    %545 = arith.select %542, %543, %544 : vector<8x128xi1>, vector<8x128xf32>
    %546 = arith.addf %540, %545 : vector<8x128xf32>
    %c1_i32_147 = arith.constant 1 : i32
    %547 = vector.broadcast %c1_i32_147 : i32 to vector<8x128xi32>
    %548 = arith.cmpi eq, %0, %547 : vector<8x128xi32>
    %cst_148 = arith.constant 0.000000e+00 : f32
    %549 = vector.broadcast %418 : f32 to vector<8x128xf32>
    %550 = vector.broadcast %cst_148 : f32 to vector<8x128xf32>
    %551 = arith.select %548, %549, %550 : vector<8x128xi1>, vector<8x128xf32>
    %552 = arith.addf %546, %551 : vector<8x128xf32>
    %c2_i32_149 = arith.constant 2 : i32
    %553 = vector.broadcast %c2_i32_149 : i32 to vector<8x128xi32>
    %554 = arith.cmpi eq, %0, %553 : vector<8x128xi32>
    %cst_150 = arith.constant 0.000000e+00 : f32
    %555 = vector.broadcast %419 : f32 to vector<8x128xf32>
    %556 = vector.broadcast %cst_150 : f32 to vector<8x128xf32>
    %557 = arith.select %554, %555, %556 : vector<8x128xi1>, vector<8x128xf32>
    %558 = arith.addf %552, %557 : vector<8x128xf32>
    %c3_i32_151 = arith.constant 3 : i32
    %559 = vector.broadcast %c3_i32_151 : i32 to vector<8x128xi32>
    %560 = arith.cmpi eq, %0, %559 : vector<8x128xi32>
    %cst_152 = arith.constant 0.000000e+00 : f32
    %561 = vector.broadcast %525 : f32 to vector<8x128xf32>
    %562 = vector.broadcast %cst_152 : f32 to vector<8x128xf32>
    %563 = arith.select %560, %561, %562 : vector<8x128xi1>, vector<8x128xf32>
    %564 = arith.addf %558, %563 : vector<8x128xf32>
    %c4_i32_153 = arith.constant 4 : i32
    %565 = vector.broadcast %c4_i32_153 : i32 to vector<8x128xi32>
    %566 = arith.cmpi eq, %0, %565 : vector<8x128xi32>
    %cst_154 = arith.constant 0.000000e+00 : f32
    %567 = vector.broadcast %529 : f32 to vector<8x128xf32>
    %568 = vector.broadcast %cst_154 : f32 to vector<8x128xf32>
    %569 = arith.select %566, %567, %568 : vector<8x128xi1>, vector<8x128xf32>
    %570 = arith.addf %564, %569 : vector<8x128xf32>
    %c5_i32_155 = arith.constant 5 : i32
    %571 = vector.broadcast %c5_i32_155 : i32 to vector<8x128xi32>
    %572 = arith.cmpi eq, %0, %571 : vector<8x128xi32>
    %cst_156 = arith.constant 0.000000e+00 : f32
    %573 = vector.broadcast %534 : f32 to vector<8x128xf32>
    %574 = vector.broadcast %cst_156 : f32 to vector<8x128xf32>
    %575 = arith.select %572, %573, %574 : vector<8x128xi1>, vector<8x128xf32>
    %576 = arith.addf %570, %575 : vector<8x128xf32>
    %c6_i32_157 = arith.constant 6 : i32
    %577 = vector.broadcast %c6_i32_157 : i32 to vector<8x128xi32>
    %578 = arith.cmpi eq, %0, %577 : vector<8x128xi32>
    %cst_158 = arith.constant 0.000000e+00 : f32
    %579 = vector.broadcast %539 : f32 to vector<8x128xf32>
    %580 = vector.broadcast %cst_158 : f32 to vector<8x128xf32>
    %581 = arith.select %578, %579, %580 : vector<8x128xi1>, vector<8x128xf32>
    %582 = arith.addf %576, %581 : vector<8x128xf32>
    %583 = vector.broadcast %c2_i32_104 : i32 to vector<8x128xi32>
    %584 = arith.cmpi eq, %1, %583 : vector<8x128xi32>
    %cst_159 = arith.constant 0.000000e+00 : f32
    %585 = vector.broadcast %cst_159 : f32 to vector<8x128xf32>
    %586 = arith.select %584, %582, %585 : vector<8x128xi1>, vector<8x128xf32>
    %587 = arith.addf %392, %586 : vector<8x128xf32>
    %c3_i32_160 = arith.constant 3 : i32
    %588 = arith.index_cast %c3_i32_160 : i32 to index
    %c0_161 = arith.constant 0 : index
    %c0_162 = arith.constant 0 : index
    %589 = vector.load %arg1[%588, %c0_161, %c0_162] : memref<4x16x128xf32, #tpu.memory_space<vmem>>, vector<1x16x128xf32>
    %590 = vector.shape_cast %589 : vector<1x16x128xf32> to vector<16x128xf32>
    %591 = arith.index_cast %c3_i32_160 : i32 to index
    %c0_163 = arith.constant 0 : index
    %c0_164 = arith.constant 0 : index
    %592 = vector.load %arg2[%591, %c0_163, %c0_164] : memref<4x16x128xf32, #tpu.memory_space<vmem>>, vector<1x16x128xf32>
    %593 = vector.shape_cast %592 : vector<1x16x128xf32> to vector<16x128xf32>
    %cst_165 = arith.constant 0.000000e+00 : f32
    %594 = vector.broadcast %cst_165 : f32 to vector<16x128xf32>
    %595 = arith.subf %594, %590 : vector<16x128xf32>
    %596 = math.exp %595 : vector<16x128xf32>
    %cst_166 = arith.constant 1.000000e+00 : f32
    %597 = vector.broadcast %cst_166 : f32 to vector<16x128xf32>
    %598 = arith.addf %597, %596 : vector<16x128xf32>
    %599 = tpu.reciprocal %598 : vector<16x128xf32> -> vector<16x128xf32>
    %600 = vector.shape_cast %599 : vector<16x128xf32> to vector<1x16x128xf32>
    %cst_167 = arith.constant dense<0.000000e+00> : vector<1xf32>
    %601 = vector.multi_reduction <add>, %600, %cst_167 [1, 2] : vector<1x16x128xf32> to vector<1xf32>
    %602 = vector.shape_cast %601 : vector<1xf32> to vector<1x1x1xf32>
    %603 = vector.extract %602[0, 0, 0] : f32 from vector<1x1x1xf32>
    %604 = vector.shape_cast %593 : vector<16x128xf32> to vector<1x16x128xf32>
    %cst_168 = arith.constant dense<0.000000e+00> : vector<1xf32>
    %605 = vector.multi_reduction <add>, %604, %cst_168 [1, 2] : vector<1x16x128xf32> to vector<1xf32>
    %606 = vector.shape_cast %605 : vector<1xf32> to vector<1x1x1xf32>
    %607 = vector.extract %606[0, 0, 0] : f32 from vector<1x1x1xf32>
    %608 = arith.mulf %599, %593 : vector<16x128xf32>
    %609 = vector.shape_cast %608 : vector<16x128xf32> to vector<1x16x128xf32>
    %cst_169 = arith.constant dense<0.000000e+00> : vector<1xf32>
    %610 = vector.multi_reduction <add>, %609, %cst_169 [1, 2] : vector<1x16x128xf32> to vector<1xf32>
    %611 = vector.shape_cast %610 : vector<1xf32> to vector<1x1x1xf32>
    %612 = vector.extract %611[0, 0, 0] : f32 from vector<1x1x1xf32>
    %613 = arith.subf %603, %612 : f32
    %614 = arith.subf %607, %612 : f32
    %cst_170 = arith.constant 1.000000e+00 : f32
    %615 = vector.broadcast %cst_170 : f32 to vector<16x128xf32>
    %616 = arith.subf %615, %593 : vector<16x128xf32>
    %cst_171 = arith.constant 1.000000e+00 : f32
    %617 = vector.broadcast %cst_171 : f32 to vector<16x128xf32>
    %618 = arith.subf %617, %599 : vector<16x128xf32>
    %cst_172 = arith.constant 0.000000e+00 : f32
    %619 = vector.broadcast %cst_172 : f32 to vector<16x1xf32>
    %620 = vector.extract_strided_slice %616 {offsets = [0, 1], sizes = [16, 127], strides = [1, 1]} : vector<16x128xf32> to vector<16x127xf32>
    %621 = tpu.concatenate %620, %619 in 1 : vector<16x127xf32>, vector<16x1xf32> -> vector<16x128xf32>
    %622 = arith.maximumf %616, %621 : vector<16x128xf32>
    %cst_173 = arith.constant 0.000000e+00 : f32
    %623 = vector.broadcast %cst_173 : f32 to vector<16x1xf32>
    %624 = vector.extract_strided_slice %616 {offsets = [0, 0], sizes = [16, 127], strides = [1, 1]} : vector<16x128xf32> to vector<16x127xf32>
    %625 = tpu.concatenate %623, %624 in 1 : vector<16x1xf32>, vector<16x127xf32> -> vector<16x128xf32>
    %626 = arith.maximumf %622, %625 : vector<16x128xf32>
    %cst_174 = arith.constant 0.000000e+00 : f32
    %627 = vector.broadcast %cst_174 : f32 to vector<1x128xf32>
    %628 = vector.extract_strided_slice %626 {offsets = [1, 0], sizes = [15, 128], strides = [1, 1]} : vector<16x128xf32> to vector<15x128xf32>
    %629 = tpu.concatenate %628, %627 in 0 : vector<15x128xf32>, vector<1x128xf32> -> vector<16x128xf32>
    %630 = arith.maximumf %626, %629 : vector<16x128xf32>
    %cst_175 = arith.constant 0.000000e+00 : f32
    %631 = vector.broadcast %cst_175 : f32 to vector<1x128xf32>
    %632 = vector.extract_strided_slice %626 {offsets = [0, 0], sizes = [15, 128], strides = [1, 1]} : vector<16x128xf32> to vector<15x128xf32>
    %633 = tpu.concatenate %631, %632 in 0 : vector<1x128xf32>, vector<15x128xf32> -> vector<16x128xf32>
    %634 = arith.maximumf %630, %633 : vector<16x128xf32>
    %635 = arith.subf %634, %616 : vector<16x128xf32>
    %cst_176 = arith.constant 0.000000e+00 : f32
    %636 = vector.broadcast %cst_176 : f32 to vector<16x1xf32>
    %637 = vector.extract_strided_slice %618 {offsets = [0, 1], sizes = [16, 127], strides = [1, 1]} : vector<16x128xf32> to vector<16x127xf32>
    %638 = tpu.concatenate %637, %636 in 1 : vector<16x127xf32>, vector<16x1xf32> -> vector<16x128xf32>
    %639 = arith.maximumf %618, %638 : vector<16x128xf32>
    %cst_177 = arith.constant 0.000000e+00 : f32
    %640 = vector.broadcast %cst_177 : f32 to vector<16x1xf32>
    %641 = vector.extract_strided_slice %618 {offsets = [0, 0], sizes = [16, 127], strides = [1, 1]} : vector<16x128xf32> to vector<16x127xf32>
    %642 = tpu.concatenate %640, %641 in 1 : vector<16x1xf32>, vector<16x127xf32> -> vector<16x128xf32>
    %643 = arith.maximumf %639, %642 : vector<16x128xf32>
    %cst_178 = arith.constant 0.000000e+00 : f32
    %644 = vector.broadcast %cst_178 : f32 to vector<1x128xf32>
    %645 = vector.extract_strided_slice %643 {offsets = [1, 0], sizes = [15, 128], strides = [1, 1]} : vector<16x128xf32> to vector<15x128xf32>
    %646 = tpu.concatenate %645, %644 in 0 : vector<15x128xf32>, vector<1x128xf32> -> vector<16x128xf32>
    %647 = arith.maximumf %643, %646 : vector<16x128xf32>
    %cst_179 = arith.constant 0.000000e+00 : f32
    %648 = vector.broadcast %cst_179 : f32 to vector<1x128xf32>
    %649 = vector.extract_strided_slice %643 {offsets = [0, 0], sizes = [15, 128], strides = [1, 1]} : vector<16x128xf32> to vector<15x128xf32>
    %650 = tpu.concatenate %648, %649 in 0 : vector<1x128xf32>, vector<15x128xf32> -> vector<16x128xf32>
    %651 = arith.maximumf %647, %650 : vector<16x128xf32>
    %652 = arith.subf %651, %618 : vector<16x128xf32>
    %cst_180 = arith.constant 0.000000e+00 : f32
    %653 = vector.broadcast %cst_180 : f32 to vector<16x1xf32>
    %654 = vector.extract_strided_slice %635 {offsets = [0, 1], sizes = [16, 127], strides = [1, 1]} : vector<16x128xf32> to vector<16x127xf32>
    %655 = tpu.concatenate %654, %653 in 1 : vector<16x127xf32>, vector<16x1xf32> -> vector<16x128xf32>
    %656 = arith.maximumf %635, %655 : vector<16x128xf32>
    %cst_181 = arith.constant 0.000000e+00 : f32
    %657 = vector.broadcast %cst_181 : f32 to vector<16x1xf32>
    %658 = vector.extract_strided_slice %635 {offsets = [0, 0], sizes = [16, 127], strides = [1, 1]} : vector<16x128xf32> to vector<16x127xf32>
    %659 = tpu.concatenate %657, %658 in 1 : vector<16x1xf32>, vector<16x127xf32> -> vector<16x128xf32>
    %660 = arith.maximumf %656, %659 : vector<16x128xf32>
    %cst_182 = arith.constant 0.000000e+00 : f32
    %661 = vector.broadcast %cst_182 : f32 to vector<16x2xf32>
    %662 = vector.extract_strided_slice %635 {offsets = [0, 2], sizes = [16, 126], strides = [1, 1]} : vector<16x128xf32> to vector<16x126xf32>
    %663 = tpu.concatenate %662, %661 in 1 : vector<16x126xf32>, vector<16x2xf32> -> vector<16x128xf32>
    %664 = arith.maximumf %660, %663 : vector<16x128xf32>
    %cst_183 = arith.constant 0.000000e+00 : f32
    %665 = vector.broadcast %cst_183 : f32 to vector<16x2xf32>
    %666 = vector.extract_strided_slice %635 {offsets = [0, 0], sizes = [16, 126], strides = [1, 1]} : vector<16x128xf32> to vector<16x126xf32>
    %667 = tpu.concatenate %665, %666 in 1 : vector<16x2xf32>, vector<16x126xf32> -> vector<16x128xf32>
    %668 = arith.maximumf %664, %667 : vector<16x128xf32>
    %cst_184 = arith.constant 0.000000e+00 : f32
    %669 = vector.broadcast %cst_184 : f32 to vector<1x128xf32>
    %670 = vector.extract_strided_slice %668 {offsets = [1, 0], sizes = [15, 128], strides = [1, 1]} : vector<16x128xf32> to vector<15x128xf32>
    %671 = tpu.concatenate %670, %669 in 0 : vector<15x128xf32>, vector<1x128xf32> -> vector<16x128xf32>
    %672 = arith.maximumf %668, %671 : vector<16x128xf32>
    %cst_185 = arith.constant 0.000000e+00 : f32
    %673 = vector.broadcast %cst_185 : f32 to vector<1x128xf32>
    %674 = vector.extract_strided_slice %668 {offsets = [0, 0], sizes = [15, 128], strides = [1, 1]} : vector<16x128xf32> to vector<15x128xf32>
    %675 = tpu.concatenate %673, %674 in 0 : vector<1x128xf32>, vector<15x128xf32> -> vector<16x128xf32>
    %676 = arith.maximumf %672, %675 : vector<16x128xf32>
    %cst_186 = arith.constant 0.000000e+00 : f32
    %677 = vector.broadcast %cst_186 : f32 to vector<2x128xf32>
    %678 = vector.extract_strided_slice %668 {offsets = [2, 0], sizes = [14, 128], strides = [1, 1]} : vector<16x128xf32> to vector<14x128xf32>
    %679 = tpu.concatenate %678, %677 in 0 : vector<14x128xf32>, vector<2x128xf32> -> vector<16x128xf32>
    %680 = arith.maximumf %676, %679 : vector<16x128xf32>
    %cst_187 = arith.constant 0.000000e+00 : f32
    %681 = vector.broadcast %cst_187 : f32 to vector<2x128xf32>
    %682 = vector.extract_strided_slice %668 {offsets = [0, 0], sizes = [14, 128], strides = [1, 1]} : vector<16x128xf32> to vector<14x128xf32>
    %683 = tpu.concatenate %681, %682 in 0 : vector<2x128xf32>, vector<14x128xf32> -> vector<16x128xf32>
    %684 = arith.maximumf %680, %683 : vector<16x128xf32>
    %cst_188 = arith.constant 0.000000e+00 : f32
    %685 = vector.broadcast %cst_188 : f32 to vector<16x1xf32>
    %686 = vector.extract_strided_slice %652 {offsets = [0, 1], sizes = [16, 127], strides = [1, 1]} : vector<16x128xf32> to vector<16x127xf32>
    %687 = tpu.concatenate %686, %685 in 1 : vector<16x127xf32>, vector<16x1xf32> -> vector<16x128xf32>
    %688 = arith.maximumf %652, %687 : vector<16x128xf32>
    %cst_189 = arith.constant 0.000000e+00 : f32
    %689 = vector.broadcast %cst_189 : f32 to vector<16x1xf32>
    %690 = vector.extract_strided_slice %652 {offsets = [0, 0], sizes = [16, 127], strides = [1, 1]} : vector<16x128xf32> to vector<16x127xf32>
    %691 = tpu.concatenate %689, %690 in 1 : vector<16x1xf32>, vector<16x127xf32> -> vector<16x128xf32>
    %692 = arith.maximumf %688, %691 : vector<16x128xf32>
    %cst_190 = arith.constant 0.000000e+00 : f32
    %693 = vector.broadcast %cst_190 : f32 to vector<16x2xf32>
    %694 = vector.extract_strided_slice %652 {offsets = [0, 2], sizes = [16, 126], strides = [1, 1]} : vector<16x128xf32> to vector<16x126xf32>
    %695 = tpu.concatenate %694, %693 in 1 : vector<16x126xf32>, vector<16x2xf32> -> vector<16x128xf32>
    %696 = arith.maximumf %692, %695 : vector<16x128xf32>
    %cst_191 = arith.constant 0.000000e+00 : f32
    %697 = vector.broadcast %cst_191 : f32 to vector<16x2xf32>
    %698 = vector.extract_strided_slice %652 {offsets = [0, 0], sizes = [16, 126], strides = [1, 1]} : vector<16x128xf32> to vector<16x126xf32>
    %699 = tpu.concatenate %697, %698 in 1 : vector<16x2xf32>, vector<16x126xf32> -> vector<16x128xf32>
    %700 = arith.maximumf %696, %699 : vector<16x128xf32>
    %cst_192 = arith.constant 0.000000e+00 : f32
    %701 = vector.broadcast %cst_192 : f32 to vector<1x128xf32>
    %702 = vector.extract_strided_slice %700 {offsets = [1, 0], sizes = [15, 128], strides = [1, 1]} : vector<16x128xf32> to vector<15x128xf32>
    %703 = tpu.concatenate %702, %701 in 0 : vector<15x128xf32>, vector<1x128xf32> -> vector<16x128xf32>
    %704 = arith.maximumf %700, %703 : vector<16x128xf32>
    %cst_193 = arith.constant 0.000000e+00 : f32
    %705 = vector.broadcast %cst_193 : f32 to vector<1x128xf32>
    %706 = vector.extract_strided_slice %700 {offsets = [0, 0], sizes = [15, 128], strides = [1, 1]} : vector<16x128xf32> to vector<15x128xf32>
    %707 = tpu.concatenate %705, %706 in 0 : vector<1x128xf32>, vector<15x128xf32> -> vector<16x128xf32>
    %708 = arith.maximumf %704, %707 : vector<16x128xf32>
    %cst_194 = arith.constant 0.000000e+00 : f32
    %709 = vector.broadcast %cst_194 : f32 to vector<2x128xf32>
    %710 = vector.extract_strided_slice %700 {offsets = [2, 0], sizes = [14, 128], strides = [1, 1]} : vector<16x128xf32> to vector<14x128xf32>
    %711 = tpu.concatenate %710, %709 in 0 : vector<14x128xf32>, vector<2x128xf32> -> vector<16x128xf32>
    %712 = arith.maximumf %708, %711 : vector<16x128xf32>
    %cst_195 = arith.constant 0.000000e+00 : f32
    %713 = vector.broadcast %cst_195 : f32 to vector<2x128xf32>
    %714 = vector.extract_strided_slice %700 {offsets = [0, 0], sizes = [14, 128], strides = [1, 1]} : vector<16x128xf32> to vector<14x128xf32>
    %715 = tpu.concatenate %713, %714 in 0 : vector<2x128xf32>, vector<14x128xf32> -> vector<16x128xf32>
    %716 = arith.maximumf %712, %715 : vector<16x128xf32>
    %717 = vector.shape_cast %652 : vector<16x128xf32> to vector<1x16x128xf32>
    %cst_196 = arith.constant dense<0.000000e+00> : vector<1xf32>
    %718 = vector.multi_reduction <add>, %717, %cst_196 [1, 2] : vector<1x16x128xf32> to vector<1xf32>
    %719 = vector.shape_cast %718 : vector<1xf32> to vector<1x1x1xf32>
    %720 = vector.extract %719[0, 0, 0] : f32 from vector<1x1x1xf32>
    %721 = vector.shape_cast %635 : vector<16x128xf32> to vector<1x16x128xf32>
    %cst_197 = arith.constant dense<0.000000e+00> : vector<1xf32>
    %722 = vector.multi_reduction <add>, %721, %cst_197 [1, 2] : vector<1x16x128xf32> to vector<1xf32>
    %723 = vector.shape_cast %722 : vector<1xf32> to vector<1x1x1xf32>
    %724 = vector.extract %723[0, 0, 0] : f32 from vector<1x1x1xf32>
    %725 = arith.mulf %652, %684 : vector<16x128xf32>
    %726 = vector.shape_cast %725 : vector<16x128xf32> to vector<1x16x128xf32>
    %cst_198 = arith.constant dense<0.000000e+00> : vector<1xf32>
    %727 = vector.multi_reduction <add>, %726, %cst_198 [1, 2] : vector<1x16x128xf32> to vector<1xf32>
    %728 = vector.shape_cast %727 : vector<1xf32> to vector<1x1x1xf32>
    %729 = vector.extract %728[0, 0, 0] : f32 from vector<1x1x1xf32>
    %730 = arith.mulf %716, %635 : vector<16x128xf32>
    %731 = vector.shape_cast %730 : vector<16x128xf32> to vector<1x16x128xf32>
    %cst_199 = arith.constant dense<0.000000e+00> : vector<1xf32>
    %732 = vector.multi_reduction <add>, %731, %cst_199 [1, 2] : vector<1x16x128xf32> to vector<1xf32>
    %733 = vector.shape_cast %732 : vector<1xf32> to vector<1x1x1xf32>
    %734 = vector.extract %733[0, 0, 0] : f32 from vector<1x1x1xf32>
    %cst_200 = arith.constant 0.000000e+00 : f32
    %735 = vector.broadcast %cst_200 : f32 to vector<8x128xf32>
    %c0_i32_201 = arith.constant 0 : i32
    %736 = vector.broadcast %c0_i32_201 : i32 to vector<8x128xi32>
    %737 = arith.cmpi eq, %0, %736 : vector<8x128xi32>
    %cst_202 = arith.constant 0.000000e+00 : f32
    %738 = vector.broadcast %612 : f32 to vector<8x128xf32>
    %739 = vector.broadcast %cst_202 : f32 to vector<8x128xf32>
    %740 = arith.select %737, %738, %739 : vector<8x128xi1>, vector<8x128xf32>
    %741 = arith.addf %735, %740 : vector<8x128xf32>
    %c1_i32_203 = arith.constant 1 : i32
    %742 = vector.broadcast %c1_i32_203 : i32 to vector<8x128xi32>
    %743 = arith.cmpi eq, %0, %742 : vector<8x128xi32>
    %cst_204 = arith.constant 0.000000e+00 : f32
    %744 = vector.broadcast %613 : f32 to vector<8x128xf32>
    %745 = vector.broadcast %cst_204 : f32 to vector<8x128xf32>
    %746 = arith.select %743, %744, %745 : vector<8x128xi1>, vector<8x128xf32>
    %747 = arith.addf %741, %746 : vector<8x128xf32>
    %c2_i32_205 = arith.constant 2 : i32
    %748 = vector.broadcast %c2_i32_205 : i32 to vector<8x128xi32>
    %749 = arith.cmpi eq, %0, %748 : vector<8x128xi32>
    %cst_206 = arith.constant 0.000000e+00 : f32
    %750 = vector.broadcast %614 : f32 to vector<8x128xf32>
    %751 = vector.broadcast %cst_206 : f32 to vector<8x128xf32>
    %752 = arith.select %749, %750, %751 : vector<8x128xi1>, vector<8x128xf32>
    %753 = arith.addf %747, %752 : vector<8x128xf32>
    %c3_i32_207 = arith.constant 3 : i32
    %754 = vector.broadcast %c3_i32_207 : i32 to vector<8x128xi32>
    %755 = arith.cmpi eq, %0, %754 : vector<8x128xi32>
    %cst_208 = arith.constant 0.000000e+00 : f32
    %756 = vector.broadcast %720 : f32 to vector<8x128xf32>
    %757 = vector.broadcast %cst_208 : f32 to vector<8x128xf32>
    %758 = arith.select %755, %756, %757 : vector<8x128xi1>, vector<8x128xf32>
    %759 = arith.addf %753, %758 : vector<8x128xf32>
    %c4_i32_209 = arith.constant 4 : i32
    %760 = vector.broadcast %c4_i32_209 : i32 to vector<8x128xi32>
    %761 = arith.cmpi eq, %0, %760 : vector<8x128xi32>
    %cst_210 = arith.constant 0.000000e+00 : f32
    %762 = vector.broadcast %724 : f32 to vector<8x128xf32>
    %763 = vector.broadcast %cst_210 : f32 to vector<8x128xf32>
    %764 = arith.select %761, %762, %763 : vector<8x128xi1>, vector<8x128xf32>
    %765 = arith.addf %759, %764 : vector<8x128xf32>
    %c5_i32_211 = arith.constant 5 : i32
    %766 = vector.broadcast %c5_i32_211 : i32 to vector<8x128xi32>
    %767 = arith.cmpi eq, %0, %766 : vector<8x128xi32>
    %cst_212 = arith.constant 0.000000e+00 : f32
    %768 = vector.broadcast %729 : f32 to vector<8x128xf32>
    %769 = vector.broadcast %cst_212 : f32 to vector<8x128xf32>
    %770 = arith.select %767, %768, %769 : vector<8x128xi1>, vector<8x128xf32>
    %771 = arith.addf %765, %770 : vector<8x128xf32>
    %c6_i32_213 = arith.constant 6 : i32
    %772 = vector.broadcast %c6_i32_213 : i32 to vector<8x128xi32>
    %773 = arith.cmpi eq, %0, %772 : vector<8x128xi32>
    %cst_214 = arith.constant 0.000000e+00 : f32
    %774 = vector.broadcast %734 : f32 to vector<8x128xf32>
    %775 = vector.broadcast %cst_214 : f32 to vector<8x128xf32>
    %776 = arith.select %773, %774, %775 : vector<8x128xi1>, vector<8x128xf32>
    %777 = arith.addf %771, %776 : vector<8x128xf32>
    %778 = vector.broadcast %c3_i32_160 : i32 to vector<8x128xi32>
    %779 = arith.cmpi eq, %1, %778 : vector<8x128xi32>
    %cst_215 = arith.constant 0.000000e+00 : f32
    %780 = vector.broadcast %cst_215 : f32 to vector<8x128xf32>
    %781 = arith.select %779, %777, %780 : vector<8x128xi1>, vector<8x128xf32>
    %782 = arith.addf %587, %781 : vector<8x128xf32>
    %c4_i32_216 = arith.constant 4 : i32
    %c0_217 = arith.constant 0 : index
    %c0_218 = arith.constant 0 : index
    %c0_219 = arith.constant 0 : index
    %783 = vector.load %arg3[%c0_217, %c0_218, %c0_219] : memref<1x8x128xf32, #tpu.memory_space<vmem>>, vector<1x8x128xf32>
    %784 = vector.shape_cast %783 : vector<1x8x128xf32> to vector<8x128xf32>
    %785 = vector.shape_cast %782 : vector<8x128xf32> to vector<1x8x128xf32>
    tpu.vector_store %arg3[%c0_217, %c0_218, %c0_219], %785 {strides = array<i32>} : memref<1x8x128xf32, #tpu.memory_space<vmem>>, vector<1x8x128xf32>,
    return
  }
  func.func @transform_0(%arg0: i32) -> (i32, i32, i32) {
    %c0_i32 = arith.constant 0 : i32
    %c0_i32_0 = arith.constant 0 : i32
    %c0_i32_1 = arith.constant 0 : i32
    return %arg0, %c0_i32, %c0_i32_0 : i32, i32, i32
  }
  func.func @transform_1(%arg0: i32) -> (i32, i32, i32) {
    %c0_i32 = arith.constant 0 : i32
    %c0_i32_0 = arith.constant 0 : i32
    %c0_i32_1 = arith.constant 0 : i32
    return %arg0, %c0_i32, %c0_i32_0 : i32, i32, i32
  }
  func.func @transform_2(%arg0: i32) -> (i32, i32, i32) {
    %c0_i32 = arith.constant 0 : i32
    %c0_i32_0 = arith.constant 0 : i32
    %c0_i32_1 = arith.constant 0 : i32
    return %arg0, %c0_i32, %c0_i32_0 : i32, i32, i32
  }
}

</mosaic_0001>

<bundles_post_ra>
// kernel: tpu_custom_call.1
= control target key start
LH: loop header
LB: loop body
LE: loop exit
PB: predicated region body
PF: predicated region fallthrough
CT: control target
= control target key end

     0   :  { %s3168_s0 = inlined_call_operand.hbm [shape: f32[8,16,128], index: 0, kind: input, shape index: {}]   ;;  %s3169_s1 = inlined_call_operand.hbm [shape: f32[8,16,128], index: 1, kind: input, shape index: {}]   ;;  %s3170_s2 = inlined_call_operand.hbm [shape: f32[2,8,128], index: 2, kind: output, shape index: {}]  }
   0x1   :  { %3173 = sst [smem:[#allocation12_spill]] %s3168_s0 }
   0x2   :  { %3174 = sst [smem:[#allocation13_spill]] %s3169_s1 }
   0x3   :  { %7 = vsyncpa [#allocation3], 0 }
   0x4   :  { %9 = vsyncpa [#allocation3 + $0x1], 0 }
   0x5   :  { %10 = vsyncpa [#allocation6], 0 }
   0x6   :  { %12 = vsyncpa [#allocation6 + $0x1], 0 }
   0x7   :  { %13 = vsyncpa [#allocation4], 0 }
   0x8   :  { %15 = vsyncpa [#allocation4 + $0x1], 0  ;;  %s2095_s9 = smov 0   ;;  %s2097_s10 = smov 0  }
   0x9   :  { %s2099_s11 = smov 0   ;;  %s2101_s12 = smov 0  }
   0xa LB: > { %s2116_s13 = sadd.s32 4294967295, %s2069_s12   ;;  %s1763_s14 = sadd.s32 4294967294, %s2069_s12   ;;  %s2069_s12 = sphi %s2101_s12, %s3192_s12   ;;  %s2065_s11 = sphi %s2099_s11, %s3191_s11   ;;  %s2061_s10 = sphi %s2097_s10, %s3190_s10   ;;  %s2057_s9 = sphi %s2095_s9, %s3189_s9  }
   0xb   : > { %s2120_s15 = sadd.s32 1, %s2069_s12   ;;  %s28_s16 = sadd.s32 1, %s2065_s11 }
   0xc   : > { %s25_s17 = ssub.s32 %s2069_s12, %s2120_s15  ;;  %p35_p0 = scmp.ne.s32.totalorder %s2065_s11, %s2061_s10 }
   0xd   : > { %p26_p1 = scmp.eq.s32.totalorder %s25_s17, 0  ;;  %p36_p2 = scmp.eq.s32.totalorder %s2069_s12, 0 }
   0xe   : > { %p41_p3 = scmp.ne.s32.totalorder %s2061_s10, %s2057_s9  ;;  %p42_p4 = scmp.eq.s32.totalorder %s2116_s13, 0 }
   0xf   : > { %s2132_s18 = scalar_select %p26_p1, %s2065_s11, %s28_s16  }
  0x10   : > { %p2134_p5 = por %p36_p2, %p35_p0  ;;  %p2138_p6 = por %p42_p4, %p41_p3 }
  0x11   : > { %3175 = sst [smem:[#allocation11_spill]] %s2132_s18  ;;  %p91_p7 = scmp.eq.s32.totalorder %s2116_s13, 1 }
  0x12   : > { %s3177_s20 = scalar_select %p2138_p6, 1, 0 }
  0x13   : > { %p97_p8 = scmp.eq.s32.totalorder %s1763_s14, 1  ;;  %p1871_p10 = scmp.lt.s32.totalorder %s2069_s12, 2 }
  0x14   : > { %p2145_p11 = por %p91_p7, %p35_p0  ;;  %s2154_s23 = sand.u32 1, %s2065_s11  }
  0x15   : > { %p2149_p12 = por %p97_p8, %p41_p3  ;;  %s1795_s24 = sshll.u32 %s2069_s12, 10 }
  0x16   : > { %s3178_s21 = scalar_select %p2145_p11, 1, 0 }
  0x17   : > { %s3179_s22 = scalar_select %p2149_p12, 1, 0 }
  0x18   : > { %s1766_s25 = sshll.u32 %s2154_s23, 6  ;;  %s3180_s0 = sld [smem:[#allocation12_spill]] }
  0x19   : > { %s121_s29 = scalar_lea.vmem [#allocation2], %s1766_s25  ;;  %p2169_p13 = pnand %p1871_p10, %p2134_p5 }
  0x1a   : > { %s129_s30 = sshll.u32 %s121_s29, 4  ;;  %s118_s4 = scalar_lea.sflag [#allocation3], %s2154_s23  ;;  %s2173_s30 = int_to_ptr.vmem [resolvable:$true] %s129_s30 }
  0x1b   : > { %p1947_p1 = pneg %p2169_p13 }
  0x1e   : > { %s2163_s28 = scalar_lea.hbm %s3180_s0, %s1795_s24  ;;  %s1950_s8 = scalar_lea.hbm %s3180_s0, 2048 }
  0x1f   : > { %s1945_s5 = scalar_lea.hbm %s2163_s28, 1024  ;;  %p1951_p4 = scmp.lt.s32.totalorder %s2163_s28, %s3180_s0 }
  0x20   : > { %p1946_p0 = scmp.ne.s32.totalorder %s2163_s28, %s1945_s5  ;;  %p1952_p5 = scmp.lt.s32.totalorder %s1950_s8, %s1945_s5 }
  0x22   : > { %p1948_p2 = pnand %p1947_p1, %p1946_p0  ;;  %p1953_p7 = por %p1952_p5, %p1951_p4 }
  0x24   : > { %p1949_p3 = pneg %p1948_p2 }
  0x26   : > { %p1954_p8 = pnand %p1953_p7, %p1949_p3 }
  0x28   : > { %1957 = shalt.err (!%p1954_p8)
}
  0x29   : > { %s1958_s17 = scalar_lea.vmem %s2173_s30, 1024  ;;  %s2071_s19 = smov [#allocation2]  }
  0x2a   : > { %p1959_p10 = scmp.ne.s32.totalorder %s2173_s30, %s1958_s17  ;;  %s1963_s26 = sshll.u32 %s2071_s19, 4  ;;  %s1964_s26 = int_to_ptr.vmem [resolvable:$false] %s1963_s26 }
  0x2b   : > { %s1965_s27 = scalar_lea.vmem %s1964_s26, 2048  ;;  %p1966_p9 = scmp.lt.s32.totalorder %s2173_s30, %s1964_s26 }
  0x2c   : > { %p1961_p0 = pnand %p1959_p10, %p1947_p1  ;;  %p1967_p12 = scmp.lt.s32.totalorder %s1965_s27, %s1958_s17 }
  0x2e   : > { %p1962_p2 = pneg %p1961_p0  ;;  %p1968_p11 = por %p1967_p12, %p1966_p9 }
  0x30   : > { %p1969_p4 = pnand %p1968_p11, %p1962_p2 }
  0x32   : > { %1972 = shalt.err (!%p1969_p4)
}
  0x33   : > { %s2072_s29 = smov 128   ;;  %s2073_s5 = smov 8  }
  0x34   : > { %1863 = dma.hbm_to_vmem [thread:$0]  (!%p2169_p13), %s2163_s28, 1024, %s2173_s30, %s118_s4, %s2072_s29, %s2072_s29, %s2073_s5  }
  0x35   : > { %p1774_p9 = scmp.ge.s32.totalorder %s2069_s12, 1  ;;  %p159_p11 = scmp.lt.s32.totalorder %s2069_s12, 3 }
  0x36   : > { %s3183_s1 = sld [smem:[#allocation13_spill]]  ;;  %s143_s16 = scalar_lea.vmem [#allocation5], %s1766_s25 }
  0x37   : > { %p2207_p12 = pnand %p1774_p9, %p159_p11  ;;  %s151_s17 = sshll.u32 %s143_s16, 4  ;;  %s2220_s17 = int_to_ptr.vmem [resolvable:$true] %s151_s17 }
  0x38   : > { %s140_s28 = scalar_lea.sflag [#allocation6], %s2154_s23 }
  0x3c   : > { %s2216_s14 = scalar_lea.hbm %s3183_s1, %s1795_s24  ;;  %s1978_s24 = scalar_lea.hbm %s3183_s1, 2048 }
  0x3d   : > { %s1973_s30 = scalar_lea.hbm %s2216_s14, 1024  ;;  %p1979_p8 = scmp.lt.s32.totalorder %s2216_s14, %s3183_s1 }
  0x3e   : > { %p1974_p3 = scmp.ne.s32.totalorder %s2216_s14, %s1973_s30  ;;  %p1980_p10 = scmp.lt.s32.totalorder %s1978_s24, %s1973_s30 }
  0x40   : > { %p1976_p5 = pnand %p1974_p3, %p1947_p1  ;;  %p1981_p0 = por %p1980_p10, %p1979_p8 }
  0x42   : > { %p1977_p7 = pneg %p1976_p5 }
  0x44   : > { %p1982_p2 = pnand %p1981_p0, %p1977_p7 }
  0x46   : > { %1985 = shalt.err (!%p1982_p2)
}
  0x47   : > { %s1986_s23 = scalar_lea.vmem %s2220_s17, 1024  ;;  %s2074_s25 = smov [#allocation5]  }
  0x48   : > { %p1987_p4 = scmp.ne.s32.totalorder %s2220_s17, %s1986_s23  ;;  %s1991_s7 = sshll.u32 %s2074_s25, 4  ;;  %s1992_s7 = int_to_ptr.vmem [resolvable:$false] %s1991_s7 }
  0x49   : > { %s1993_s8 = scalar_lea.vmem %s1992_s7, 2048  ;;  %p1994_p3 = scmp.lt.s32.totalorder %s2220_s17, %s1992_s7 }
  0x4a   : > { %p1989_p9 = pnand %p1987_p4, %p1947_p1  ;;  %p1995_p5 = scmp.lt.s32.totalorder %s1993_s8, %s1986_s23 }
  0x4c   : > { %p1990_p11 = pneg %p1989_p9  ;;  %p1996_p6 = por %p1995_p5, %p1994_p3 }
  0x4e   : > { %p1997_p8 = pnand %p1996_p6, %p1990_p11 }
  0x50   : > { %2000 = shalt.err (!%p1997_p8)
}
  0x51   : > { %1866 = dma.hbm_to_vmem [thread:$0]  (!%p2169_p13), %s2216_s14, 1024, %s2220_s17, %s140_s28, %s2072_s29, %s2072_s29, %s2073_s5  }
  0x52   : > { %163 = sbr.rel (%p2207_p12) target bundleno = 795 (0x31b), region = 28  ;;  %s2251_s16 = sand.u32 (!%p2207_p12), 1, %s2061_s10  }
  0x53   : > { %s1775_s30 = sshll.u32 (!%p2207_p12), %s2251_s16, 6  ;;  %s166_s4 = scalar_lea.sflag (!%p2207_p12), [#allocation3], %s2251_s16 }
  0x54   : > { %s2255_s19 = scalar_lea.vmem (!%p2207_p12), [#allocation2], %s1775_s30  ;;  %p3184_p6 = scmp.ne.s32.totalorder (!%p2207_p12), %s3177_s20, 0 }
  0x57   : > { %2044 = dma.done.wait (%p3184_p6), %s166_s4, 1024  }
  0x58   : > { %2046 = vsyncadd (%p3184_p6), %s166_s4, 4294966272  ;;  %s175_s3 = scalar_lea.sflag [#allocation6], %s2251_s16  ;;  %s2262_s29 = scalar_lea.vmem [#allocation5], %s1775_s30 }
  0x59   : > { %2048 = dma.done.wait (%p3184_p6), %s175_s3, 1024  }
  0x5a   : > { %2050 = vsyncadd (%p3184_p6), %s175_s3, 4294966272  ;;  %v212_v0 = vld [vmem:[%s2262_s29] sm:$0xff]  ;;  %v213_v1 = vld [vmem:[%s2262_s29 + $0x8] sm:$0xff]  ;;  %s2075_s5 = smov 127   ;;  %s2076_s20 = smov 1   ;;  %vm270_vm0 = vcmask 1039360  }
  0x5b   : > { %v234_v2 = vadd.f32 %v213_v1, %v212_v0  ;;  %v2270_v3 = vsub.f32 1.0, %v212_v0  ;;  %v210_v4 = vld [vmem:[%s2255_s19] sm:$0xff]  ;;  %v1779_v5 = vld [vmem:[%s2255_s19 + $0x18] sm:$0xff]  ;;  %v211_v8 = vld [vmem:[%s2255_s19 + $0x8] sm:$0xff]  ;;  %v2282_v14 = vsub.f32 1.0, %v213_v1  ;;  %vm281_vm1 = vcmask 7168  }
  0x5c   : > { %v214_v6 = vsub.f32 0.0, %v210_v4  ;;  %v588_v7 = vsub.f32 0.0, %v1779_v5  ;;  %v215_v9 = vsub.f32 0.0, %v211_v8  ;;  %v2280_v13 = vld [vmem:[%s2262_s29 + $0x18] sm:$0xff]  ;;  %v2292_v20 = vld [vmem:[%s2262_s29 + $0x10] sm:$0xff]  ;;  %v1782_v35 = vld [vmem:[%s2255_s19 + $0x20] sm:$0xff] }
  0x5d   : > { %235 = vadd.xlane.f32.xlu0 %v234_v2  ;;  %264 = vrot.lane.b32.xlu1 %v2270_v3, %s2075_s5  ;;  %v2287_v15 = vsub.f32 1.0, %v2280_v13  ;;  %v2297_v23 = vsub.f32 1.0, %v2292_v20  ;;  %v1778_v30 = vld [vmem:[%s2255_s19 + $0x10] sm:$0xff]  ;;  %v945_v37 = vsub.f32 0.0, %v1782_v35  ;;  %v1783_v38 = vld [vmem:[%s2255_s19 + $0x28] sm:$0xff]  ;;  %v1787_v48 = vld [vmem:[%s2255_s19 + $0x38] sm:$0xff] }
  0x5e   : > { %v216_v10 = vmul.f32 1.442695, %v214_v6  ;;  %v591_v11 = vmul.f32 1.442695, %v588_v7  ;;  %v218_v12 = vmul.f32 1.442695, %v215_v9 }
  0x5f   : > { %v587_v33 = vsub.f32 0.0, %v1778_v30  ;;  %v947_v39 = vmul.f32 1.442695, %v945_v37  ;;  %v946_v41 = vsub.f32 0.0, %v1783_v38  ;;  %v1786_v44 = vld [vmem:[%s2255_s19 + $0x30] sm:$0xff]  ;;  %v1304_v51 = vsub.f32 0.0, %v1787_v48 }
  0x60   : > { %1911 = vpow2.f32 %v216_v10  ;;  %v1303_v45 = vsub.f32 0.0, %v1786_v44  ;;  %v2337_v57 = vld [vmem:[%s2262_s29 + $0x20] sm:$0xff]  ;;  %v2347_v61 = vld [vmem:[%s2262_s29 + $0x28] sm:$0xff]  ;;  %v1788_v6 = vld [vmem:[%s2262_s29 + $0x30] sm:$0xff]  ;;  %vm288_vm2 = vcmask 1046528   ;;  %vm297_vm3 = vcmask 1040384  }
  0x61   : > { %275 = vrot.lane.b32.xlu1 %v2270_v3, %s2076_s20  ;;  %1913 = vpow2.f32 %v591_v11  ;;  %v589_v34 = vmul.f32 1.442695, %v587_v33  ;;  %v949_v43 = vmul.f32 1.442695, %v946_v41  ;;  %v1307_v55 = vmul.f32 1.442695, %v1304_v51 }
  0x62   : > { %1915 = vpow2.f32 %v218_v12  ;;  %v1305_v49 = vmul.f32 1.442695, %v1303_v45  ;;  %v2342_v59 = vsub.f32 1.0, %v2337_v57  ;;  %v2375_v7 = vsub.f32 1.0, %v1788_v6  ;;  %v1789_v8 = vld [vmem:[%s2262_s29 + $0x38] sm:$0xff]  ;;  %s2077_s6 = smov 126  }
  0x63   : > { %v2386_v10 = vsub.f32 1.0, %v1789_v8  ;;  %s2078_s14 = smov 2   ;;  %vm378_vm4 = vcmask 1031168   ;;  %vm389_vm5 = vcmask 15360   ;;  %vm412_vm6 = vcmask 1045504   ;;  %p3185_p1 = scmp.ne.s32.totalorder %s3178_s21, 0 }
  0x64   : > { %vm421_vm7 = vcmask 1041408  }
  0x65   : > { %277 = vrot.lane.b32.xlu1 %v2282_v14, %s2076_s20 }
  0x69   : > { %639 = vrot.lane.b32.xlu1 %v2287_v15, %s2075_s5 }
  0x6d   : > { %v1912_v16 = vpop.eup %1911 }
  0x6e   : > { %v1914_v17 = vpop.eup %1913  ;;  %v220_v18 = vadd.f32 1.0, %v1912_v16 }
  0x6f   : > { %v1916_v19 = vpop.eup %1915  ;;  %v594_v21 = vadd.f32 1.0, %v1914_v17 }
  0x70   : > { %1917 = vrcp.f32 %v220_v18  ;;  %v221_v22 = vadd.f32 1.0, %v1916_v19 }
  0x72   : > { %1919 = vrcp.f32 %v221_v22 }
  0x73   : > { %266 = vrot.lane.b32.xlu0 %v2282_v14, %s2075_s5  ;;  %1921 = vrcp.f32 %v594_v21 }
  0x74   : > { %1923 = vpow2.f32 %v589_v34 }
  0x75   : > { %1925 = vpow2.f32 %v947_v39 }
  0x77   : > { %637 = vrot.lane.b32.xlu0 %v2297_v23, %s2075_s5 }
  0x7d   : > { %v1918_v24 = vpop.eup %1917 }
  0x7e   : > { %v2301_v25 = vsub.f32 1.0, %v1918_v24  ;;  %v244_v26 = vmul.f32 %v1918_v24, %v212_v0 }
  0x7f   : > { %v1920_v27 = vpop.eup %1919 }
  0x80   : > { %310 = vrot.lane.b32.xlu1 %v2301_v25, %s2075_s5  ;;  %v245_v28 = vmul.f32 %v1920_v27, %v213_v1  ;;  %v2305_v29 = vpop.eup %1921  ;;  %v224_v36 = vadd.f32 %v1920_v27, %v1918_v24  ;;  %v2320_v46 = vsub.f32 1.0, %v1920_v27  ;;  %v2357_v1 = vsub.f32 1.0, %v2347_v61 }
  0x81   : > { %v2311_v32 = vsub.f32 1.0, %v2305_v29  ;;  %v1924_v40 = vpop.eup %1923 }
  0x82   : > { %v246_v31 = vadd.f32 %v245_v28, %v244_v26  ;;  %v593_v42 = vadd.f32 1.0, %v1924_v40  ;;  %v1926_v47 = vpop.eup %1925 }
  0x83   : > { %v951_v50 = vadd.f32 1.0, %v1926_v47 }
  0x84   : > { %320 = vrot.lane.b32.xlu1 %v2301_v25, %s2076_s20  ;;  %1927 = vrcp.f32 %v593_v42 }
  0x85   : > { %1929 = vpow2.f32 %v949_v43 }
  0x86   : > { %1931 = vpow2.f32 %v1305_v49 }
  0x87   : > { %1933 = vrcp.f32 %v951_v50 }
  0x88   : > { %681 = vrot.lane.b32.xlu1 %v2311_v32, %s2075_s5  ;;  %1935 = vpow2.f32 %v1307_v55 }
  0x8c   : > { %649 = vrot.lane.b32.xlu1 %v2287_v15, %s2076_s20 }
  0x91   : > { %v2325_v52 = vpop.eup %1927 }
  0x92   : > { %v1930_v53 = vpop.eup %1929  ;;  %v2330_v54 = vsub.f32 1.0, %v2325_v52 }
  0x93   : > { %v952_v56 = vadd.f32 1.0, %v1930_v53  ;;  %v1932_v58 = vpop.eup %1931 }
  0x94   : > { %v2344_v60 = vpop.eup %1933  ;;  %v1309_v63 = vadd.f32 1.0, %v1932_v58 }
  0x95   : > { %1937 = vrcp.f32 %v952_v56  ;;  %v2352_v62 = vsub.f32 1.0, %v2344_v60  ;;  %v1936_v0 = vpop.eup %1935 }
  0x96   : > { %225 = vadd.xlane.f32.xlu0 %v224_v36  ;;  %1939 = vrcp.f32 %v1309_v63  ;;  %v1310_v5 = vadd.f32 1.0, %v1936_v0 }
  0x98   : > { %1941 = vrcp.f32 %v1310_v5 }
  0xa2   : > { %v2359_v2 = vpop.eup %1937 }
  0xa3   : > { %v2366_v4 = vsub.f32 1.0, %v2359_v2  ;;  %v2382_v9 = vpop.eup %1939 }
  0xa4   : > { %v2391_v11 = vsub.f32 1.0, %v2382_v9 }
  0xa5   : > { %v2395_v12 = vpop.eup %1941 }
  0xa6   : > { %v2402_v16 = vsub.f32 1.0, %v2395_v12 }
  0xac   : > { %312 = vrot.lane.b32.xlu0 %v2320_v46, %s2075_s5 }
  0xb0   : > { %247 = vadd.xlane.f32.xlu1 %v246_v31  ;;  %322 = vrot.lane.b32.xlu0 %v2320_v46, %s2076_s20 }
  0xb4   : > { %679 = vrot.lane.b32.xlu0 %v2330_v54, %s2075_s5 }
  0xb8   : > { %647 = vrot.lane.b32.xlu0 %v2297_v23, %s2076_s20 }
  0xbc   : > { %689 = vrot.lane.b32.xlu0 %v2330_v54, %s2076_s20 }
  0xc0   : > { %995 = vrot.lane.b32.xlu0 %v2342_v59, %s2075_s5 }
  0xc1   : > { %691 = vrot.lane.b32.xlu1 %v2311_v32, %s2076_s20 }
  0xc4   : > { %1037 = vrot.lane.b32.xlu0 %v2352_v62, %s2075_s5 }
  0xc5   : > { %997 = vrot.lane.b32.xlu1 %v2357_v1, %s2075_s5 }
  0xc8   : > { %1005 = vrot.lane.b32.xlu0 %v2342_v59, %s2076_s20 }
  0xc9   : > { %1039 = vrot.lane.b32.xlu1 %v2366_v4, %s2075_s5 }
  0xcc   : > { %1047 = vrot.lane.b32.xlu0 %v2352_v62, %s2076_s20 }
  0xcd   : > { %1007 = vrot.lane.b32.xlu1 %v2357_v1, %s2076_s20 }
  0xcf   : > { %v265_v17 = vpop.permute.xlu1 %264 }
  0xd0   : > { %1353 = vrot.lane.b32.xlu0 %v2375_v7, %s2075_s5  ;;  %v271_v18 = vsel %vm270_vm0, %v265_v17, 0.0 }
  0xd1   : > { %1049 = vrot.lane.b32.xlu1 %v2366_v4, %s2076_s20  ;;  %v273_v22 = vmax.f32 %v2270_v3, %v271_v18 }
  0xd3   : > { %v276_v19 = vpop.permute.xlu1 %275 }
  0xd4   : > { %1363 = vrot.lane.b32.xlu0 %v2375_v7, %s2076_s20  ;;  %v282_v24 = vsel %vm281_vm1, 0.0, %v276_v19 }
  0xd5   : > { %1355 = vrot.lane.b32.xlu1 %v2386_v10, %s2075_s5  ;;  %v284_v30 = vmax.f32 %v273_v22, %v282_v24 }
  0xd7   : > { %v278_v26 = vpop.permute.xlu1 %277  ;;  %v289_v35 = vrot.slane %v284_v30, 1  ;;  %v298_v36 = vrot.slane %v284_v30, 7 }
  0xd8   : > { %1395 = vrot.lane.b32.xlu0 %v2391_v11, %s2075_s5  ;;  %v283_v33 = vsel %vm281_vm1, 0.0, %v278_v26 }
  0xd9   : > { %1365 = vrot.lane.b32.xlu1 %v2386_v10, %s2076_s20  ;;  %v303_v43 = vsel %vm297_vm3, 0.0, %v298_v36 }
  0xdc   : > { %1405 = vrot.lane.b32.xlu0 %v2391_v11, %s2076_s20 }
  0xdd   : > { %1397 = vrot.lane.b32.xlu1 %v2402_v16, %s2075_s5 }
  0xe1   : > { %1407 = vrot.lane.b32.xlu1 %v2402_v16, %s2076_s20 }
  0xe6   : > { %v236_v21 = vpop.xlane.xlu0 %235 }
  0xe7   : > { %v237_v50 = vrot.slane %v236_v21, 4 }
  0xe9   : > { %v238_v53 = vadd.f32 %v237_v50, %v236_v21 }
  0xea   : > { %v267_v27 = vpop.permute.xlu0 %266 }
  0xeb   : > { %v272_v28 = vsel %vm270_vm0, %v267_v27, 0.0  ;;  %v239_v63 = vrot.slane %v238_v53, 2 }
  0xec   : > { %v274_v31 = vmax.f32 %v2282_v14, %v272_v28 }
  0xed   : > { %v240_v17 = vadd.f32 %v239_v63, %v238_v53 }
  0xee   : > { %v285_v34 = vmax.f32 %v274_v31, %v283_v33  ;;  %v638_v55 = vpop.permute.xlu0 %637 }
  0xef   : > { %v241_v27 = vrot.slane %v240_v17, 1 }
  0xf0   : > { %v290_v37 = vrot.slane %v285_v34, 1  ;;  %v299_v38 = vrot.slane %v285_v34, 7 }
  0xf2   : > { %v291_v39 = vsel %vm288_vm2, %v289_v35, %v290_v37  ;;  %v294_v40 = vsel %vm288_vm2, %v290_v37, 0.0  ;;  %v300_v44 = vsel %vm297_vm3, %v298_v36, %v299_v38  ;;  %v643_v35 = vsel %vm270_vm0, %v638_v55, 0.0 }
  0xf3   : > { %v295_v41 = vmax.f32 %v284_v30, %v291_v39  ;;  %v296_v42 = vmax.f32 %v285_v34, %v294_v40  ;;  %v242_v34 = vadd.f32 %v241_v27, %v240_v17  ;;  %v645_v37 = vmax.f32 %v2297_v23, %v643_v35 }
  0xf5   : > { %v304_v45 = vmax.f32 %v295_v41, %v303_v43  ;;  %v305_v47 = vmax.f32 %v296_v42, %v300_v44 }
  0xf7   : > { %v2421_v48 = vsub.f32 %v304_v45, %v2270_v3  ;;  %v2424_v49 = vsub.f32 %v305_v47, %v2282_v14  ;;  %v640_v3 = vpop.permute.xlu1 %639 }
  0xf8   : > { %v644_v18 = vsel %vm270_vm0, %v640_v3, 0.0 }
  0xf9   : > { %352 = vrot.lane.b32.xlu1 %v2421_v48, %s2075_s5  ;;  %354 = vrot.lane.b32.xlu0 %v2424_v49, %s2075_s5  ;;  %v646_v26 = vmax.f32 %v2287_v15, %v644_v18 }
  0xfb   : > { %v2442_v14 = vpop.permute.xlu1 %310 }
  0xfd   : > { %362 = vrot.lane.b32.xlu1 %v2421_v48, %s2076_s20  ;;  %364 = vrot.lane.b32.xlu0 %v2424_v49, %s2076_s20 }
  0xff   : > { %v2444_v51 = vpop.permute.xlu1 %320 }
 0x101   : > { %372 = vrot.lane.b32.xlu1 %v2421_v48, %s2077_s6  ;;  %374 = vrot.lane.b32.xlu0 %v2424_v49, %s2077_s6 }
 0x103   : > { %v2446_v56 = vpop.permute.xlu1 %681 }
 0x105   : > { %383 = vrot.lane.b32.xlu1 %v2421_v48, %s2078_s14  ;;  %385 = vrot.lane.b32.xlu0 %v2424_v49, %s2078_s14 }
 0x107   : > { %v650_v6 = vpop.permute.xlu1 %649 }
 0x108   : > { %v654_v22 = vsel %vm281_vm1, 0.0, %v650_v6 }
 0x109   : > { %v656_v30 = vmax.f32 %v646_v26, %v654_v22 }
 0x10b   : > { %v660_v36 = vrot.slane %v656_v30, 1  ;;  %v668_v42 = vrot.slane %v656_v30, 7 }
 0x10d   : > { %v664_v40 = vsel %vm288_vm2, %v660_v36, 0.0 }
 0x10e   : > { %v666_v47 = vmax.f32 %v656_v30, %v664_v40 }
 0x11f   : > { %v226_v58 = vpop.xlane.xlu0 %225 }
 0x120   : > { %v227_v0 = vrot.slane %v226_v58, 4 }
 0x122   : > { %v228_v5 = vadd.f32 %v227_v0, %v226_v58 }
 0x123   : > { %v2448_v8 = vpop.permute.xlu0 %312 }
 0x124   : > { %v229_v19 = vrot.slane %v228_v5, 2 }
 0x126   : > { %v230_v24 = vadd.f32 %v229_v19, %v228_v5 }
 0x127   : > { %v2453_v21 = vpop.permute.xlu0 %322 }
 0x128   : > { %v231_v28 = vrot.slane %v230_v24, 1 }
 0x12a   : > { %v232_v31 = vadd.f32 %v231_v28, %v230_v24 }
 0x12b   : > { %v2455_v33 = vpop.permute.xlu0 %679 }
 0x12c   : > { %1798 = vpush %v232_v31 }
 0x12d   : > { %1800 = vpush %v242_v34 }
 0x12f   : > { %v648_v38 = vpop.permute.xlu0 %647 }
 0x130   : > { %v653_v39 = vsel %vm281_vm1, 0.0, %v648_v38 }
 0x131   : > { %v655_v41 = vmax.f32 %v645_v37, %v653_v39 }
 0x133   : > { %v659_v43 = vrot.slane %v655_v41, 1  ;;  %v667_v44 = vrot.slane %v655_v41, 7  ;;  %v2461_v45 = vpop.permute.xlu0 %689 }
 0x135   : > { %v661_v3 = vsel %vm288_vm2, %v659_v43, %v660_v36  ;;  %v669_v50 = vsel %vm297_vm3, %v667_v44, %v668_v42  ;;  %v672_v58 = vsel %vm297_vm3, 0.0, %v667_v44 }
 0x136   : > { %v665_v53 = vmax.f32 %v655_v41, %v661_v3  ;;  %v674_v55 = vmax.f32 %v666_v47, %v669_v50  ;;  %v317_v50 = vsel %vm270_vm0, %v2448_v8, 0.0 }
 0x137   : > { %v996_v63 = vpop.permute.xlu0 %995 }
 0x138   : > { %v673_v0 = vmax.f32 %v665_v53, %v672_v58  ;;  %v2467_v5 = vsub.f32 %v674_v55, %v2287_v15  ;;  %v1001_v27 = vsel %vm270_vm0, %v996_v63, 0.0 }
 0x139   : > { %v248_v6 = vpop.xlane.xlu1 %247  ;;  %v1003_v31 = vmax.f32 %v2342_v59, %v1001_v27 }
 0x13a   : > { %v2470_v17 = vsub.f32 %v673_v0, %v2297_v23  ;;  %v249_v18 = vrot.slane %v248_v6, 4  ;;  %723 = vrot.lane.b32.xlu1 %v2467_v5, %s2075_s5  ;;  %v319_v0 = vmax.f32 %v2320_v46, %v317_v50 }
 0x13b   : > { %v2476_v24 = vpop.permute.xlu0 %1037 }
 0x13c   : > { %v250_v19 = vadd.f32 %v249_v18, %v248_v6  ;;  %721 = vrot.lane.b32.xlu0 %v2470_v17, %s2075_s5 }
 0x13d   : > { %v692_v22 = vpop.permute.xlu1 %691 }
 0x13e   : > { %731 = vrot.lane.b32.xlu1 %v2470_v17, %s2076_s20  ;;  %v251_v15 = vrot.slane %v250_v19, 2 }
 0x13f   : > { %v1006_v30 = vpop.permute.xlu0 %1005 }
 0x140   : > { %733 = vrot.lane.b32.xlu0 %v2467_v5, %s2076_s20  ;;  %v252_v23 = vadd.f32 %v251_v15, %v250_v19  ;;  %v1011_v37 = vsel %vm281_vm1, 0.0, %v1006_v30  ;;  %v327_v19 = vsel %vm281_vm1, 0.0, %v2453_v21  ;;  %v326_v21 = vsel %vm281_vm1, 0.0, %v2444_v51 }
 0x141   : > { %v998_v26 = vpop.permute.xlu1 %997  ;;  %v1013_v39 = vmax.f32 %v1003_v31, %v1011_v37  ;;  %v329_v27 = vmax.f32 %v319_v0, %v327_v19 }
 0x142   : > { %v253_v28 = vrot.slane %v252_v23, 1  ;;  %v1002_v36 = vsel %vm270_vm0, %v998_v26, 0.0 }
 0x143   : > { %v1004_v38 = vmax.f32 %v2357_v1, %v1002_v36  ;;  %v1017_v43 = vrot.slane %v1013_v39, 1  ;;  %v1025_v44 = vrot.slane %v1013_v39, 7  ;;  %v333_v31 = vrot.slane %v329_v27, 1 }
 0x144   : > { %v254_v35 = vadd.f32 %v253_v28, %v252_v23  ;;  %v316_v28 = vsel %vm270_vm0, %v2442_v14, 0.0  ;;  %v696_v14 = vsel %vm281_vm1, 0.0, %v692_v22 }
 0x145   : > { %v1040_v34 = vpop.permute.xlu1 %1039  ;;  %v1030_v6 = vsel %vm297_vm3, 0.0, %v1025_v44  ;;  %v318_v30 = vmax.f32 %v2301_v25, %v316_v28 }
 0x146   : > { %1802 = vpush %v254_v35 }
 0x147   : > { %v328_v35 = vmax.f32 %v318_v30, %v326_v21 }
 0x149   : > { %v1008_v40 = vpop.permute.xlu1 %1007  ;;  %v332_v22 = vrot.slane %v328_v35, 1 }
 0x14a   : > { %v1012_v41 = vsel %vm281_vm1, 0.0, %v1008_v40 }
 0x14b   : > { %v1014_v42 = vmax.f32 %v1004_v38, %v1012_v41  ;;  %v341_v38 = vrot.slane %v329_v27, 7  ;;  %v340_v41 = vrot.slane %v328_v35, 7 }
 0x14d   : > { %v1018_v47 = vrot.slane %v1014_v42, 1  ;;  %v1026_v3 = vrot.slane %v1014_v42, 7 }
 0x14f   : > { %v1019_v53 = vsel %vm288_vm2, %v1017_v43, %v1018_v47  ;;  %v1022_v55 = vsel %vm288_vm2, %v1018_v47, 0.0  ;;  %v1027_v18 = vsel %vm297_vm3, %v1025_v44, %v1026_v3  ;;  %v1050_v47 = vpop.permute.xlu1 %1049 }
 0x150   : > { %v1023_v58 = vmax.f32 %v1013_v39, %v1019_v53  ;;  %v1024_v63 = vmax.f32 %v1014_v42, %v1022_v55  ;;  %v334_v42 = vsel %vm288_vm2, %v332_v22, %v333_v31  ;;  %v1044_v53 = vsel %vm270_vm0, %v1040_v34, 0.0 }
 0x151   : > { %v338_v3 = vmax.f32 %v328_v35, %v334_v42 }
 0x152   : > { %v1031_v15 = vmax.f32 %v1023_v58, %v1030_v6  ;;  %v1032_v23 = vmax.f32 %v1024_v63, %v1027_v18  ;;  %v1054_v58 = vsel %vm281_vm1, 0.0, %v1050_v47  ;;  %v345_v63 = vsel %vm297_vm3, 0.0, %v340_v41 }
 0x153   : > { %v1046_v6 = vmax.f32 %v2366_v4, %v1044_v53  ;;  %v346_v18 = vmax.f32 %v338_v3, %v345_v63 }
 0x154   : > { %v2498_v26 = vsub.f32 %v1031_v15, %v2342_v59  ;;  %v2501_v8 = vsub.f32 %v1032_v23, %v2357_v1  ;;  %v686_v59 = vsel %vm270_vm0, %v2446_v56, 0.0  ;;  %v685_v1 = vsel %vm270_vm0, %v2455_v33, 0.0  ;;  %v1048_v23 = vpop.permute.xlu0 %1047 }
 0x155   : > { %v688_v51 = vmax.f32 %v2311_v32, %v686_v59  ;;  %v687_v36 = vmax.f32 %v2330_v54, %v685_v1  ;;  %v695_v56 = vsel %vm281_vm1, 0.0, %v2461_v45  ;;  %v337_v33 = vsel %vm288_vm2, %v333_v31, 0.0 }
 0x156   : > { %1081 = vrot.lane.b32.xlu0 %v2501_v8, %s2075_s5  ;;  %1079 = vrot.lane.b32.xlu1 %v2498_v26, %s2075_s5  ;;  %v339_v40 = vmax.f32 %v329_v27, %v337_v33  ;;  %v342_v45 = vsel %vm297_vm3, %v340_v41, %v341_v38  ;;  %v1043_v15 = vsel %vm270_vm0, %v2476_v24, 0.0  ;;  %v1056_v27 = vmax.f32 %v1046_v6, %v1054_v58 }
 0x157   : > { %v698_v37 = vmax.f32 %v688_v51, %v696_v14  ;;  %v697_v39 = vmax.f32 %v687_v36, %v695_v56  ;;  %v1045_v21 = vmax.f32 %v2352_v62, %v1043_v15  ;;  %v2557_v59 = vsub.f32 %v346_v18, %v2301_v25 }
 0x158   : > { %v347_v50 = vmax.f32 %v339_v40, %v342_v45  ;;  %v1053_v1 = vsel %vm281_vm1, 0.0, %v1048_v23  ;;  %v1060_v30 = vrot.slane %v1056_v27, 1  ;;  %v1068_v33 = vrot.slane %v1056_v27, 7 }
 0x159   : > { %v702_v43 = vrot.slane %v698_v37, 1  ;;  %v701_v44 = vrot.slane %v697_v39, 1  ;;  %v709_v0 = vrot.slane %v697_v39, 7  ;;  %v710_v31 = vrot.slane %v698_v37, 7 }
 0x15a   : > { %743 = vrot.lane.b32.xlu0 %v2467_v5, %s2077_s6  ;;  %741 = vrot.lane.b32.xlu1 %v2470_v17, %s2077_s6  ;;  %v2546_v19 = vsub.f32 %v347_v50, %v2320_v46  ;;  %v1055_v14 = vmax.f32 %v1045_v21, %v1053_v1  ;;  %v1064_v25 = vsel %vm288_vm2, %v1060_v30, 0.0 }
 0x15b   : > { %v703_v55 = vsel %vm288_vm2, %v701_v44, %v702_v43  ;;  %v714_v28 = vsel %vm297_vm3, 0.0, %v709_v0  ;;  %v706_v24 = vsel %vm288_vm2, %v702_v43, 0.0  ;;  %v711_v36 = vsel %vm297_vm3, %v709_v0, %v710_v31  ;;  %v1354_v43 = vpop.permute.xlu0 %1353  ;;  %v1356_v44 = vpop.permute.xlu1 %1355 }
 0x15c   : > { %v707_v34 = vmax.f32 %v697_v39, %v703_v55  ;;  %v708_v35 = vmax.f32 %v698_v37, %v706_v24  ;;  %v1059_v56 = vrot.slane %v1055_v14, 1  ;;  %v1066_v38 = vmax.f32 %v1056_v27, %v1064_v25 }
 0x15d   : > { %v1067_v39 = vrot.slane %v1055_v14, 7  ;;  %v1360_v55 = vsel %vm270_vm0, %v1356_v44, 0.0  ;;  %v1359_v58 = vsel %vm270_vm0, %v1354_v43, 0.0  ;;  %s1799_s17 = spop %1798 }
 0x15e   : > { %1091 = vrot.lane.b32.xlu0 %v2501_v8, %s2076_s20  ;;  %1089 = vrot.lane.b32.xlu1 %v2498_v26, %s2076_s20  ;;  %v715_v46 = vmax.f32 %v707_v34, %v714_v28  ;;  %v716_v22 = vmax.f32 %v708_v35, %v711_v36  ;;  %v1061_v37 = vsel %vm288_vm2, %v1059_v56, %v1060_v30  ;;  %s3013_s28 = spop %1800 }
 0x15f   : > { %v1065_v41 = vmax.f32 %v1055_v14, %v1061_v37  ;;  %v1072_v45 = vsel %vm297_vm3, 0.0, %v1067_v39  ;;  %v1364_v50 = vpop.permute.xlu0 %1363  ;;  %v1366_v53 = vpop.permute.xlu1 %1365  ;;  %v1361_v63 = vmax.f32 %v2375_v7, %v1359_v58 }
 0x160   : > { %v2566_v51 = vsub.f32 %v715_v46, %v2330_v54  ;;  %v1069_v54 = vsel %vm297_vm3, %v1067_v39, %v1068_v33  ;;  %v2581_v40 = vsub.f32 %v716_v22, %v2311_v32  ;;  %v1370_v0 = vsel %vm281_vm1, 0.0, %v1366_v53 }
 0x161   : > { %v1074_v42 = vmax.f32 %v1066_v38, %v1069_v54  ;;  %v1073_v47 = vmax.f32 %v1065_v41, %v1072_v45 }
 0x162   : > { %753 = vrot.lane.b32.xlu0 %v2467_v5, %s2078_s14  ;;  %751 = vrot.lane.b32.xlu1 %v2470_v17, %s2078_s14 }
 0x163   : > { %v2589_v3 = vsub.f32 %v1074_v42, %v2366_v4  ;;  %v2596_v32 = vsub.f32 %v1073_v47, %v2352_v62  ;;  %v1362_v4 = vmax.f32 %v2386_v10, %v1360_v55  ;;  %v1369_v62 = vsel %vm281_vm1, 0.0, %v1364_v50  ;;  %v1396_v6 = vpop.permute.xlu0 %1395  ;;  %v1398_v18 = vpop.permute.xlu1 %1397 }
 0x164   : > { %v1371_v15 = vmax.f32 %v1361_v63, %v1369_v62  ;;  %v1401_v23 = vsel %vm270_vm0, %v1396_v6, 0.0  ;;  %v1402_v27 = vsel %vm270_vm0, %v1398_v18, 0.0 }
 0x165   : > { %v1372_v34 = vmax.f32 %v1362_v4, %v1370_v0  ;;  %v1403_v28 = vmax.f32 %v2391_v11, %v1401_v23  ;;  %v1404_v24 = vmax.f32 %v2402_v16, %v1402_v27 }
 0x166   : > { %1101 = vrot.lane.b32.xlu0 %v2501_v8, %s2077_s6  ;;  %1099 = vrot.lane.b32.xlu1 %v2498_v26, %s2077_s6  ;;  %v1375_v1 = vrot.slane %v1371_v15, 1  ;;  %v1383_v35 = vrot.slane %v1371_v15, 7 }
 0x167   : > { %v1406_v21 = vpop.permute.xlu0 %1405  ;;  %v1376_v46 = vrot.slane %v1372_v34, 1  ;;  %v1408_v30 = vpop.permute.xlu1 %1407  ;;  %v1384_v56 = vrot.slane %v1372_v34, 7 }
 0x168   : > { %v1411_v31 = vsel %vm281_vm1, 0.0, %v1406_v21  ;;  %v1412_v14 = vsel %vm281_vm1, 0.0, %v1408_v30  ;;  %v1388_v54 = vsel %vm297_vm3, 0.0, %v1383_v35 }
 0x169   : > { %v1413_v25 = vmax.f32 %v1403_v28, %v1411_v31  ;;  %v1380_v36 = vsel %vm288_vm2, %v1376_v46, 0.0  ;;  %v1377_v33 = vsel %vm288_vm2, %v1375_v1, %v1376_v46  ;;  %v1414_v22 = vmax.f32 %v1404_v24, %v1412_v14 }
 0x16a   : > { %434 = vrot.lane.b32.xlu0 %v2546_v19, %s2075_s5  ;;  %1109 = vrot.lane.b32.xlu1 %v2498_v26, %s2078_s14  ;;  %v1382_v38 = vmax.f32 %v1372_v34, %v1380_v36  ;;  %v1381_v39 = vmax.f32 %v1371_v15, %v1377_v33  ;;  %v1385_v37 = vsel %vm297_vm3, %v1383_v35, %v1384_v56 }
 0x16b   : > { %v1418_v41 = vrot.slane %v1414_v22, 1  ;;  %v1417_v42 = vrot.slane %v1413_v25, 1  ;;  %v1426_v47 = vrot.slane %v1414_v22, 7  ;;  %v1425_v53 = vrot.slane %v1413_v25, 7  ;;  %v353_v34 = vpop.permute.xlu1 %352  ;;  %v355_v15 = vpop.permute.xlu0 %354 }
 0x16c   : > { %v1389_v43 = vmax.f32 %v1381_v39, %v1388_v54  ;;  %v1390_v45 = vmax.f32 %v1382_v38, %v1385_v37  ;;  %v358_v31 = vsel %vm270_vm0, %v353_v34, 0.0  ;;  %v359_v14 = vsel %vm270_vm0, %v355_v15, 0.0 }
 0x16d   : > { %v1422_v44 = vsel %vm288_vm2, %v1418_v41, 0.0  ;;  %v1419_v50 = vsel %vm288_vm2, %v1417_v42, %v1418_v41  ;;  %v1427_v0 = vsel %vm297_vm3, %v1425_v53, %v1426_v47  ;;  %v1430_v62 = vsel %vm297_vm3, 0.0, %v1425_v53 }
 0x16e   : > { %444 = vrot.lane.b32.xlu0 %v2546_v19, %s2076_s20  ;;  %432 = vrot.lane.b32.xlu1 %v2557_v59, %s2075_s5  ;;  %v2645_v55 = vsub.f32 %v1389_v43, %v2375_v7  ;;  %v2648_v58 = vsub.f32 %v1390_v45, %v2386_v10  ;;  %v1424_v4 = vmax.f32 %v1414_v22, %v1422_v44 }
 0x16f   : > { %v1423_v63 = vmax.f32 %v1413_v25, %v1419_v50  ;;  %v363_v23 = vpop.permute.xlu1 %362  ;;  %v360_v33 = vmax.f32 %v2421_v48, %v358_v31  ;;  %v361_v22 = vmax.f32 %v2424_v49, %v359_v14 }
 0x170   : > { %v1432_v18 = vmax.f32 %v1424_v4, %v1427_v0  ;;  %v368_v36 = vsel %vm281_vm1, 0.0, %v363_v23 }
 0x171   : > { %v1431_v6 = vmax.f32 %v1423_v63, %v1430_v62  ;;  %v370_v54 = vmax.f32 %v360_v33, %v368_v36  ;;  %v516_v33 = vadd.f32 %v2424_v49, %v2421_v48 }
 0x172   : > { %797 = vrot.lane.b32.xlu0 %v2566_v51, %s2075_s5  ;;  %442 = vrot.lane.b32.xlu1 %v2557_v59, %s2076_s20  ;;  %v2664_v10 = vsub.f32 %v1432_v18, %v2402_v16 }
 0x173   : > { %v2661_v7 = vsub.f32 %v1431_v6, %v2391_v11  ;;  %v365_v11 = vpop.permute.xlu0 %364  ;;  %v373_v16 = vpop.permute.xlu1 %372 }
 0x174   : > { %v369_v56 = vsel %vm281_vm1, 0.0, %v365_v11  ;;  %v379_v38 = vsel %vm378_vm4, %v373_v16, 0.0 }
 0x175   : > { %v371_v41 = vmax.f32 %v361_v22, %v369_v56  ;;  %v381_v50 = vmax.f32 %v370_v54, %v379_v38 }
 0x176   : > { %454 = vrot.lane.b32.xlu0 %v2546_v19, %s2077_s6  ;;  %452 = vrot.lane.b32.xlu1 %v2557_v59, %s2077_s6 }
 0x177   : > { %v375_v27 = vpop.permute.xlu0 %374  ;;  %v384_v28 = vpop.permute.xlu1 %383  ;;  %s3015_s24 = spop %1802 }
 0x178   : > { %v380_v39 = vsel %vm378_vm4, %v375_v27, 0.0  ;;  %v390_v45 = vsel %vm389_vm5, 0.0, %v384_v28 }
 0x179   : > { %v382_v53 = vmax.f32 %v371_v41, %v380_v39  ;;  %v2709_v62 = vmax.f32 %v381_v50, %v390_v45 }
 0x17a   : > { %809 = vrot.lane.b32.xlu0 %v2581_v40, %s2076_s20  ;;  %799 = vrot.lane.b32.xlu1 %v2581_v40, %s2075_s5 }
 0x17b   : > { %v386_v21 = vpop.permute.xlu0 %385  ;;  %v396_v28 = vrot.slane %v2709_v62, 1 }
 0x17c   : > { %v391_v44 = vsel %vm389_vm5, 0.0, %v386_v21 }
 0x17d   : > { %v2711_v6 = vmax.f32 %v382_v53, %v391_v44  ;;  %v506_v44 = vadd.f32 %v2546_v19, %v2557_v59 }
 0x17e   : > { %807 = vrot.lane.b32.xlu1 %v2566_v51, %s2076_s20  ;;  %1157 = vrot.lane.b32.xlu0 %v2589_v3, %s2075_s5 }
 0x17f   : > { %v397_v21 = vrot.slane %v2711_v6, 1  ;;  %v405_v45 = vrot.slane %v2711_v6, 7 }
 0x181   : > { %v398_v54 = vsel %vm288_vm2, %v396_v28, %v397_v21  ;;  %v401_v41 = vsel %vm288_vm2, %v397_v21, 0.0  ;;  %v414_v28 = vrot.slane %v2711_v6, 2 }
 0x182   : > { %464 = vrot.lane.b32.xlu0 %v2546_v19, %s2078_s14  ;;  %1155 = vrot.lane.b32.xlu1 %v2596_v32, %s2075_s5  ;;  %v403_v50 = vmax.f32 %v2711_v6, %v401_v41 }
 0x183   : > { %v418_v41 = vsel %vm412_vm6, %v414_v28, 0.0 }
 0x186   : > { %819 = vrot.lane.b32.xlu0 %v2581_v40, %s2077_s6  ;;  %462 = vrot.lane.b32.xlu1 %v2557_v59, %s2078_s14 }
 0x18a   : > { %1167 = vrot.lane.b32.xlu0 %v2589_v3, %s2076_s20  ;;  %817 = vrot.lane.b32.xlu1 %v2566_v51, %s2077_s6 }
 0x18e   : > { %829 = vrot.lane.b32.xlu0 %v2581_v40, %s2078_s14  ;;  %1165 = vrot.lane.b32.xlu1 %v2596_v32, %s2076_s20 }
 0x192   : > { %1177 = vrot.lane.b32.xlu0 %v2589_v3, %s2077_s6  ;;  %827 = vrot.lane.b32.xlu1 %v2566_v51, %s2078_s14 }
 0x196   : > { %1111 = vrot.lane.b32.xlu0 %v2501_v8, %s2078_s14  ;;  %1175 = vrot.lane.b32.xlu1 %v2596_v32, %s2077_s6 }
 0x19a   : > { %1187 = vrot.lane.b32.xlu0 %v2589_v3, %s2078_s14  ;;  %1185 = vrot.lane.b32.xlu1 %v2596_v32, %s2078_s14 }
 0x19e   : > { %1439 = vrot.lane.b32.xlu0 %v2648_v58, %s2075_s5  ;;  %1437 = vrot.lane.b32.xlu1 %v2645_v55, %s2075_s5 }
 0x1a2   : > { %1449 = vrot.lane.b32.xlu0 %v2648_v58, %s2076_s20  ;;  %1447 = vrot.lane.b32.xlu1 %v2645_v55, %s2076_s20 }
 0x1a6   : > { %1515 = vrot.lane.b32.xlu0 %v2664_v10, %s2075_s5  ;;  %1513 = vrot.lane.b32.xlu1 %v2661_v7, %s2075_s5  ;;  %s256_s5 = ssub.f32 %s1799_s17, %s3015_s24 }
 0x1aa   : > { %1459 = vrot.lane.b32.xlu0 %v2648_v58, %s2077_s6  ;;  %1457 = vrot.lane.b32.xlu1 %v2645_v55, %s2077_s6 }
 0x1ac   : > { %v724_v46 = vpop.permute.xlu1 %723 }
 0x1ad   : > { %v728_v47 = vsel %vm270_vm0, %v724_v46, 0.0 }
 0x1ae   : > { %1525 = vrot.lane.b32.xlu0 %v2664_v10, %s2076_s20  ;;  %1523 = vrot.lane.b32.xlu1 %v2661_v7, %s2076_s20  ;;  %v722_v1 = vpop.permute.xlu0 %721  ;;  %v730_v18 = vmax.f32 %v2467_v5, %v728_v47  ;;  %v402_v47 = vmax.f32 %v2709_v62, %v398_v54 }
 0x1af   : > { %v727_v37 = vsel %vm270_vm0, %v722_v1, 0.0 }
 0x1b0   : > { %v732_v24 = vpop.permute.xlu1 %731  ;;  %v729_v4 = vmax.f32 %v2470_v17, %v727_v37 }
 0x1b1   : > { %v737_v63 = vsel %vm281_vm1, 0.0, %v732_v24 }
 0x1b2   : > { %1469 = vrot.lane.b32.xlu0 %v2648_v58, %s2078_s14  ;;  %1467 = vrot.lane.b32.xlu1 %v2645_v55, %s2078_s14  ;;  %v734_v30 = vpop.permute.xlu0 %733  ;;  %v739_v16 = vmax.f32 %v729_v4, %v737_v63  ;;  %v617_v63 = vmul.f32 %v2325_v52, %v2292_v20 }
 0x1b3   : > { %v738_v0 = vsel %vm281_vm1, 0.0, %v734_v30 }
 0x1b4   : > { %v740_v27 = vmax.f32 %v730_v18, %v738_v0  ;;  %v618_v0 = vmul.f32 %v2305_v29, %v2280_v13 }
 0x1b6   : > { %1535 = vrot.lane.b32.xlu0 %v2664_v10, %s2077_s6  ;;  %1533 = vrot.lane.b32.xlu1 %v2661_v7, %s2077_s6 }
 0x1ba   : > { %1545 = vrot.lane.b32.xlu0 %v2664_v10, %s2078_s14  ;;  %1543 = vrot.lane.b32.xlu1 %v2661_v7, %s2078_s14 }
 0x1c8   : > { %v2692_v35 = vpop.permute.xlu1 %1079  ;;  %v2694_v25 = vpop.permute.xlu0 %1081 }
 0x1cc   : > { %v742_v42 = vpop.permute.xlu1 %741  ;;  %v744_v43 = vpop.permute.xlu0 %743 }
 0x1cd   : > { %v747_v23 = vsel %vm378_vm4, %v742_v42, 0.0  ;;  %v748_v11 = vsel %vm378_vm4, %v744_v43, 0.0  ;;  %v607_v42 = vadd.f32 %v2280_v13, %v2292_v20  ;;  %v404_v43 = vrot.slane %v2709_v62, 7 }
 0x1ce   : > { %v749_v46 = vmax.f32 %v739_v16, %v747_v23  ;;  %v750_v1 = vmax.f32 %v740_v27, %v748_v11  ;;  %v413_v11 = vrot.slane %v2709_v62, 2  ;;  %v871_v16 = vadd.f32 %v2581_v40, %v2566_v51 }
 0x1cf   : > { %v597_v27 = vadd.f32 %v2325_v52, %v2305_v29  ;;  %v406_v13 = vsel %vm297_vm3, %v404_v43, %v405_v45  ;;  %v955_v29 = vadd.f32 %v2359_v2, %v2344_v60  ;;  %v619_v52 = vadd.f32 %v618_v0, %v617_v63 }
 0x1d0   : > { %v2714_v34 = vpop.permute.xlu1 %1089  ;;  %v2716_v15 = vpop.permute.xlu0 %1091  ;;  %v415_v54 = vsel %vm412_vm6, %v413_v11, %v414_v28 }
 0x1d4   : > { %v752_v24 = vpop.permute.xlu1 %751  ;;  %v754_v30 = vpop.permute.xlu0 %753 }
 0x1d5   : > { %v757_v31 = vsel %vm389_vm5, 0.0, %v752_v24  ;;  %v758_v14 = vsel %vm389_vm5, 0.0, %v754_v30  ;;  %v411_v24 = vmax.f32 %v403_v50, %v406_v13 }
 0x1d6   : > { %v2724_v36 = vmax.f32 %v749_v46, %v757_v31  ;;  %v2726_v56 = vmax.f32 %v750_v1, %v758_v14  ;;  %v409_v46 = vsel %vm297_vm3, 0.0, %v404_v43  ;;  %v423_v43 = vrot.slane %v2711_v6, 6 }
 0x1d7   : > { %v410_v1 = vmax.f32 %v402_v47, %v409_v46 }
 0x1d8   : > { %v763_v22 = vrot.slane %v2724_v36, 1  ;;  %v764_v38 = vrot.slane %v2726_v56, 1  ;;  %v2732_v39 = vpop.permute.xlu1 %1099  ;;  %v2734_v37 = vpop.permute.xlu0 %1101  ;;  %v771_v20 = vrot.slane %v2724_v36, 7  ;;  %v772_v21 = vrot.slane %v2726_v56, 7 }
 0x1d9   : > { %517 = vadd.xlane.f32.xlu0 %v516_v33  ;;  %v779_v45 = vrot.slane %v2724_v36, 2  ;;  %v419_v50 = vmax.f32 %v410_v1, %v415_v54  ;;  %v787_v28 = vrot.slane %v2724_v36, 6 }
 0x1da   : > { %v765_v18 = vsel %vm288_vm2, %v763_v22, %v764_v38  ;;  %v768_v23 = vsel %vm288_vm2, %v764_v38, 0.0  ;;  %v975_v22 = vmul.f32 %v2344_v60, %v2337_v57  ;;  %v976_v38 = vmul.f32 %v2359_v2, %v2347_v61 }
 0x1db   : > { %v769_v30 = vmax.f32 %v2724_v36, %v765_v18  ;;  %v770_v31 = vmax.f32 %v2726_v56, %v768_v23  ;;  %v776_v47 = vsel %vm297_vm3, 0.0, %v771_v20  ;;  %v780_v60 = vrot.slane %v2726_v56, 2 }
 0x1dc   : > { %v2746_v53 = vpop.permute.xlu1 %1109  ;;  %v2748_v4 = vpop.permute.xlu0 %434  ;;  %v420_v2 = vmax.f32 %v411_v24, %v418_v41 }
 0x1dd   : > { %608 = vadd.xlane.f32.xlu0 %v607_v42  ;;  %v422_v42 = vrot.slane %v2709_v62, 6  ;;  %v777_v63 = vmax.f32 %v769_v30, %v776_v47  ;;  %v977_v62 = vadd.f32 %v976_v38, %v975_v22 }
 0x1de   : > { %507 = vadd.xlane.f32.xlu1 %v506_v44  ;;  %v773_v44 = vsel %vm297_vm3, %v771_v20, %v772_v21  ;;  %v788_v20 = vrot.slane %v2726_v56, 6  ;;  %v792_v56 = vsel %vm421_vm7, 0.0, %v787_v28 }
 0x1df   : > { %v778_v0 = vmax.f32 %v770_v31, %v773_v44  ;;  %v424_v6 = vsel %vm421_vm7, %v422_v42, %v423_v43  ;;  %v427_v11 = vsel %vm421_vm7, 0.0, %v422_v42  ;;  %v881_v31 = vadd.f32 %v2467_v5, %v2470_v17 }
 0x1e0   : > { %v433_v14 = vpop.permute.xlu1 %432  ;;  %v445_v33 = vpop.permute.xlu0 %444  ;;  %v428_v21 = vmax.f32 %v419_v50, %v427_v11  ;;  %v429_v13 = vmax.f32 %v420_v2, %v424_v6  ;;  %v789_v36 = vsel %vm421_vm7, %v787_v28, %v788_v20 }
 0x1e1   : > { %872 = vadd.xlane.f32.xlu0 %v871_v16  ;;  %v781_v16 = vsel %vm412_vm6, %v779_v45, %v780_v60  ;;  %v439_v45 = vsel %vm270_vm0, %v2748_v4, 0.0  ;;  %v449_v44 = vsel %vm281_vm1, 0.0, %v445_v33  ;;  %v1229_v4 = vadd.f32 %v2589_v3, %v2596_v32 }
 0x1e2   : > { %598 = vadd.xlane.f32.xlu1 %v597_v27  ;;  %v784_v27 = vsel %vm412_vm6, %v780_v60, 0.0  ;;  %v785_v46 = vmax.f32 %v777_v63, %v781_v16  ;;  %v526_v22 = vmul.f32 %v428_v21, %v2557_v59  ;;  %v527_v38 = vmul.f32 %v429_v13, %v2546_v19 }
 0x1e3   : > { %v786_v1 = vmax.f32 %v778_v0, %v784_v27  ;;  %v1085_v60 = vsel %vm270_vm0, %v2692_v35, 0.0  ;;  %v441_v50 = vmax.f32 %v2546_v19, %v439_v45  ;;  %v438_v0 = vsel %vm270_vm0, %v433_v14, 0.0 }
 0x1e4   : > { %v443_v18 = vpop.permute.xlu1 %442  ;;  %v2782_v23 = vpop.permute.xlu0 %797  ;;  %v793_v54 = vmax.f32 %v785_v46, %v792_v56  ;;  %v1313_v35 = vadd.f32 %v2395_v12, %v2382_v9  ;;  %v1087_v19 = vmax.f32 %v2498_v26, %v1085_v60  ;;  %v1086_v27 = vsel %vm270_vm0, %v2694_v25, 0.0 }
 0x1e5   : > { %956 = vadd.xlane.f32.xlu0 %v955_v29  ;;  %v1239_v29 = vadd.f32 %v2501_v8, %v2498_v26  ;;  %v794_v41 = vmax.f32 %v786_v1, %v789_v36  ;;  %v451_v6 = vmax.f32 %v441_v50, %v449_v44  ;;  %v448_v11 = vsel %vm281_vm1, 0.0, %v443_v18 }
 0x1e6   : > { %620 = vadd.xlane.f32.xlu1 %v619_v52  ;;  %v965_v52 = vadd.f32 %v2347_v61, %v2337_v57  ;;  %v528_v57 = vadd.f32 %v527_v38, %v526_v22  ;;  %v891_v61 = vmul.f32 %v793_v54, %v2566_v51  ;;  %v1105_v14 = vsel %vm378_vm4, %v2732_v39, 0.0 }
 0x1e7   : > { %v892_v47 = vmul.f32 %v794_v41, %v2581_v40  ;;  %v440_v28 = vmax.f32 %v2557_v59, %v438_v0  ;;  %v1096_v46 = vsel %vm281_vm1, 0.0, %v2716_v15  ;;  %v1115_v25 = vsel %vm389_vm5, 0.0, %v2746_v53 }
 0x1e8   : > { %v453_v24 = vpop.permute.xlu1 %452  ;;  %v455_v30 = vpop.permute.xlu0 %454 }
 0x1e9   : > { %978 = vadd.xlane.f32.xlu0 %v977_v62  ;;  %v459_v33 = vsel %vm378_vm4, %v455_v30, 0.0  ;;  %v1095_v62 = vsel %vm281_vm1, 0.0, %v2714_v34  ;;  %v893_v16 = vadd.f32 %v892_v47, %v891_v61  ;;  %v458_v1 = vsel %vm378_vm4, %v453_v24, 0.0 }
 0x1ea   : > { %882 = vadd.xlane.f32.xlu1 %v881_v31  ;;  %v461_v20 = vmax.f32 %v451_v6, %v459_v33  ;;  %v1097_v13 = vmax.f32 %v1087_v19, %v1095_v62  ;;  %v450_v30 = vmax.f32 %v440_v28, %v448_v11  ;;  %v1088_v31 = vmax.f32 %v2501_v8, %v1086_v27 }
 0x1ec   : > { %v800_v42 = vpop.permute.xlu1 %799  ;;  %v810_v43 = vpop.permute.xlu0 %809  ;;  %v460_v15 = vmax.f32 %v450_v30, %v458_v1  ;;  %v2839_v22 = vmax.f32 %v1088_v31, %v1096_v46 }
 0x1ed   : > { %1240 = vadd.xlane.f32.xlu0 %v1239_v29  ;;  %v804_v39 = vsel %vm270_vm0, %v800_v42, 0.0  ;;  %v1107_v29 = vmax.f32 %v1097_v13, %v1105_v14  ;;  %v814_v44 = vsel %vm281_vm1, 0.0, %v810_v43 }
 0x1ee   : > { %966 = vadd.xlane.f32.xlu1 %v965_v52  ;;  %v2837_v52 = vsel %vm378_vm4, %v2734_v37, 0.0  ;;  %v806_v53 = vmax.f32 %v2581_v40, %v804_v39  ;;  %v803_v37 = vsel %vm270_vm0, %v2782_v23, 0.0 }
 0x1ef   : > { %v2841_v38 = vmax.f32 %v1107_v29, %v1115_v25  ;;  %v1108_v45 = vmax.f32 %v2839_v22, %v2837_v52  ;;  %v805_v43 = vmax.f32 %v2566_v51, %v803_v37 }
 0x1f0   : > { %v808_v2 = vpop.permute.xlu1 %807  ;;  %v2808_v63 = vpop.permute.xlu0 %1157  ;;  %v816_v0 = vmax.f32 %v806_v53, %v814_v44 }
 0x1f1   : > { %529 = vadd.xlane.f32.xlu0 %v528_v57  ;;  %v1129_v40 = vrot.slane %v2841_v38, 7  ;;  %v813_v11 = vsel %vm281_vm1, 0.0, %v808_v2  ;;  %v1121_v29 = vrot.slane %v2841_v38, 1  ;;  %v1137_v37 = vrot.slane %v2841_v38, 2 }
 0x1f2   : > { %1230 = vadd.xlane.f32.xlu1 %v1229_v4  ;;  %v815_v39 = vmax.f32 %v805_v43, %v813_v11 }
 0x1f4   : > { %v2825_v34 = vpop.permute.xlu1 %1155  ;;  %v465_v21 = vpop.permute.xlu0 %464 }
 0x1f5   : > { %v469_v18 = vsel %vm389_vm5, 0.0, %v465_v21  ;;  %894 = vadd.xlane.f32.xlu0 %v893_v16 }
 0x1f6   : > { %v471_v59 = vmax.f32 %v461_v20, %v469_v18  ;;  %1314 = vadd.xlane.f32.xlu1 %v1313_v35 }
 0x1f8   : > { %v475_v24 = vrot.slane %v471_v59, 1  ;;  %v463_v36 = vpop.permute.xlu1 %462  ;;  %v820_v56 = vpop.permute.xlu0 %819  ;;  %v483_v57 = vrot.slane %v471_v59, 7  ;;  %v491_v4 = vrot.slane %v471_v59, 2  ;;  %v499_v46 = vrot.slane %v471_v59, 6 }
 0x1f9   : > { %v468_v54 = vsel %vm389_vm5, 0.0, %v463_v36  ;;  %v824_v33 = vsel %vm378_vm4, %v820_v56, 0.0  ;;  %v1161_v36 = vsel %vm270_vm0, %v2825_v34, 0.0  ;;  %v1134_v34 = vsel %vm297_vm3, 0.0, %v1129_v40 }
 0x1fa   : > { %v470_v41 = vmax.f32 %v460_v15, %v468_v54  ;;  %v479_v42 = vsel %vm288_vm2, %v475_v24, 0.0  ;;  %v826_v14 = vmax.f32 %v816_v0, %v824_v33  ;;  %v495_v13 = vsel %vm412_vm6, %v491_v4, 0.0 }
 0x1fb   : > { %v481_v62 = vmax.f32 %v471_v59, %v479_v42  ;;  %v1162_v15 = vsel %vm270_vm0, %v2808_v63, 0.0 }
 0x1fc   : > { %v474_v61 = vrot.slane %v470_v41, 1  ;;  %v482_v47 = vrot.slane %v470_v41, 7  ;;  %v818_v60 = vpop.permute.xlu1 %817  ;;  %v1168_v50 = vpop.permute.xlu0 %1167  ;;  %v490_v6 = vrot.slane %v470_v41, 2  ;;  %v498_v23 = vrot.slane %v470_v41, 6 }
 0x1fd   : > { %v823_v1 = vsel %vm378_vm4, %v818_v60, 0.0  ;;  %v1164_v63 = vmax.f32 %v2589_v3, %v1162_v15 }
 0x1fe   : > { %v476_v35 = vsel %vm288_vm2, %v474_v61, %v475_v24  ;;  %v484_v19 = vsel %vm297_vm3, %v482_v47, %v483_v57  ;;  %v487_v21 = vsel %vm297_vm3, 0.0, %v482_v47  ;;  %v492_v2 = vsel %vm412_vm6, %v490_v6, %v491_v4 }
 0x1ff   : > { %v480_v16 = vmax.f32 %v470_v41, %v476_v35  ;;  %v489_v27 = vmax.f32 %v481_v62, %v484_v19  ;;  %v500_v31 = vsel %vm421_vm7, %v498_v23, %v499_v46  ;;  %v825_v56 = vmax.f32 %v815_v39, %v823_v1 }
 0x200   : > { %v1166_v28 = vpop.permute.xlu1 %1165  ;;  %v830_v20 = vpop.permute.xlu0 %829  ;;  %v503_v42 = vsel %vm421_vm7, 0.0, %v498_v23  ;;  %v1145_v61 = vrot.slane %v2841_v38, 6  ;;  %v1172_v47 = vsel %vm281_vm1, 0.0, %v1168_v50  ;;  %v1163_v4 = vmax.f32 %v2596_v32, %v1161_v36 }
 0x201   : > { %v834_v18 = vsel %vm389_vm5, 0.0, %v830_v20  ;;  %v488_v25 = vmax.f32 %v480_v16, %v487_v21  ;;  %v497_v30 = vmax.f32 %v489_v27, %v495_v13  ;;  %v1171_v0 = vsel %vm281_vm1, 0.0, %v1166_v28 }
 0x202   : > { %v2861_v51 = vmax.f32 %v826_v14, %v834_v18  ;;  %v1174_v11 = vmax.f32 %v1164_v63, %v1172_v47  ;;  %v1173_v28 = vmax.f32 %v1163_v4, %v1171_v0  ;;  %v1150_v4 = vsel %vm421_vm7, 0.0, %v1145_v61 }
 0x203   : > { %v496_v24 = vmax.f32 %v488_v25, %v492_v2  ;;  %v505_v59 = vmax.f32 %v497_v30, %v500_v31 }
 0x204   : > { %v840_v53 = vrot.slane %v2861_v51, 1  ;;  %v828_v54 = vpop.permute.xlu1 %827  ;;  %v1178_v41 = vpop.permute.xlu0 %1177 }
 0x205   : > { %v833_v44 = vsel %vm389_vm5, 0.0, %v828_v54  ;;  %v504_v57 = vmax.f32 %v496_v24, %v503_v42  ;;  %v539_v62 = vmul.f32 %v505_v59, %v2424_v49  ;;  %v1182_v50 = vsel %vm378_vm4, %v1178_v41, 0.0 }
 0x206   : > { %v2877_v60 = vmax.f32 %v825_v56, %v833_v44  ;;  %v844_v43 = vsel %vm288_vm2, %v840_v53, 0.0  ;;  %v1184_v13 = vmax.f32 %v1174_v11, %v1182_v50  ;;  %v856_v42 = vrot.slane %v2861_v51, 2 }
 0x207   : > { %v538_v33 = vmul.f32 %v504_v57, %v2421_v48  ;;  %v848_v48 = vrot.slane %v2861_v51, 7  ;;  %v846_v1 = vmax.f32 %v2861_v51, %v844_v43 }
 0x208   : > { %v839_v6 = vrot.slane %v2877_v60, 1  ;;  %v847_v35 = vrot.slane %v2877_v60, 7  ;;  %v1176_v19 = vpop.permute.xlu1 %1175  ;;  %v1112_v23 = vpop.permute.xlu0 %1111  ;;  %v855_v21 = vrot.slane %v2877_v60, 2 }
 0x209   : > { %v1181_v16 = vsel %vm378_vm4, %v1176_v19, 0.0  ;;  %v1116_v27 = vsel %vm389_vm5, 0.0, %v1112_v23  ;;  %v540_v14 = vadd.f32 %v539_v62, %v538_v33  ;;  %v864_v23 = vrot.slane %v2861_v51, 6 }
 0x20a   : > { %v1118_v49 = vmax.f32 %v1108_v45, %v1116_v27  ;;  %v841_v20 = vsel %vm288_vm2, %v839_v6, %v840_v53  ;;  %v1183_v18 = vmax.f32 %v1173_v28, %v1181_v16  ;;  %v849_v2 = vsel %vm297_vm3, %v847_v35, %v848_v48 }
 0x20b   : > { %541 = vadd.xlane.f32.xlu0 %v540_v14  ;;  %v845_v46 = vmax.f32 %v2877_v60, %v841_v20  ;;  %v852_v31 = vsel %vm297_vm3, 0.0, %v847_v35  ;;  %v854_v0 = vmax.f32 %v846_v1, %v849_v2  ;;  %v863_v6 = vrot.slane %v2877_v60, 6 }
 0x20c   : > { %v1122_v25 = vrot.slane %v1118_v49, 1  ;;  %v1186_v30 = vpop.permute.xlu1 %1185  ;;  %v1188_v39 = vpop.permute.xlu0 %1187  ;;  %v1130_v52 = vrot.slane %v1118_v49, 7  ;;  %v1138_v15 = vrot.slane %v1118_v49, 2  ;;  %v1146_v62 = vrot.slane %v1118_v49, 6 }
 0x20d   : > { %v1191_v22 = vsel %vm389_vm5, 0.0, %v1186_v30  ;;  %v1192_v45 = vsel %vm389_vm5, 0.0, %v1188_v39  ;;  %v853_v41 = vmax.f32 %v845_v46, %v852_v31  ;;  %v857_v19 = vsel %vm412_vm6, %v855_v21, %v856_v42  ;;  %v1943_v31 = vld [vmem:[%s2262_s29 + $0x30] sm:$0xff] }
 0x20e   : > { %v2904_v24 = vmax.f32 %v1183_v18, %v1191_v22  ;;  %v2906_v59 = vmax.f32 %v1184_v13, %v1192_v45  ;;  %v1123_v36 = vsel %vm288_vm2, %v1121_v29, %v1122_v25  ;;  %v1126_v56 = vsel %vm288_vm2, %v1122_v25, 0.0 }
 0x20f   : > { %v1127_v53 = vmax.f32 %v2841_v38, %v1123_v36  ;;  %v1128_v54 = vmax.f32 %v1118_v49, %v1126_v56  ;;  %v1131_v29 = vsel %vm297_vm3, %v1129_v40, %v1130_v52  ;;  %v1139_v50 = vsel %vm412_vm6, %v1137_v37, %v1138_v15 }
 0x210   : > { %v1197_v44 = vrot.slane %v2904_v24, 1  ;;  %v1198_v57 = vrot.slane %v2906_v59, 1  ;;  %v1438_v63 = vpop.permute.xlu1 %1437  ;;  %v1440_v47 = vpop.permute.xlu0 %1439  ;;  %v1142_v43 = vsel %vm412_vm6, %v1138_v15, 0.0  ;;  %v860_v16 = vsel %vm412_vm6, %v856_v42, 0.0  ;;  %v1944_v15 = vld [vmem:[%s2262_s29 + $0x38] sm:$0xff] }
 0x211   : > { %v1135_v33 = vmax.f32 %v1127_v53, %v1134_v34  ;;  %v1136_v35 = vmax.f32 %v1128_v54, %v1131_v29  ;;  %v861_v27 = vmax.f32 %v853_v41, %v857_v19  ;;  %v1205_v14 = vrot.slane %v2904_v24, 7 }
 0x212   : > { %v862_v48 = vmax.f32 %v854_v0, %v860_v16  ;;  %v1199_v60 = vsel %vm288_vm2, %v1197_v44, %v1198_v57  ;;  %v1206_v37 = vrot.slane %v2906_v59, 7  ;;  %v1147_v51 = vsel %vm421_vm7, %v1145_v61, %v1146_v62 }
 0x213   : > { %v1143_v11 = vmax.f32 %v1135_v33, %v1139_v50  ;;  %v1144_v28 = vmax.f32 %v1136_v35, %v1142_v43  ;;  %v868_v20 = vsel %vm421_vm7, 0.0, %v863_v6  ;;  %v865_v1 = vsel %vm421_vm7, %v863_v6, %v864_v23 }
 0x214   : > { %v1448_v40 = vpop.permute.xlu1 %1447  ;;  %v1450_v34 = vpop.permute.xlu0 %1449  ;;  %v869_v13 = vmax.f32 %v861_v27, %v868_v20  ;;  %v1202_v18 = vsel %vm288_vm2, %v1198_v57, 0.0  ;;  %v1203_v25 = vmax.f32 %v2904_v24, %v1199_v60  ;;  %v870_v2 = vmax.f32 %v862_v48, %v865_v1 }
 0x215   : > { %v1151_v49 = vmax.f32 %v1143_v11, %v1150_v4  ;;  %v1152_v21 = vmax.f32 %v1144_v28, %v1147_v51  ;;  %v1204_v61 = vmax.f32 %v2906_v59, %v1202_v18  ;;  %v1333_v52 = vmul.f32 %v1943_v31, %v2382_v9 }
 0x216   : > { %v1213_v22 = vrot.slane %v2904_v24, 2  ;;  %v1210_v45 = vsel %vm297_vm3, 0.0, %v1205_v14  ;;  %v1334_v36 = vmul.f32 %v1944_v15, %v2395_v12  ;;  %v903_v53 = vmul.f32 %v869_v13, %v2470_v17 }
 0x217   : > { %v1249_v46 = vmul.f32 %v1151_v49, %v2596_v32  ;;  %v1250_v38 = vmul.f32 %v1152_v21, %v2589_v3  ;;  %v1207_v32 = vsel %vm297_vm3, %v1205_v14, %v1206_v37  ;;  %v1211_v54 = vmax.f32 %v1203_v25, %v1210_v45 }
 0x218   : > { %v1514_v30 = vpop.permute.xlu1 %1513  ;;  %v1516_v39 = vpop.permute.xlu0 %1515  ;;  %v1212_v3 = vmax.f32 %v1204_v61, %v1207_v32  ;;  %v1214_v41 = vrot.slane %v2906_v59, 2  ;;  %v1221_v42 = vrot.slane %v2904_v24, 6  ;;  %v1222_v9 = vrot.slane %v2906_v59, 6 }
 0x219   : > { %v1251_v56 = vadd.f32 %v1250_v38, %v1249_v46  ;;  %v904_v4 = vmul.f32 %v870_v2, %v2467_v5  ;;  %v1443_v0 = vsel %vm270_vm0, %v1438_v63, 0.0  ;;  %v1444_v12 = vsel %vm270_vm0, %v1440_v47, 0.0 }
 0x21a   : > { %v1215_v29 = vsel %vm412_vm6, %v1213_v22, %v1214_v41  ;;  %v1218_v17 = vsel %vm412_vm6, %v1214_v41, 0.0  ;;  %v1335_v35 = vadd.f32 %v1334_v36, %v1333_v52  ;;  %v1453_v24 = vsel %vm281_vm1, 0.0, %v1448_v40 }
 0x21b   : > { %1252 = vadd.xlane.f32.xlu1 %v1251_v56  ;;  %v905_v33 = vadd.f32 %v904_v4, %v903_v53  ;;  %v1219_v62 = vmax.f32 %v1211_v54, %v1215_v29  ;;  %v1220_v6 = vmax.f32 %v1212_v3, %v1218_v17  ;;  %v1454_v59 = vsel %vm281_vm1, 0.0, %v1450_v34 }
 0x21c   : > { %v1458_v44 = vpop.permute.xlu1 %1457  ;;  %v1460_v57 = vpop.permute.xlu0 %1459  ;;  %v1223_v50 = vsel %vm421_vm7, %v1221_v42, %v1222_v9  ;;  %v1226_v5 = vsel %vm421_vm7, 0.0, %v1221_v42  ;;  %v1445_v63 = vmax.f32 %v2645_v55, %v1443_v0  ;;  %v1446_v47 = vmax.f32 %v2648_v58, %v1444_v12 }
 0x21d   : > { %v1227_v19 = vmax.f32 %v1219_v62, %v1226_v5  ;;  %v1228_v23 = vmax.f32 %v1220_v6, %v1223_v50  ;;  %v1463_v16 = vsel %vm378_vm4, %v1458_v44, 0.0  ;;  %v1464_v27 = vsel %vm378_vm4, %v1460_v57, 0.0 }
 0x21e   : > { %v1455_v14 = vmax.f32 %v1445_v63, %v1453_v24  ;;  %v1456_v40 = vmax.f32 %v1446_v47, %v1454_v59  ;;  %v1519_v48 = vsel %vm270_vm0, %v1514_v30, 0.0  ;;  %v1597_v60 = vadd.f32 %v2648_v58, %v2645_v55 }
 0x21f   : > { %906 = vadd.xlane.f32.xlu1 %v905_v33  ;;  %v1261_v34 = vmul.f32 %v1227_v19, %v2498_v26  ;;  %v1262_v28 = vmul.f32 %v1228_v23, %v2501_v8  ;;  %v1520_v37 = vsel %vm270_vm0, %v1516_v39, 0.0  ;;  %v1323_v1 = vadd.f32 %v1944_v15, %v1943_v31 }
 0x220   : > { %v1524_v43 = vpop.permute.xlu1 %1523  ;;  %v1526_v11 = vpop.permute.xlu0 %1525  ;;  %v1465_v51 = vmax.f32 %v1455_v14, %v1463_v16  ;;  %v1466_v49 = vmax.f32 %v1456_v40, %v1464_v27  ;;  %v1521_v18 = vmax.f32 %v2661_v7, %v1519_v48  ;;  %v1522_v38 = vmax.f32 %v2664_v10, %v1520_v37 }
 0x221   : > { %v1263_v20 = vadd.f32 %v1262_v28, %v1261_v34  ;;  %v1529_v46 = vsel %vm281_vm1, 0.0, %v1524_v43  ;;  %v1530_v25 = vsel %vm281_vm1, 0.0, %v1526_v11  ;;  %v1587_v2 = vadd.f32 %v2664_v10, %v2661_v7 }
 0x222   : > { %v1531_v61 = vmax.f32 %v1521_v18, %v1529_v46  ;;  %v1532_v15 = vmax.f32 %v1522_v38, %v1530_v25 }
 0x223   : > { %1336 = vadd.xlane.f32.xlu1 %v1335_v35  ;;  %1264 = vadd.xlane.f32.xlu0 %v1263_v20 }
 0x224   : > { %v1468_v21 = vpop.permute.xlu1 %1467  ;;  %v1470_v13 = vpop.permute.xlu0 %1469 }
 0x225   : > { %v1473_v26 = vsel %vm389_vm5, 0.0, %v1468_v21  ;;  %v1474_v8 = vsel %vm389_vm5, 0.0, %v1470_v13 }
 0x226   : > { %v1475_v30 = vmax.f32 %v1465_v51, %v1473_v26  ;;  %v1476_v39 = vmax.f32 %v1466_v49, %v1474_v8 }
 0x227   : > { %1598 = vadd.xlane.f32.xlu1 %v1597_v60  ;;  %1324 = vadd.xlane.f32.xlu0 %v1323_v1 }
 0x228   : > { %v1479_v52 = vrot.slane %v1475_v30, 1  ;;  %v1487_v22 = vrot.slane %v1475_v30, 7  ;;  %v1480_v31 = vrot.slane %v1476_v39, 1  ;;  %v1534_v32 = vpop.permute.xlu1 %1533  ;;  %v1536_v45 = vpop.permute.xlu0 %1535  ;;  %v1488_v36 = vrot.slane %v1476_v39, 7 }
 0x229   : > { %v1539_v56 = vsel %vm378_vm4, %v1534_v32, 0.0  ;;  %v1540_v53 = vsel %vm378_vm4, %v1536_v45, 0.0  ;;  %v1495_v54 = vrot.slane %v1475_v30, 2  ;;  %v1496_v42 = vrot.slane %v1476_v39, 2 }
 0x22a   : > { %v1481_v3 = vsel %vm288_vm2, %v1479_v52, %v1480_v31  ;;  %v1484_v41 = vsel %vm288_vm2, %v1480_v31, 0.0  ;;  %v1541_v9 = vmax.f32 %v1531_v61, %v1539_v56  ;;  %v1542_v44 = vmax.f32 %v1532_v15, %v1540_v53 }
 0x22b   : > { %v1485_v57 = vmax.f32 %v1475_v30, %v1481_v3  ;;  %v1486_v4 = vmax.f32 %v1476_v39, %v1484_v41  ;;  %v1489_v29 = vsel %vm297_vm3, %v1487_v22, %v1488_v36  ;;  %v1492_v17 = vsel %vm297_vm3, 0.0, %v1487_v22  ;;  %1588 = vadd.xlane.f32.xlu0 %v1587_v2 }
 0x22c   : > { %v1544_v0 = vpop.permute.xlu1 %1543  ;;  %v1546_v12 = vpop.permute.xlu0 %1545  ;;  %v1503_v33 = vrot.slane %v1475_v30, 6  ;;  %v1504_v62 = vrot.slane %v1476_v39, 6  ;;  %v1497_v63 = vsel %vm412_vm6, %v1495_v54, %v1496_v42  ;;  %v1500_v47 = vsel %vm412_vm6, %v1496_v42, 0.0 }
 0x22d   : > { %v1549_v6 = vsel %vm389_vm5, 0.0, %v1544_v0  ;;  %v1550_v35 = vsel %vm389_vm5, 0.0, %v1546_v12  ;;  %v1493_v24 = vmax.f32 %v1485_v57, %v1492_v17  ;;  %v1494_v59 = vmax.f32 %v1486_v4, %v1489_v29 }
 0x22e   : > { %v1551_v50 = vmax.f32 %v1541_v9, %v1549_v6  ;;  %v1552_v5 = vmax.f32 %v1542_v44, %v1550_v35  ;;  %v1505_v43 = vsel %vm421_vm7, %v1503_v33, %v1504_v62  ;;  %v1508_v14 = vsel %vm421_vm7, 0.0, %v1503_v33 }
 0x22f   : > { %v1501_v19 = vmax.f32 %v1493_v24, %v1497_v63  ;;  %v1502_v23 = vmax.f32 %v1494_v59, %v1500_v47 }
 0x230   : > { %v1555_v11 = vrot.slane %v1551_v50, 1  ;;  %v1563_v16 = vrot.slane %v1551_v50, 7  ;;  %v1556_v27 = vrot.slane %v1552_v5, 1  ;;  %v1564_v40 = vrot.slane %v1552_v5, 7 }
 0x231   : > { %v1509_v34 = vmax.f32 %v1501_v19, %v1508_v14  ;;  %v1510_v28 = vmax.f32 %v1502_v23, %v1505_v43  ;;  %v1571_v48 = vrot.slane %v1551_v50, 2  ;;  %v1572_v51 = vrot.slane %v1552_v5, 2 }
 0x232   : > { %v1557_v60 = vsel %vm288_vm2, %v1555_v11, %v1556_v27  ;;  %v1560_v37 = vsel %vm288_vm2, %v1556_v27, 0.0  ;;  %v1565_v46 = vsel %vm297_vm3, %v1563_v16, %v1564_v40  ;;  %v1568_v1 = vsel %vm297_vm3, 0.0, %v1563_v16 }
 0x233   : > { %v1607_v49 = vmul.f32 %v1509_v34, %v2661_v7  ;;  %v1608_v20 = vmul.f32 %v1510_v28, %v2664_v10  ;;  %v1561_v21 = vmax.f32 %v1551_v50, %v1557_v60  ;;  %v1562_v13 = vmax.f32 %v1552_v5, %v1560_v37 }
 0x234   : > { %v1579_v26 = vrot.slane %v1551_v50, 6  ;;  %v1580_v8 = vrot.slane %v1552_v5, 6  ;;  %v1573_v39 = vsel %vm412_vm6, %v1571_v48, %v1572_v51  ;;  %v1576_v38 = vsel %vm412_vm6, %v1572_v51, 0.0 }
 0x235   : > { %v1609_v18 = vadd.f32 %v1608_v20, %v1607_v49  ;;  %v1569_v25 = vmax.f32 %v1561_v21, %v1568_v1  ;;  %v1570_v30 = vmax.f32 %v1562_v13, %v1565_v46 }
 0x236   : > { %v1581_v10 = vsel %vm421_vm7, %v1579_v26, %v1580_v8  ;;  %v1584_v61 = vsel %vm421_vm7, 0.0, %v1579_v26 }
 0x237   : > { %1610 = vadd.xlane.f32.xlu0 %v1609_v18  ;;  %v1577_v2 = vmax.f32 %v1569_v25, %v1573_v39  ;;  %v1578_v7 = vmax.f32 %v1570_v30, %v1576_v38 }
 0x239   : > { %v1585_v52 = vmax.f32 %v1577_v2, %v1584_v61  ;;  %v1586_v22 = vmax.f32 %v1578_v7, %v1581_v10 }
 0x23b   : > { %v1619_v31 = vmul.f32 %v1585_v52, %v2645_v55  ;;  %v1620_v32 = vmul.f32 %v1586_v22, %v2648_v58 }
 0x23d   : > { %v1621_v45 = vadd.f32 %v1620_v32, %v1619_v31 }
 0x23f   : > { %1622 = vadd.xlane.f32.xlu1 %v1621_v45 }
 0x262   : > { %v518_v15 = vpop.xlane.xlu0 %517 }
 0x263   : > { %v519_v36 = vrot.slane %v518_v15, 4 }
 0x265   : > { %v520_v56 = vadd.f32 %v519_v36, %v518_v15 }
 0x266   : > { %v609_v53 = vpop.xlane.xlu0 %608 }
 0x267   : > { %v521_v54 = vrot.slane %v520_v56, 2  ;;  %v508_v3 = vpop.xlane.xlu1 %507  ;;  %v610_v43 = vrot.slane %v609_v53, 4 }
 0x268   : > { %v509_v41 = vrot.slane %v508_v3, 4 }
 0x269   : > { %v522_v44 = vadd.f32 %v521_v54, %v520_v56  ;;  %v611_v28 = vadd.f32 %v610_v43, %v609_v53 }
 0x26a   : > { %v510_v42 = vadd.f32 %v509_v41, %v508_v3  ;;  %v873_v9 = vpop.xlane.xlu0 %872 }
 0x26b   : > { %v523_v12 = vrot.slane %v522_v44, 1  ;;  %v599_v59 = vpop.xlane.xlu1 %598  ;;  %v874_v14 = vrot.slane %v873_v9, 4  ;;  %v612_v21 = vrot.slane %v611_v28, 2 }
 0x26c   : > { %v511_v57 = vrot.slane %v510_v42, 2  ;;  %v600_v19 = vrot.slane %v599_v59, 4 }
 0x26d   : > { %v524_v17 = vadd.f32 %v523_v12, %v522_v44  ;;  %v875_v37 = vadd.f32 %v874_v14, %v873_v9  ;;  %v613_v2 = vadd.f32 %v612_v21, %v611_v28 }
 0x26e   : > { %v3001_v4 = vpop.xlane.xlu0 %956  ;;  %v512_v0 = vadd.f32 %v511_v57, %v510_v42  ;;  %v601_v16 = vadd.f32 %v600_v19, %v599_v59 }
 0x26f   : > { %v621_v47 = vpop.xlane.xlu1 %620  ;;  %v876_v8 = vrot.slane %v875_v37, 2  ;;  %v614_v45 = vrot.slane %v613_v2, 1  ;;  %v958_v56 = vrot.slane %v3001_v4, 4 }
 0x270   : > { %v513_v55 = vrot.slane %v512_v0, 1  ;;  %v622_v23 = vrot.slane %v621_v47, 4  ;;  %v602_v60 = vrot.slane %v601_v16, 2 }
 0x271   : > { %v877_v52 = vadd.f32 %v876_v8, %v875_v37  ;;  %v615_v44 = vadd.f32 %v614_v45, %v613_v2 }
 0x272   : > { %v3003_v29 = vpop.xlane.xlu0 %978  ;;  %v514_v58 = vadd.f32 %v513_v55, %v512_v0  ;;  %v623_v40 = vadd.f32 %v622_v23, %v621_v47  ;;  %v603_v26 = vadd.f32 %v602_v60, %v601_v16  ;;  %v959_v0 = vadd.f32 %v958_v56, %v3001_v4 }
 0x273   : > { %v883_v11 = vpop.xlane.xlu1 %882  ;;  %v878_v3 = vrot.slane %v877_v52, 1  ;;  %v980_v12 = vrot.slane %v3003_v29, 4 }
 0x274   : > { %1804 = vpush %v514_v58  ;;  %v884_v34 = vrot.slane %v883_v11, 4  ;;  %v624_v51 = vrot.slane %v623_v40, 2  ;;  %v604_v7 = vrot.slane %v603_v26, 1 }
 0x275   : > { %1806 = vpush %v524_v17  ;;  %v879_v58 = vadd.f32 %v878_v3, %v877_v52 }
 0x276   : > { %v3005_v33 = vpop.xlane.xlu0 %1240  ;;  %v885_v49 = vadd.f32 %v884_v34, %v883_v11  ;;  %v625_v30 = vadd.f32 %v624_v51, %v623_v40  ;;  %v605_v36 = vadd.f32 %v604_v7, %v603_v26 }
 0x277   : > { %v967_v13 = vpop.xlane.xlu1 %966 }
 0x278   : > { %v886_v25 = vrot.slane %v885_v49, 2  ;;  %v626_v22 = vrot.slane %v625_v30, 1  ;;  %v968_v9 = vrot.slane %v967_v13, 4 }
 0x27a   : > { %v530_v62 = vpop.xlane.xlu0 %529  ;;  %v887_v31 = vadd.f32 %v886_v25, %v885_v49  ;;  %v627_v41 = vadd.f32 %v626_v22, %v625_v30 }
 0x27b   : > { %v531_v6 = vrot.slane %v530_v62, 4  ;;  %v1231_v10 = vpop.xlane.xlu1 %1230 }
 0x27c   : > { %v888_v42 = vrot.slane %v887_v31, 1  ;;  %v1232_v55 = vrot.slane %v1231_v10, 4 }
 0x27d   : > { %v532_v35 = vadd.f32 %v531_v6, %v530_v62  ;;  %v1242_v62 = vrot.slane %v3005_v33, 4  ;;  %v969_v6 = vadd.f32 %v968_v9, %v967_v13 }
 0x27e   : > { %v895_v27 = vpop.xlane.xlu0 %894  ;;  %v889_v17 = vadd.f32 %v888_v42, %v887_v31  ;;  %v1233_v4 = vadd.f32 %v1232_v55, %v1231_v10 }
 0x27f   : > { %v533_v24 = vrot.slane %v532_v35, 2  ;;  %v896_v48 = vrot.slane %v895_v27, 4  ;;  %v1315_v53 = vpop.xlane.xlu1 %1314  ;;  %v1243_v47 = vadd.f32 %v1242_v62, %v3005_v33  ;;  %v970_v19 = vrot.slane %v969_v6, 2 }
 0x280   : > { %v1234_v14 = vrot.slane %v1233_v4, 2 }
 0x281   : > { %v534_v50 = vadd.f32 %v533_v24, %v532_v35  ;;  %v897_v46 = vadd.f32 %v896_v48, %v895_v27  ;;  %v1316_v35 = vrot.slane %v1315_v53, 4  ;;  %v1244_v28 = vrot.slane %v1243_v47, 2 }
 0x282   : > { %v971_v51 = vadd.f32 %v970_v19, %v969_v6  ;;  %v1235_v33 = vadd.f32 %v1234_v14, %v1233_v4 }
 0x283   : > { %v535_v5 = vrot.slane %v534_v50, 1  ;;  %v898_v39 = vrot.slane %v897_v46, 2  ;;  %v1317_v23 = vadd.f32 %v1316_v35, %v1315_v53  ;;  %v1245_v25 = vadd.f32 %v1244_v28, %v1243_v47 }
 0x284   : > { %v1236_v31 = vrot.slane %v1235_v33, 1 }
 0x285   : > { %v536_v63 = vadd.f32 %v535_v5, %v534_v50  ;;  %v899_v15 = vadd.f32 %v898_v39, %v897_v46  ;;  %v960_v5 = vrot.slane %v959_v0, 2  ;;  %v1318_v48 = vrot.slane %v1317_v23, 2 }
 0x286   : > { %v1246_v53 = vrot.slane %v1245_v25, 1 }
 0x287   : > { %1808 = vpush %v536_v63  ;;  %v900_v57 = vrot.slane %v899_v15, 1  ;;  %v981_v63 = vadd.f32 %v980_v12, %v3003_v29  ;;  %v961_v40 = vadd.f32 %v960_v5, %v959_v0  ;;  %v1319_v39 = vadd.f32 %v1318_v48, %v1317_v23 }
 0x288   : > { %v1247_v62 = vadd.f32 %v1246_v53, %v1245_v25  ;;  %v555_v25 = vstv %s256_s5 }
 0x289   : > { %v901_v24 = vadd.f32 %v900_v57, %v899_v15  ;;  %v982_v27 = vrot.slane %v981_v63, 2  ;;  %v962_v21 = vrot.slane %v961_v40, 1 }
 0x28b   : > { %v983_v13 = vadd.f32 %v982_v27, %v981_v63  ;;  %v963_v52 = vadd.f32 %v962_v21, %v961_v40 }
 0x28d   : > { %v984_v22 = vrot.slane %v983_v13, 1 }
 0x28f   : > { %v985_v0 = vadd.f32 %v984_v22, %v983_v13 }
 0x294   : > { %v542_v20 = vpop.xlane.xlu0 %541 }
 0x295   : > { %v543_v1 = vrot.slane %v542_v20, 4 }
 0x297   : > { %v544_v18 = vadd.f32 %v543_v1, %v542_v20 }
 0x299   : > { %v545_v38 = vrot.slane %v544_v18, 2 }
 0x29b   : > { %v546_v61 = vadd.f32 %v545_v38, %v544_v18  ;;  %v972_v18 = vrot.slane %v971_v51, 1 }
 0x29d   : > { %v547_v32 = vrot.slane %v546_v61, 1  ;;  %v973_v56 = vadd.f32 %v972_v18, %v971_v51 }
 0x29f   : > { %v548_v54 = vadd.f32 %v547_v32, %v546_v61 }
 0x2a1   : > { %1810 = vpush %v548_v54  ;;  %v1320_v54 = vrot.slane %v1319_v39, 1 }
 0x2a2   : > { %1812 = vpush %v605_v36 }
 0x2a3   : > { %1814 = vpush %v615_v44  ;;  %v1321_v6 = vadd.f32 %v1320_v54, %v1319_v39 }
 0x2a4   : > { %1816 = vpush %v627_v41  ;;  %v1253_v59 = vpop.xlane.xlu1 %1252 }
 0x2a5   : > { %1818 = vpush %v879_v58  ;;  %v1254_v50 = vrot.slane %v1253_v59, 4  ;;  %v1237_v58 = vadd.f32 %v1236_v31, %v1235_v33  ;;  %s3017_s26 = spop %1804 }
 0x2a6   : > { %1820 = vpush %v889_v17  ;;  %s3019_s27 = spop %1806  ;;  %v563_v53 = vstv %s3017_s26 }
 0x2a7   : > { %1822 = vpush %v901_v24  ;;  %v1255_v43 = vadd.f32 %v1254_v50, %v1253_v59 }
 0x2a8   : > { %v907_v11 = vpop.xlane.xlu1 %906 }
 0x2a9   : > { %v908_v16 = vrot.slane %v907_v11, 4  ;;  %v1256_v60 = vrot.slane %v1255_v43, 2 }
 0x2ab   : > { %v909_v34 = vadd.f32 %v908_v16, %v907_v11  ;;  %v1257_v30 = vadd.f32 %v1256_v60, %v1255_v43 }
 0x2ac   : > { %v1337_v37 = vpop.xlane.xlu1 %1336  ;;  %v1265_v20 = vpop.xlane.xlu0 %1264 }
 0x2ad   : > { %v910_v49 = vrot.slane %v909_v34, 2  ;;  %v1338_v29 = vrot.slane %v1337_v37, 4  ;;  %v1266_v46 = vrot.slane %v1265_v20, 4  ;;  %v1258_v9 = vrot.slane %v1257_v30, 1 }
 0x2af   : > { %v1339_v1 = vadd.f32 %v1338_v29, %v1337_v37  ;;  %v911_v26 = vadd.f32 %v910_v49, %v909_v34  ;;  %v1267_v38 = vadd.f32 %v1266_v46, %v1265_v20  ;;  %v1259_v50 = vadd.f32 %v1258_v9, %v1257_v30 }
 0x2b0   : > { %v1599_v8 = vpop.xlane.xlu1 %1598  ;;  %v1325_v61 = vpop.xlane.xlu0 %1324 }
 0x2b1   : > { %v1340_v2 = vrot.slane %v1339_v1, 2  ;;  %v1600_v7 = vrot.slane %v1599_v8, 4  ;;  %v912_v10 = vrot.slane %v911_v26, 1  ;;  %v1268_v32 = vrot.slane %v1267_v38, 2 }
 0x2b2   : > { %v1326_v45 = vrot.slane %v1325_v61, 4 }
 0x2b3   : > { %v1601_v15 = vadd.f32 %v1600_v7, %v1599_v8  ;;  %v913_v36 = vadd.f32 %v912_v10, %v911_v26  ;;  %v1341_v3 = vadd.f32 %v1340_v2, %v1339_v1  ;;  %v1269_v44 = vadd.f32 %v1268_v32, %v1267_v38 }
 0x2b4   : > { %v1327_v41 = vadd.f32 %v1326_v45, %v1325_v61  ;;  %v1589_v57 = vpop.xlane.xlu0 %1588  ;;  %v206_v1 = vlaneseq  ;;  %v551_v2 = vstv %s3015_s24 }
 0x2b5   : > { %v1602_v42 = vrot.slane %v1601_v15, 2  ;;  %1824 = vpush %v913_v36  ;;  %v1590_v55 = vrot.slane %v1589_v57, 4  ;;  %v1270_v17 = vrot.slane %v1269_v44, 1  ;;  %v1342_v35 = vrot.slane %v1341_v3, 1 }
 0x2b6   : > { %1826 = vpush %v963_v52  ;;  %v1328_v12 = vrot.slane %v1327_v41, 2  ;;  %v3037_v26 = vshrl.u32 %v206_v1, 7 }
 0x2b7   : > { %1828 = vpush %v973_v56  ;;  %v1603_v24 = vadd.f32 %v1602_v42, %v1601_v15  ;;  %v1591_v59 = vadd.f32 %v1590_v55, %v1589_v57  ;;  %v1271_v5 = vadd.f32 %v1270_v17, %v1269_v44  ;;  %v1343_v19 = vadd.f32 %v1342_v35, %v1341_v3 }
 0x2b8   : > { %1830 = vpush %v985_v0  ;;  %v1329_v63 = vadd.f32 %v1328_v12, %v1327_v41  ;;  %s3021_s23 = spop %1808  ;;  %vm550_vm8 = vcmp.eq.s32.totalorder %v3037_v26, 0  ;;  %vm554_vm9 = vcmp.eq.s32.totalorder %v3037_v26, 1  ;;  %vm558_vm10 = vcmp.eq.s32.totalorder %v3037_v26, 2 }
 0x2b9   : > { %1832 = vpush %v1237_v58  ;;  %v1592_v4 = vrot.slane %v1591_v59, 2  ;;  %v1604_v23 = vrot.slane %v1603_v24, 1  ;;  %v556_v10 = vsel %vm554_vm9, %v555_v25, 0.0  ;;  %v552_v15 = vsel %vm550_vm8, %v551_v2, 0.0 }
 0x2ba   : > { %1834 = vpush %v1247_v62  ;;  %v1330_v47 = vrot.slane %v1329_v63, 1  ;;  %v557_v36 = vadd.f32 %v556_v10, %v552_v15  ;;  %vm562_vm11 = vcmp.eq.s32.totalorder %v3037_v26, 3  ;;  %vm566_vm12 = vcmp.eq.s32.totalorder %v3037_v26, 4 }
 0x2bb   : > { %1836 = vpush %v1259_v50  ;;  %v1593_v11 = vadd.f32 %v1592_v4, %v1591_v59  ;;  %v1605_v14 = vadd.f32 %v1604_v23, %v1603_v24  ;;  %v564_v55 = vsel %vm562_vm11, %v563_v53, 0.0  ;;  %vm570_vm13 = vcmp.eq.s32.totalorder %v3037_v26, 5 }
 0x2bc   : > { %1838 = vpush %v1271_v5  ;;  %v1331_v43 = vadd.f32 %v1330_v47, %v1329_v63  ;;  %v567_v47 = vstv %s3019_s27  ;;  %vm574_vm14 = vcmp.eq.s32.totalorder %v3037_v26, 6  ;;  %v209_v25 = vand.u32 127, %v206_v1 }
 0x2bd   : > { %1840 = vpush %v1321_v6  ;;  %v1594_v16 = vrot.slane %v1593_v11, 1 }
 0x2be   : > { %1842 = vpush %v1331_v43  ;;  %vm936_vm15 = vcmp.eq.s32.totalorder %v209_v25, 1  ;;  %vm578_vm0 = vcmp.eq.s32.totalorder %v209_v25, 0  ;;  %vm1294_vm1 = vcmp.eq.s32.totalorder %v209_v25, 2  ;;  %vm1652_vm2 = vcmp.eq.s32.totalorder %v209_v25, 3 }
 0x2bf   : > { %1844 = vpush %v1343_v19  ;;  %v1595_v34 = vadd.f32 %v1594_v16, %v1593_v11  ;;  %v571_v19 = vstv %s3021_s23  ;;  %s1777_s23 = sshll.u32 %s2251_s16, 3 }
 0x2c0   : > { %v1611_v27 = vpop.xlane.xlu0 %1610 }
 0x2c1   : > { %v1612_v40 = vrot.slane %v1611_v27, 4  ;;  %1846 = vpush %v1595_v34 }
 0x2c2   : > { %1848 = vpush %v1605_v14 }
 0x2c3   : > { %v1613_v28 = vadd.f32 %v1612_v40, %v1611_v27 }
 0x2c5   : > { %v1614_v48 = vrot.slane %v1613_v28, 2 }
 0x2c7   : > { %v1615_v60 = vadd.f32 %v1614_v48, %v1613_v28  ;;  %v568_v48 = vsel %vm566_vm12, %v567_v47, 0.0 }
 0x2c8   : > { %v1623_v37 = vpop.xlane.xlu1 %1622 }
 0x2c9   : > { %v1624_v51 = vrot.slane %v1623_v37, 4  ;;  %v1616_v49 = vrot.slane %v1615_v60, 1 }
 0x2cb   : > { %v1625_v29 = vadd.f32 %v1624_v51, %v1623_v37  ;;  %v1617_v20 = vadd.f32 %v1616_v49, %v1615_v60  ;;  %v572_v60 = vsel %vm570_vm13, %v571_v19, 0.0 }
 0x2cd   : > { %v1626_v21 = vrot.slane %v1625_v29, 2  ;;  %1850 = vpush %v1617_v20 }
 0x2cf   : > { %v1627_v13 = vadd.f32 %v1626_v21, %v1625_v29 }
 0x2d1   : > { %v1628_v33 = vrot.slane %v1627_v13, 1 }
 0x2d2   : > { %s3023_s25 = spop %1810 }
 0x2d3   : > { %v1629_v46 = vadd.f32 %v1628_v33, %v1627_v13  ;;  %s1813_s7 = spop %1812  ;;  %v575_v37 = vstv %s3023_s25 }
 0x2d4   : > { %s3025_s8 = spop %1814 }
 0x2d5   : > { %1852 = vpush %v1629_v46  ;;  %s3027_s30 = spop %1816 }
 0x2d6   : > { %s3029_s4 = spop %1818  ;;  %s629_s3 = ssub.f32 %s1813_s7, %s3027_s30  ;;  %v915_v8 = vstv %s3027_s30 }
 0x2d7   : > { %s3031_s19 = spop %1820  ;;  %s630_s0 = ssub.f32 %s3025_s8, %s3027_s30  ;;  %v916_v39 = vsel %vm550_vm8, %v915_v8, 0.0  ;;  %v924_v3 = vstv %s3029_s4 }
 0x2d8   : > { %s3034_s29 = spop %1822  ;;  %v918_v18 = vstv %s629_s3  ;;  %s257_s8 = ssub.f32 %s3013_s28, %s3015_s24  ;;  %v925_v58 = vsel %vm562_vm11, %v924_v3, 0.0  ;;  %v927_v62 = vstv %s3031_s19 }
 0x2d9   : > { %v919_v38 = vsel %vm554_vm9, %v918_v18, 0.0  ;;  %v921_v31 = vstv %s630_s0  ;;  %v928_v43 = vsel %vm566_vm12, %v927_v62, 0.0  ;;  %v930_v11 = vstv %s3034_s29  ;;  %s1791_s4 = sshll.u32 %s2116_s13, 7  ;;  %s203_s19 = scalar_lea.vmem [#allocation7], %s1777_s23 }
 0x2da   : > { %v920_v22 = vadd.f32 %v919_v38, %v916_v39  ;;  %v559_v56 = vstv %s257_s8  ;;  %v922_v54 = vsel %vm558_vm10, %v921_v31, 0.0  ;;  %v931_v20 = vsel %vm570_vm13, %v930_v11, 0.0  ;;  %s1670_s29 = sshll.u32 %s203_s19, 4  ;;  %s2079_s8 = smov [#allocation7]   ;;  %s1671_s29 = int_to_ptr.vmem [resolvable:$true] %s1670_s29 }
 0x2db   : > { %v560_v0 = vsel %vm558_vm10, %v559_v56, 0.0 }
 0x2dc   : > { %v923_v42 = vadd.f32 %v922_v54, %v920_v22  ;;  %v561_v12 = vadd.f32 %v560_v0, %v557_v36 }
 0x2de   : > { %v926_v59 = vadd.f32 %v925_v58, %v923_v42  ;;  %v565_v4 = vadd.f32 %v564_v55, %v561_v12 }
 0x2e0   : > { %v929_v14 = vadd.f32 %v928_v43, %v926_v59  ;;  %v569_v29 = vadd.f32 %v568_v48, %v565_v4 }
 0x2e2   : > { %v932_v33 = vadd.f32 %v931_v20, %v929_v14  ;;  %v573_v18 = vadd.f32 %v572_v60, %v569_v29 }
 0x2e6   : > { %s3040_s20 = spop %1824 }
 0x2e7   : > { %s1827_s6 = spop %1826  ;;  %v933_v40 = vstv %s3040_s20 }
 0x2e8   : > { %s1829_s14 = spop %1828  ;;  %v934_v21 = vsel %vm574_vm14, %v933_v40, 0.0 }
 0x2e9   : > { %s1831_s1 = spop %1830  ;;  %v935_v38 = vadd.f32 %v934_v21, %v932_v33 }
 0x2ea   : > { %s987_s7 = ssub.f32 %s1827_s6, %s1831_s1  ;;  %v1273_v30 = vstv %s1831_s1  ;;  %s3047_s18 = spop %1832 }
 0x2eb   : > { %s988_s17 = ssub.f32 %s1829_s14, %s1831_s1  ;;  %s3053_s3 = spop %1834  ;;  %v1274_v61 = vsel %vm550_vm8, %v1273_v30, 0.0  ;;  %v1282_v44 = vstv %s3047_s18  ;;  %v576_v30 = vsel %vm574_vm14, %v575_v37, 0.0 }
 0x2ec   : > { %v1276_v7 = vstv %s987_s7  ;;  %s3058_s30 = spop %1836  ;;  %v1283_v6 = vsel %vm562_vm11, %v1282_v44, 0.0  ;;  %v1285_v5 = vstv %s3053_s3  ;;  %s1668_s7 = scalar_lea.hbm %s3170_s2, %s1791_s4 }
 0x2ed   : > { %v1277_v52 = vsel %vm554_vm9, %v1276_v7, 0.0  ;;  %v1279_v45 = vstv %s988_s17  ;;  %s3066_s1 = spop %1838  ;;  %v1286_v16 = vsel %vm566_vm12, %v1285_v5, 0.0  ;;  %v1288_v28 = vstv %s3058_s30  ;;  %s1657_s17 = scalar_lea.sflag [#allocation4], %s2251_s16 }
 0x2ee   : > { %v1278_v32 = vadd.f32 %v1277_v52, %v1274_v61  ;;  %s1841_s28 = spop %1840  ;;  %v1280_v41 = vsel %vm558_vm10, %v1279_v45, 0.0  ;;  %v1289_v13 = vsel %vm570_vm13, %v1288_v28, 0.0  ;;  %v1291_v8 = vstv %s3066_s1  ;;  %s2001_s3 = scalar_lea.vmem %s1671_s29, 128 }
 0x2ef   : > { %s1843_s24 = spop %1842  ;;  %v1292_v61 = vsel %vm574_vm14, %v1291_v8, 0.0  ;;  %v577_v52 = vadd.f32 %v576_v30, %v573_v18  ;;  %p2002_p13 = scmp.ne.s32.totalorder %s1671_s29, %s2001_s3 }
 0x2f0   : > { %s1845_s0 = spop %1844  ;;  %v1281_v9 = vadd.f32 %v1280_v41, %v1278_v32  ;;  %v937_v32 = vsel %vm936_vm15, %v935_v38, 0.0  ;;  %s2005_s30 = sshll.u32 %s2079_s8, 4  ;;  %s2006_s30 = int_to_ptr.vmem [resolvable:$false] %s2005_s30 }
 0x2f1   : > { %s1345_s5 = ssub.f32 %s1841_s28, %s1845_s0  ;;  %v1631_v57 = vstv %s1845_s0  ;;  %v579_v15 = vsel %vm578_vm0, %v577_v52, 0.0  ;;  %p2003_p12 = pnand %p2002_p13, %p3185_p1 }
 0x2f2   : > { %s1346_s6 = ssub.f32 %s1843_s24, %s1845_s0  ;;  %v1632_v35 = vsel %vm550_vm8, %v1631_v57, 0.0  ;;  %v1284_v50 = vadd.f32 %v1283_v6, %v1281_v9  ;;  %s1847_s18 = spop %1846  ;;  %v938_v54 = vadd.f32 %v937_v32, %v579_v15 }
 0x2f3   : > { %v1634_v17 = vstv %s1345_s5  ;;  %v1640_v49 = vstv %s1847_s18  ;;  %s1849_s26 = spop %1848  ;;  %p2004_p7 = pneg %p2003_p12 }
 0x2f4   : > { %v1635_v24 = vsel %vm554_vm9, %v1634_v17, 0.0  ;;  %v1637_v63 = vstv %s1346_s6  ;;  %v1287_v34 = vadd.f32 %v1286_v16, %v1284_v50  ;;  %v1641_v39 = vsel %vm562_vm11, %v1640_v49, 0.0  ;;  %s2007_s13 = scalar_lea.vmem %s2006_s30, 256  ;;  %p2008_p10 = scmp.lt.s32.totalorder %s1671_s29, %s2006_s30 }
 0x2f5   : > { %v1636_v23 = vadd.f32 %v1635_v24, %v1632_v35  ;;  %v1638_v27 = vsel %vm558_vm10, %v1637_v63, 0.0  ;;  %v1643_v7 = vstv %s1849_s26  ;;  %p2009_p0 = scmp.lt.s32.totalorder %s2007_s13, %s2001_s3 }
 0x2f6   : > { %v1290_v46 = vadd.f32 %v1289_v13, %v1287_v34  ;;  %v1644_v1 = vsel %vm566_vm12, %v1643_v7, 0.0 }
 0x2f7   : > { %v1639_v51 = vadd.f32 %v1638_v27, %v1636_v23  ;;  %p2010_p2 = por %p2009_p0, %p2008_p10 }
 0x2f8   : > { %v1293_v22 = vadd.f32 %v1292_v61, %v1290_v46 }
 0x2f9   : > { %v1642_v2 = vadd.f32 %v1641_v39, %v1639_v51  ;;  %p2011_p4 = pnand %p2010_p2, %p2004_p7 }
 0x2fa   : > { %v1295_v36 = vsel %vm1294_vm1, %v1293_v22, 0.0 }
 0x2fb   : > { %v1645_v45 = vadd.f32 %v1644_v1, %v1642_v2  ;;  %v1296_v42 = vadd.f32 %v1295_v36, %v938_v54 }
 0x2fe   : > { %s1851_s27 = spop %1850 }
 0x2ff   : > { %v1646_v10 = vstv %s1851_s27 }
 0x300   : > { %v1647_v31 = vsel %vm570_vm13, %v1646_v10, 0.0 }
 0x301   : > { %v1648_v56 = vadd.f32 %v1647_v31, %v1645_v45 }
 0x306   : > { %s1853_s25 = spop %1852 }
 0x307   : > { %v1649_v53 = vstv %s1853_s25 }
 0x308   : > { %v1650_v3 = vsel %vm574_vm14, %v1649_v53, 0.0 }
 0x309   : > { %v1651_v41 = vadd.f32 %v1650_v3, %v1648_v56 }
 0x30b   : > { %v1653_v9 = vsel %vm1652_vm2, %v1651_v41, 0.0 }
 0x30c   : > { %v1654_v44 = vadd.f32 %v1653_v9, %v1296_v42 }
 0x30e   : > { %1655 = vst [vmem:[%s203_s19] sm:$0xff] %v1654_v44 }
 0x30f   : > { %2014 = shalt.err (!%p2011_p4)
}
 0x310   : > { %s2015_s1 = scalar_lea.hbm %s1668_s7, 128  ;;  %s2019_s24 = scalar_lea.hbm %s3170_s2, 256 }
 0x311   : > { %p2016_p9 = scmp.ne.s32.totalorder %s1668_s7, %s2015_s1  ;;  %p2020_p5 = scmp.lt.s32.totalorder %s1668_s7, %s3170_s2 }
 0x312   : > { %p2021_p8 = scmp.lt.s32.totalorder %s2019_s24, %s2015_s1 }
 0x313   : > { %p2017_p11 = pnand %p2016_p9, %p3185_p1 }
 0x314   : > { %p2022_p6 = por %p2021_p8, %p2020_p5 }
 0x315   : > { %p2018_p3 = pneg %p2017_p11 }
 0x317   : > { %p2023_p13 = pnand %p2022_p6, %p2018_p3 }
 0x319   : > { %2026 = shalt.err (!%p2023_p13)
}
 0x31a   : > { %1858 = dma.vmem_to_hbm [thread:$0]  (%p3185_p1), %s1671_s29, 128, %s1668_s7, %s1657_s17  }
 0x31b PF: > { %s1682_s6 = sand.u32 1, %s2057_s9   ;;  %p3186_p12 = scmp.ne.s32.totalorder %s3179_s22, 0 }
 0x31c   : > { %p3187_p7 = scmp.ge.s32.totalorder %s2069_s12, 2  ;;  %s1683_s18 = scalar_lea.sflag [#allocation4], %s1682_s6 }
 0x31e   : > { %p1868_p10 = pnand %p3187_p7, %p3186_p12 }
 0x320   : > { %p1869_p0 = pneg %p1868_p10 }
 0x322   : > { %2052 = dma.done.wait (%p1869_p0), %s1683_s18, 128  }
 0x323   : > { %2054 = vsyncadd (%p1869_p0), %s1683_s18, 4294967168  ;;  %s3188_s26 = sld [smem:[#allocation11_spill]]  ;;  %p18_p2 = scmp.ge.s32.totalorder %s2120_s15, 4  }
 0x324   : > { %s3189_s9 = smov %s2061_s10  ;;  %s3190_s10 = smov %s2065_s11 }
 0x325   : > { %s3192_s12 = smov %s2120_s15  ;;  %20 = sbr.rel (!%p18_p2) target bundleno = 10 (0xa), region = 92 }
 0x329   : > { %s3191_s11 = smov %s3188_s26 }
 0x32a   :  { %1688 = vsyncpa [#allocation3], 1 }
 0x32b   :  { %1690 = vsyncpa [#allocation3 + $0x1], 1 }
 0x32c   :  { %1691 = vsyncpa [#allocation6], 1 }
 0x32d   :  { %1693 = vsyncpa [#allocation6 + $0x1], 1 }
 0x32e   :  { %1694 = vsyncpa [#allocation4], 1 }
 0x32f   :  { %1696 = vsyncpa [#allocation4 + $0x1], 1 }

</bundles_post_ra>
